<compile_context>
chip_gen: v7x
topology: tpu7x:2x2x1
jax: 0.10.0
libtpu: 0.0.40
codegen_flags: <defaults>
</compile_context>

<pallas_src>
import functools

import numpy as np

import jax
import jax.numpy as jnp
from jax.experimental import pallas as pl
from jax.experimental.pallas import tpu as pltpu


def _transformer_block_kernel(
    x_ref, mask_ref, ln1_w_ref, ln1_b_ref, w_qkv_ref, dw_qkv_ref, temp_ref,
    w_proj_ref, ln2_w_ref, ln2_b_ref, w_in_ref, dw_ffn_ref, w_out_ref,
    o_ref, *, num_heads, H, W):
    """One batch element: out = x + attn(ln1(x)); out = out + ffn(ln2(out))."""
    f32 = jnp.float32
    HIGH = jax.lax.Precision.HIGHEST
    HW = H * W

    x = x_ref[...].astype(f32)                       # (C, HW), HW on lanes
    C = x.shape[0]
    ch = C // num_heads
    masks = mask_ref[...]                            # (9, HW) zero-pad mask table

    def layernorm(t, w_ref, b_ref):
        # WithBias_LayerNorm over the channel (sublane) axis, per spatial pos.
        mu = jnp.mean(t, axis=0, keepdims=True)                    # (1, HW)
        var = jnp.mean((t - mu) ** 2, axis=0, keepdims=True)       # (1, HW)
        t = (t - mu) * jax.lax.rsqrt(var + 1e-5)
        return t * w_ref[...].astype(f32) + b_ref[...].astype(f32)

    def dwconv3x3(t, w9_ref):
        # 3x3 depthwise conv (padding=1) on the flattened spatial axis:
        # center tap in place, 8 circular lane-shifts (XLU) masked by the
        # precomputed zero-padding table and scaled by per-channel taps.
        w9 = w9_ref[...].astype(f32)                                # (Cn, 9)
        acc = t * w9[:, 4:5]                                        # (0,0) tap
        idx = 0
        for dy in (-1, 0, 1):
            for dx in (-1, 0, 1):
                if not (dy == 0 and dx == 0):
                    off = dy * W + dx
                    shifted = pltpu.roll(t, (-off) % HW, 1)
                    acc = acc + (shifted * masks[idx:idx + 1, :]) * w9[:, idx:idx + 1]
                idx += 1
        return acc

    def matmul(w, t):
        return jnp.dot(w, t, precision=HIGH, preferred_element_type=f32)

    # ---------------- attention branch ----------------
    xn = layernorm(x, ln1_w_ref, ln1_b_ref)
    qkv = dwconv3x3(matmul(w_qkv_ref[...].astype(f32), xn), dw_qkv_ref)  # (3C, HW)

    q = qkv[0:C, :].reshape(num_heads, ch, HW)
    k = qkv[C:2 * C, :].reshape(num_heads, ch, HW)
    v = qkv[2 * C:3 * C, :].reshape(num_heads, ch, HW)

    # F.normalize(dim=-1): x / max(||x||, 1e-12)  ==  x * rsqrt(max(||x||^2, 1e-24))
    q = q * jax.lax.rsqrt(jnp.maximum(jnp.sum(q * q, axis=-1, keepdims=True), 1e-24))
    k = k * jax.lax.rsqrt(jnp.maximum(jnp.sum(k * k, axis=-1, keepdims=True), 1e-24))

    # Batched per-head channel attention (contraction over the spatial axis).
    logits = jnp.einsum("hcn,hdn->hcd", q, k,
                        precision=HIGH, preferred_element_type=f32)     # (h, ch, ch)
    logits = logits * temp_ref[...].astype(f32).reshape(num_heads, 1, 1)
    m = jnp.max(logits, axis=-1, keepdims=True)
    e = jnp.exp(logits - m)
    attn = e * pl.reciprocal(jnp.sum(e, axis=-1, keepdims=True), approx=True)
    attn_out = jnp.einsum("hcd,hdn->hcn", attn, v,
                          precision=HIGH, preferred_element_type=f32)   # (h, ch, HW)
    x = x + matmul(w_proj_ref[...].astype(f32), attn_out.reshape(C, HW))  # residual 1

    # ---------------- feed-forward branch ----------------
    yn = layernorm(x, ln2_w_ref, ln2_b_ref)
    y = dwconv3x3(matmul(w_in_ref[...].astype(f32), yn), dw_ffn_ref)    # (2*hidden, HW)
    hidden = y.shape[0] // 2
    # TODO(synk): PyTorch F.gelu defaults to the exact erf GELU; the tanh
    # approximation is used here (and in the reference) since erf lowering on
    # Mosaic is not guaranteed (max abs deviation ~1e-3).
    y = jax.nn.gelu(y[0:hidden, :], approximate=True) * y[hidden:, :]
    y = matmul(w_out_ref[...].astype(f32), y)                           # (C, HW)

    o_ref[...] = (x + y).astype(o_ref.dtype)                            # residual 2


def transformer_block_forward(x, params, *, num_heads):
    """x: (B, C, H, W) NCHW; params: dict of arrays in PyTorch layouts (bias=False)."""
    B, C, H, W = x.shape
    HW = H * W
    assert HW % 128 == 0, "H*W must be a multiple of 128 for the lane-dense layout"
    assert C % num_heads == 0

    w_qkv = params["w_qkv"]                                         # (3C, C)
    w_dw_qkv = params["w_dw_qkv"].reshape(3 * C, 9)                 # (3C, 3, 3) -> (3C, 9)
    temp = params["temperature"].reshape(num_heads, 1)
    w_proj = params["w_proj"]                                       # (C, C)
    w_in = params["w_in"]                                           # (2*hidden, C)
    w_dw_ffn = params["w_dw_ffn"].reshape(params["w_dw_ffn"].shape[0], 9)
    w_out = params["w_out"]                                         # (C, hidden)
    ln1_w = params["ln1_w"].reshape(C, 1)
    ln1_b = params["ln1_b"].reshape(C, 1)
    ln2_w = params["ln2_w"].reshape(C, 1)
    ln2_b = params["ln2_b"].reshape(C, 1)
    two_hidden = w_in.shape[0]
    hidden = two_hidden // 2
    ch = C // num_heads

    # Precomputed zero-padding masks for the 3x3 depthwise convs on the
    # flattened spatial axis: mask[k, p] = 1 iff tap k of pixel p is in-bounds.
    rows = np.arange(HW) // W
    cols = np.arange(HW) % W
    masks = []
    for dy in (-1, 0, 1):
        for dx in (-1, 0, 1):
            ok = ((rows + dy >= 0) & (rows + dy < H) &
                  (cols + dx >= 0) & (cols + dx < W))
            masks.append(ok.astype(np.float32))
    dw_mask = jnp.asarray(np.stack(masks, axis=0))                  # (9, HW)

    # NCHW flattened is already the lane-dense (B, C, HW) layout: pure reshape,
    # no transposes / extra HBM passes.
    x2d = x.reshape(B, C, HW)

    def bcast_spec(shape):
        return pl.BlockSpec(shape, lambda b, _n=len(shape): (0,) * _n)

    kernel = functools.partial(_transformer_block_kernel,
                               num_heads=num_heads, H=H, W=W)

    # Advisory cost estimate (bandwidth-heavy op) for XLA scheduling.
    flops = B * (
        2 * HW * C * (3 * C)                # qkv 1x1
        + 2 * 9 * HW * (3 * C)              # dw conv on qkv
        + num_heads * 2 * 2 * ch * ch * HW  # q@k^T and attn@v
        + 2 * HW * C * C                    # attn project_out
        + 2 * HW * two_hidden * C           # ffn project_in
        + 2 * 9 * HW * two_hidden           # dw conv on ffn
        + 2 * HW * C * hidden               # ffn project_out
    )
    transcendentals = B * (num_heads * ch * ch + hidden * HW)
    param_bytes = sum(int(np.prod(a.shape)) * 4 for a in
                      (dw_mask, ln1_w, ln1_b, w_qkv, w_dw_qkv, temp, w_proj,
                       ln2_w, ln2_b, w_in, w_dw_ffn, w_out))
    bytes_accessed = 2 * x2d.size * x2d.dtype.itemsize + B * param_bytes

    out = pl.pallas_call(
        kernel,
        out_shape=jax.ShapeDtypeStruct((B, C, HW), x.dtype),
        grid=(B,),
        in_specs=[
            pl.BlockSpec((None, C, HW), lambda b: (b, 0, 0)),       # x, one image
            bcast_spec(dw_mask.shape),
            bcast_spec(ln1_w.shape), bcast_spec(ln1_b.shape),
            bcast_spec(w_qkv.shape), bcast_spec(w_dw_qkv.shape),
            bcast_spec(temp.shape), bcast_spec(w_proj.shape),
            bcast_spec(ln2_w.shape), bcast_spec(ln2_b.shape),
            bcast_spec(w_in.shape), bcast_spec(w_dw_ffn.shape),
            bcast_spec(w_out.shape),
        ],
        out_specs=pl.BlockSpec((None, C, HW), lambda b: (b, 0, 0)),
        compiler_params=pltpu.CompilerParams(
            dimension_semantics=("parallel",)),
        cost_estimate=pl.CostEstimate(
            flops=int(flops), transcendentals=int(transcendentals),
            bytes_accessed=int(bytes_accessed)),
    )(x2d, dw_mask, ln1_w, ln1_b, w_qkv, w_dw_qkv, temp, w_proj,
      ln2_w, ln2_b, w_in, w_dw_ffn, w_out)

    return out.reshape(B, C, H, W)


def transformer_block_reference(x, params, *, num_heads):
    """Pure-JAX reference mirroring the PyTorch TransformerBlock forward."""
    B, C, H, W = x.shape
    HIGH = jax.lax.Precision.HIGHEST

    def layernorm(t, w, b):
        mu = jnp.mean(t, axis=1, keepdims=True)
        var = jnp.mean((t - mu) ** 2, axis=1, keepdims=True)
        return ((t - mu) / jnp.sqrt(var + 1e-5) * w[None, :, None, None]
                + b[None, :, None, None])

    def conv1x1(t, w):
        return jnp.einsum("oc,bchw->bohw", w, t, precision=HIGH)

    def dwconv3x3(t, w):  # w: (Cn, 3, 3)
        return jax.lax.conv_general_dilated(
            t, w[:, None, :, :], window_strides=(1, 1), padding=((1, 1), (1, 1)),
            dimension_numbers=("NCHW", "OIHW", "NCHW"),
            feature_group_count=t.shape[1], precision=HIGH)

    # --- attention ---
    xn = layernorm(x, params["ln1_w"], params["ln1_b"])
    qkv = dwconv3x3(conv1x1(xn, params["w_qkv"]), params["w_dw_qkv"])
    q, k, v = jnp.split(qkv, 3, axis=1)
    ch = C // num_heads
    to_heads = lambda t: t.reshape(B, num_heads, ch, H * W)
    q, k, v = to_heads(q), to_heads(k), to_heads(v)
    q = q / jnp.maximum(jnp.sqrt(jnp.sum(q * q, axis=-1, keepdims=True)), 1e-12)
    k = k / jnp.maximum(jnp.sqrt(jnp.sum(k * k, axis=-1, keepdims=True)), 1e-12)
    attn = jnp.einsum("bhcn,bhdn->bhcd", q, k, precision=HIGH)
    attn = attn * params["temperature"][None, :, None, None]
    attn = jax.nn.softmax(attn, axis=-1)
    out = jnp.einsum("bhcd,bhdn->bhcn", attn, v, precision=HIGH).reshape(B, C, H, W)
    x = x + conv1x1(out, params["w_proj"])

    # --- feed-forward ---
    xn = layernorm(x, params["ln2_w"], params["ln2_b"])
    y = dwconv3x3(conv1x1(xn, params["w_in"]), params["w_dw_ffn"])
    hidden = y.shape[1] // 2
    y1, y2 = y[:, :hidden], y[:, hidden:]
    y = jax.nn.gelu(y1, approximate=True) * y2
    return x + conv1x1(y, params["w_out"])


if __name__ == "__main__":
    # Small shapes consistent with the module: dim=16, 2 heads, 16x16 spatial,
    # ffn_expansion_factor=2, bias=False, LayerNorm_type='WithBias'.
    B, dim, H, W = 2, 16, 16, 16
    num_heads = 2
    ffn_expansion_factor = 2.0
    hidden = int(dim * ffn_expansion_factor)
    # TODO(synk): conv bias terms (bias=True) and the BiasFree LayerNorm variant
    # are not implemented; this instantiation uses bias=False / 'WithBias'.

    key = jax.random.PRNGKey(0)
    ks = jax.random.split(key, 12)
    x = jax.random.normal(ks[0], (B, dim, H, W), dtype=jnp.float32)

    def uinit(k, shape, fan_in):
        bound = 1.0 / (fan_in ** 0.5)
        return jax.random.uniform(k, shape, minval=-bound, maxval=bound,
                                  dtype=jnp.float32)

    params = {
        "ln1_w": 1.0 + 0.1 * jax.random.normal(ks[1], (dim,), jnp.float32),
        "ln1_b": 0.1 * jax.random.normal(ks[2], (dim,), jnp.float32),
        "w_qkv": uinit(ks[3], (3 * dim, dim), dim),
        "w_dw_qkv": uinit(ks[4], (3 * dim, 3, 3), 9),
        "temperature": jax.random.uniform(ks[5], (num_heads,), jnp.float32,
                                          minval=0.5, maxval=1.5),
        "w_proj": uinit(ks[6], (dim, dim), dim),
        "ln2_w": 1.0 + 0.1 * jax.random.normal(ks[7], (dim,), jnp.float32),
        "ln2_b": 0.1 * jax.random.normal(ks[8], (dim,), jnp.float32),
        "w_in": uinit(ks[9], (2 * hidden, dim), dim),
        "w_dw_ffn": uinit(ks[10], (2 * hidden, 3, 3), 9),
        "w_out": uinit(ks[11], (dim, hidden), hidden),
    }

    fwd = jax.jit(functools.partial(transformer_block_forward, num_heads=num_heads))
    out = jax.block_until_ready(fwd(x, params))
    ref = transformer_block_reference(x, params, num_heads=num_heads)

    assert out.shape == x.shape
    max_err = float(jnp.max(jnp.abs(out - ref)))
    assert jnp.allclose(out, ref, atol=2e-2, rtol=2e-2), (
        f"mismatch vs reference: max abs err {max_err}")
    print("KERNEL_OK")
</pallas_src>

<mosaic_0001>
module attributes {stable_mosaic.version = 11 : i64} {
  func.func @_transformer_block_kernel(%arg0: i32, %arg1: memref<1x16x256xf32, #tpu.memory_space<vmem>>, %arg2: memref<9x256xf32, #tpu.memory_space<vmem>>, %arg3: memref<16x1xf32, #tpu.memory_space<vmem>>, %arg4: memref<16x1xf32, #tpu.memory_space<vmem>>, %arg5: memref<48x16xf32, #tpu.memory_space<vmem>>, %arg6: memref<48x9xf32, #tpu.memory_space<vmem>>, %arg7: memref<2x1xf32, #tpu.memory_space<vmem>>, %arg8: memref<16x16xf32, #tpu.memory_space<vmem>>, %arg9: memref<16x1xf32, #tpu.memory_space<vmem>>, %arg10: memref<16x1xf32, #tpu.memory_space<vmem>>, %arg11: memref<64x16xf32, #tpu.memory_space<vmem>>, %arg12: memref<64x9xf32, #tpu.memory_space<vmem>>, %arg13: memref<16x32xf32, #tpu.memory_space<vmem>>, %arg14: memref<1x16x256xf32, #tpu.memory_space<vmem>>) attributes {dimension_semantics = [#tpu.dimension_semantics<parallel>], iteration_bounds = array<i64: 2>, scalar_prefetch = 0 : i64, scratch_operands = 0 : i64, tpu.core_type = #tpu.core_type<tc>, window_params = [{transform_indices = @transform_0, window_bounds = array<i64: 1, 16, 256>}, {pipeline_mode = #tpu.pipeline_mode<synchronous>, transform_indices = @transform_1, window_bounds = array<i64: 9, 256>}, {pipeline_mode = #tpu.pipeline_mode<synchronous>, transform_indices = @transform_2, window_bounds = array<i64: 16, 1>}, {pipeline_mode = #tpu.pipeline_mode<synchronous>, transform_indices = @transform_3, window_bounds = array<i64: 16, 1>}, {pipeline_mode = #tpu.pipeline_mode<synchronous>, transform_indices = @transform_4, window_bounds = array<i64: 48, 16>}, {pipeline_mode = #tpu.pipeline_mode<synchronous>, transform_indices = @transform_5, window_bounds = array<i64: 48, 9>}, {pipeline_mode = #tpu.pipeline_mode<synchronous>, transform_indices = @transform_6, window_bounds = array<i64: 2, 1>}, {pipeline_mode = #tpu.pipeline_mode<synchronous>, transform_indices = @transform_7, window_bounds = array<i64: 16, 16>}, {pipeline_mode = #tpu.pipeline_mode<synchronous>, transform_indices = @transform_8, window_bounds = array<i64: 16, 1>}, {pipeline_mode = #tpu.pipeline_mode<synchronous>, transform_indices = @transform_9, window_bounds = array<i64: 16, 1>}, {pipeline_mode = #tpu.pipeline_mode<synchronous>, transform_indices = @transform_10, window_bounds = array<i64: 64, 16>}, {pipeline_mode = #tpu.pipeline_mode<synchronous>, transform_indices = @transform_11, window_bounds = array<i64: 64, 9>}, {pipeline_mode = #tpu.pipeline_mode<synchronous>, transform_indices = @transform_12, window_bounds = array<i64: 16, 32>}, {transform_indices = @transform_13, window_bounds = array<i64: 1, 16, 256>}]} {
    %c0 = arith.constant 0 : index
    %c0_0 = arith.constant 0 : index
    %c0_1 = arith.constant 0 : index
    %0 = vector.load %arg1[%c0, %c0_0, %c0_1] : memref<1x16x256xf32, #tpu.memory_space<vmem>>, vector<1x16x256xf32>
    %1 = vector.shape_cast %0 : vector<1x16x256xf32> to vector<16x256xf32>
    %c0_2 = arith.constant 0 : index
    %c0_3 = arith.constant 0 : index
    %2 = vector.load %arg2[%c0_2, %c0_3] : memref<9x256xf32, #tpu.memory_space<vmem>>, vector<9x256xf32>
    %cst = arith.constant dense<0.000000e+00> : vector<256xf32>
    %3 = vector.multi_reduction <add>, %1, %cst [0] : vector<16x256xf32> to vector<256xf32>
    %4 = vector.shape_cast %3 : vector<256xf32> to vector<1x256xf32>
    %cst_4 = arith.constant 1.600000e+01 : f32
    %5 = vector.broadcast %cst_4 : f32 to vector<1x256xf32>
    %6 = arith.divf %4, %5 : vector<1x256xf32>
    %7 = vector.broadcast %6 : vector<1x256xf32> to vector<16x256xf32>
    %8 = arith.subf %1, %7 : vector<16x256xf32>
    %9 = arith.mulf %8, %8 : vector<16x256xf32>
    %cst_5 = arith.constant dense<0.000000e+00> : vector<256xf32>
    %10 = vector.multi_reduction <add>, %9, %cst_5 [0] : vector<16x256xf32> to vector<256xf32>
    %11 = vector.shape_cast %10 : vector<256xf32> to vector<1x256xf32>
    %cst_6 = arith.constant 1.600000e+01 : f32
    %12 = vector.broadcast %cst_6 : f32 to vector<1x256xf32>
    %13 = arith.divf %11, %12 : vector<1x256xf32>
    %14 = vector.broadcast %6 : vector<1x256xf32> to vector<16x256xf32>
    %15 = arith.subf %1, %14 : vector<16x256xf32>
    %cst_7 = arith.constant 9.99999974E-6 : f32
    %16 = vector.broadcast %cst_7 : f32 to vector<1x256xf32>
    %17 = arith.addf %13, %16 : vector<1x256xf32>
    %18 = math.rsqrt %17 : vector<1x256xf32>
    %19 = vector.broadcast %18 : vector<1x256xf32> to vector<16x256xf32>
    %20 = arith.mulf %15, %19 : vector<16x256xf32>
    %c0_8 = arith.constant 0 : index
    %c0_9 = arith.constant 0 : index
    %21 = vector.load %arg3[%c0_8, %c0_9] : memref<16x1xf32, #tpu.memory_space<vmem>>, vector<16x1xf32>
    %22 = vector.broadcast %21 : vector<16x1xf32> to vector<16x256xf32>
    %23 = arith.mulf %20, %22 : vector<16x256xf32>
    %c0_10 = arith.constant 0 : index
    %c0_11 = arith.constant 0 : index
    %24 = vector.load %arg4[%c0_10, %c0_11] : memref<16x1xf32, #tpu.memory_space<vmem>>, vector<16x1xf32>
    %25 = vector.broadcast %24 : vector<16x1xf32> to vector<16x256xf32>
    %26 = arith.addf %23, %25 : vector<16x256xf32>
    %c0_12 = arith.constant 0 : index
    %c0_13 = arith.constant 0 : index
    %27 = vector.load %arg5[%c0_12, %c0_13] : memref<48x16xf32, #tpu.memory_space<vmem>>, vector<48x16xf32>
    %cst_14 = arith.constant dense<0.000000e+00> : vector<48x256xf32>
    %28 = tpu.matmul %27, %26, %cst_14 {dimension_numbers = #tpu.dot_dimension_numbers<[1], [0], [0], [1], [0, 0, 1, 1], [], []>, precision = #tpu.contract_precision<fp32>} : vector<48x16xf32>, vector<16x256xf32>, vector<48x256xf32> -> vector<48x256xf32>
    %c0_15 = arith.constant 0 : index
    %c0_16 = arith.constant 0 : index
    %29 = vector.load %arg6[%c0_15, %c0_16] : memref<48x9xf32, #tpu.memory_space<vmem>>, vector<48x9xf32>
    %30 = vector.extract_strided_slice %29 {offsets = [0, 4], sizes = [48, 1], strides = [1, 1]} : vector<48x9xf32> to vector<48x1xf32>
    %31 = vector.broadcast %30 : vector<48x1xf32> to vector<48x256xf32>
    %32 = arith.mulf %28, %31 : vector<48x256xf32>
    %c17_i32 = arith.constant 17 : i32
    %33 = tpu.dynamic_rotate %28 by %c17_i32 dim 1 : vector<48x256xf32>, i32 -> vector<48x256xf32>
    %34 = vector.extract_strided_slice %2 {offsets = [0, 0], sizes = [1, 256], strides = [1, 1]} : vector<9x256xf32> to vector<1x256xf32>
    %35 = vector.broadcast %34 : vector<1x256xf32> to vector<48x256xf32>
    %36 = arith.mulf %33, %35 : vector<48x256xf32>
    %37 = vector.extract_strided_slice %29 {offsets = [0, 0], sizes = [48, 1], strides = [1, 1]} : vector<48x9xf32> to vector<48x1xf32>
    %38 = vector.broadcast %37 : vector<48x1xf32> to vector<48x256xf32>
    %39 = arith.mulf %36, %38 : vector<48x256xf32>
    %40 = arith.addf %32, %39 : vector<48x256xf32>
    %c16_i32 = arith.constant 16 : i32
    %41 = tpu.dynamic_rotate %28 by %c16_i32 dim 1 : vector<48x256xf32>, i32 -> vector<48x256xf32>
    %42 = vector.extract_strided_slice %2 {offsets = [1, 0], sizes = [1, 256], strides = [1, 1]} : vector<9x256xf32> to vector<1x256xf32>
    %43 = vector.broadcast %42 : vector<1x256xf32> to vector<48x256xf32>
    %44 = arith.mulf %41, %43 : vector<48x256xf32>
    %45 = vector.extract_strided_slice %29 {offsets = [0, 1], sizes = [48, 1], strides = [1, 1]} : vector<48x9xf32> to vector<48x1xf32>
    %46 = vector.broadcast %45 : vector<48x1xf32> to vector<48x256xf32>
    %47 = arith.mulf %44, %46 : vector<48x256xf32>
    %48 = arith.addf %40, %47 : vector<48x256xf32>
    %c15_i32 = arith.constant 15 : i32
    %49 = tpu.dynamic_rotate %28 by %c15_i32 dim 1 : vector<48x256xf32>, i32 -> vector<48x256xf32>
    %50 = vector.extract_strided_slice %2 {offsets = [2, 0], sizes = [1, 256], strides = [1, 1]} : vector<9x256xf32> to vector<1x256xf32>
    %51 = vector.broadcast %50 : vector<1x256xf32> to vector<48x256xf32>
    %52 = arith.mulf %49, %51 : vector<48x256xf32>
    %53 = vector.extract_strided_slice %29 {offsets = [0, 2], sizes = [48, 1], strides = [1, 1]} : vector<48x9xf32> to vector<48x1xf32>
    %54 = vector.broadcast %53 : vector<48x1xf32> to vector<48x256xf32>
    %55 = arith.mulf %52, %54 : vector<48x256xf32>
    %56 = arith.addf %48, %55 : vector<48x256xf32>
    %c1_i32 = arith.constant 1 : i32
    %57 = tpu.dynamic_rotate %28 by %c1_i32 dim 1 : vector<48x256xf32>, i32 -> vector<48x256xf32>
    %58 = vector.extract_strided_slice %2 {offsets = [3, 0], sizes = [1, 256], strides = [1, 1]} : vector<9x256xf32> to vector<1x256xf32>
    %59 = vector.broadcast %58 : vector<1x256xf32> to vector<48x256xf32>
    %60 = arith.mulf %57, %59 : vector<48x256xf32>
    %61 = vector.extract_strided_slice %29 {offsets = [0, 3], sizes = [48, 1], strides = [1, 1]} : vector<48x9xf32> to vector<48x1xf32>
    %62 = vector.broadcast %61 : vector<48x1xf32> to vector<48x256xf32>
    %63 = arith.mulf %60, %62 : vector<48x256xf32>
    %64 = arith.addf %56, %63 : vector<48x256xf32>
    %c255_i32 = arith.constant 255 : i32
    %65 = tpu.dynamic_rotate %28 by %c255_i32 dim 1 : vector<48x256xf32>, i32 -> vector<48x256xf32>
    %66 = vector.extract_strided_slice %2 {offsets = [5, 0], sizes = [1, 256], strides = [1, 1]} : vector<9x256xf32> to vector<1x256xf32>
    %67 = vector.broadcast %66 : vector<1x256xf32> to vector<48x256xf32>
    %68 = arith.mulf %65, %67 : vector<48x256xf32>
    %69 = vector.extract_strided_slice %29 {offsets = [0, 5], sizes = [48, 1], strides = [1, 1]} : vector<48x9xf32> to vector<48x1xf32>
    %70 = vector.broadcast %69 : vector<48x1xf32> to vector<48x256xf32>
    %71 = arith.mulf %68, %70 : vector<48x256xf32>
    %72 = arith.addf %64, %71 : vector<48x256xf32>
    %c241_i32 = arith.constant 241 : i32
    %73 = tpu.dynamic_rotate %28 by %c241_i32 dim 1 : vector<48x256xf32>, i32 -> vector<48x256xf32>
    %74 = vector.extract_strided_slice %2 {offsets = [6, 0], sizes = [1, 256], strides = [1, 1]} : vector<9x256xf32> to vector<1x256xf32>
    %75 = vector.broadcast %74 : vector<1x256xf32> to vector<48x256xf32>
    %76 = arith.mulf %73, %75 : vector<48x256xf32>
    %77 = vector.extract_strided_slice %29 {offsets = [0, 6], sizes = [48, 1], strides = [1, 1]} : vector<48x9xf32> to vector<48x1xf32>
    %78 = vector.broadcast %77 : vector<48x1xf32> to vector<48x256xf32>
    %79 = arith.mulf %76, %78 : vector<48x256xf32>
    %80 = arith.addf %72, %79 : vector<48x256xf32>
    %c240_i32 = arith.constant 240 : i32
    %81 = tpu.dynamic_rotate %28 by %c240_i32 dim 1 : vector<48x256xf32>, i32 -> vector<48x256xf32>
    %82 = vector.extract_strided_slice %2 {offsets = [7, 0], sizes = [1, 256], strides = [1, 1]} : vector<9x256xf32> to vector<1x256xf32>
    %83 = vector.broadcast %82 : vector<1x256xf32> to vector<48x256xf32>
    %84 = arith.mulf %81, %83 : vector<48x256xf32>
    %85 = vector.extract_strided_slice %29 {offsets = [0, 7], sizes = [48, 1], strides = [1, 1]} : vector<48x9xf32> to vector<48x1xf32>
    %86 = vector.broadcast %85 : vector<48x1xf32> to vector<48x256xf32>
    %87 = arith.mulf %84, %86 : vector<48x256xf32>
    %88 = arith.addf %80, %87 : vector<48x256xf32>
    %c239_i32 = arith.constant 239 : i32
    %89 = tpu.dynamic_rotate %28 by %c239_i32 dim 1 : vector<48x256xf32>, i32 -> vector<48x256xf32>
    %90 = vector.extract_strided_slice %2 {offsets = [8, 0], sizes = [1, 256], strides = [1, 1]} : vector<9x256xf32> to vector<1x256xf32>
    %91 = vector.broadcast %90 : vector<1x256xf32> to vector<48x256xf32>
    %92 = arith.mulf %89, %91 : vector<48x256xf32>
    %93 = vector.extract_strided_slice %29 {offsets = [0, 8], sizes = [48, 1], strides = [1, 1]} : vector<48x9xf32> to vector<48x1xf32>
    %94 = vector.broadcast %93 : vector<48x1xf32> to vector<48x256xf32>
    %95 = arith.mulf %92, %94 : vector<48x256xf32>
    %96 = arith.addf %88, %95 : vector<48x256xf32>
    %97 = vector.extract_strided_slice %96 {offsets = [0, 0], sizes = [16, 256], strides = [1, 1]} : vector<48x256xf32> to vector<16x256xf32>
    %98 = vector.shape_cast %97 : vector<16x256xf32> to vector<2x8x256xf32>
    %99 = vector.extract_strided_slice %96 {offsets = [16, 0], sizes = [16, 256], strides = [1, 1]} : vector<48x256xf32> to vector<16x256xf32>
    %100 = vector.shape_cast %99 : vector<16x256xf32> to vector<2x8x256xf32>
    %101 = vector.extract_strided_slice %96 {offsets = [32, 0], sizes = [16, 256], strides = [1, 1]} : vector<48x256xf32> to vector<16x256xf32>
    %102 = vector.shape_cast %101 : vector<16x256xf32> to vector<2x8x256xf32>
    %103 = arith.mulf %98, %98 : vector<2x8x256xf32>
    %cst_17 = arith.constant dense<0.000000e+00> : vector<2x8xf32>
    %104 = vector.multi_reduction <add>, %103, %cst_17 [2] : vector<2x8x256xf32> to vector<2x8xf32>
    %105 = vector.shape_cast %104 : vector<2x8xf32> to vector<2x8x1xf32>
    %cst_18 = arith.constant 1.000000e-24 : f32
    %106 = vector.broadcast %cst_18 : f32 to vector<2x8x1xf32>
    %107 = arith.maximumf %105, %106 : vector<2x8x1xf32>
    %108 = math.rsqrt %107 : vector<2x8x1xf32>
    %109 = vector.broadcast %108 : vector<2x8x1xf32> to vector<2x8x256xf32>
    %110 = arith.mulf %98, %109 : vector<2x8x256xf32>
    %111 = arith.mulf %100, %100 : vector<2x8x256xf32>
    %cst_19 = arith.constant dense<0.000000e+00> : vector<2x8xf32>
    %112 = vector.multi_reduction <add>, %111, %cst_19 [2] : vector<2x8x256xf32> to vector<2x8xf32>
    %113 = vector.shape_cast %112 : vector<2x8xf32> to vector<2x8x1xf32>
    %cst_20 = arith.constant 1.000000e-24 : f32
    %114 = vector.broadcast %cst_20 : f32 to vector<2x8x1xf32>
    %115 = arith.maximumf %113, %114 : vector<2x8x1xf32>
    %116 = math.rsqrt %115 : vector<2x8x1xf32>
    %117 = vector.broadcast %116 : vector<2x8x1xf32> to vector<2x8x256xf32>
    %118 = arith.mulf %100, %117 : vector<2x8x256xf32>
    "tpu.trace_start"() <{level = 10 : i32, message = "hcn,hdn->hcd"}> : () -> ()
    %cst_21 = arith.constant dense<0.000000e+00> : vector<2x8x8xf32>
    %119 = tpu.matmul %110, %118, %cst_21 {dimension_numbers = #tpu.dot_dimension_numbers<[2], [2], [1], [1], [0, 0, 0, 1, 1, 1], [0], [0]>, precision = #tpu.contract_precision<fp32>} : vector<2x8x256xf32>, vector<2x8x256xf32>, vector<2x8x8xf32> -> vector<2x8x8xf32>
    "tpu.trace_stop"() : () -> ()
    %c0_22 = arith.constant 0 : index
    %c0_23 = arith.constant 0 : index
    %120 = vector.load %arg7[%c0_22, %c0_23] : memref<2x1xf32, #tpu.memory_space<vmem>>, vector<2x1xf32>
    %121 = vector.shape_cast %120 : vector<2x1xf32> to vector<2x1x1xf32>
    %122 = vector.broadcast %121 : vector<2x1x1xf32> to vector<2x8x8xf32>
    %123 = arith.mulf %119, %122 : vector<2x8x8xf32>
    %cst_24 = arith.constant dense<0xFF800000> : vector<2x8xf32>
    %124 = vector.multi_reduction <maximumf>, %123, %cst_24 [2] : vector<2x8x8xf32> to vector<2x8xf32>
    %125 = vector.shape_cast %124 : vector<2x8xf32> to vector<2x8x1xf32>
    %126 = vector.broadcast %125 : vector<2x8x1xf32> to vector<2x8x8xf32>
    %127 = arith.subf %123, %126 : vector<2x8x8xf32>
    %128 = math.exp %127 : vector<2x8x8xf32>
    %cst_25 = arith.constant dense<0.000000e+00> : vector<2x8xf32>
    %129 = vector.multi_reduction <add>, %128, %cst_25 [2] : vector<2x8x8xf32> to vector<2x8xf32>
    %130 = vector.shape_cast %129 : vector<2x8xf32> to vector<2x8x1xf32>
    %131 = tpu.reciprocal %130 {approx = true} : vector<2x8x1xf32> -> vector<2x8x1xf32>
    %132 = vector.broadcast %131 : vector<2x8x1xf32> to vector<2x8x8xf32>
    %133 = arith.mulf %128, %132 : vector<2x8x8xf32>
    "tpu.trace_start"() <{level = 10 : i32, message = "hcd,hdn->hcn"}> : () -> ()
    %cst_26 = arith.constant dense<0.000000e+00> : vector<2x8x256xf32>
    %134 = tpu.matmul %133, %102, %cst_26 {dimension_numbers = #tpu.dot_dimension_numbers<[2], [1], [1], [2], [0, 0, 0, 1, 1, 2], [0], [0]>, precision = #tpu.contract_precision<fp32>} : vector<2x8x8xf32>, vector<2x8x256xf32>, vector<2x8x256xf32> -> vector<2x8x256xf32>
    "tpu.trace_stop"() : () -> ()
    %c0_27 = arith.constant 0 : index
    %c0_28 = arith.constant 0 : index
    %135 = vector.load %arg8[%c0_27, %c0_28] : memref<16x16xf32, #tpu.memory_space<vmem>>, vector<16x16xf32>
    %136 = vector.shape_cast %134 : vector<2x8x256xf32> to vector<16x256xf32>
    %cst_29 = arith.constant dense<0.000000e+00> : vector<16x256xf32>
    %137 = tpu.matmul %135, %136, %cst_29 {dimension_numbers = #tpu.dot_dimension_numbers<[1], [0], [0], [1], [0, 0, 1, 1], [], []>, precision = #tpu.contract_precision<fp32>} : vector<16x16xf32>, vector<16x256xf32>, vector<16x256xf32> -> vector<16x256xf32>
    %138 = arith.addf %1, %137 : vector<16x256xf32>
    %cst_30 = arith.constant dense<0.000000e+00> : vector<256xf32>
    %139 = vector.multi_reduction <add>, %138, %cst_30 [0] : vector<16x256xf32> to vector<256xf32>
    %140 = vector.shape_cast %139 : vector<256xf32> to vector<1x256xf32>
    %cst_31 = arith.constant 1.600000e+01 : f32
    %141 = vector.broadcast %cst_31 : f32 to vector<1x256xf32>
    %142 = arith.divf %140, %141 : vector<1x256xf32>
    %143 = vector.broadcast %142 : vector<1x256xf32> to vector<16x256xf32>
    %144 = arith.subf %138, %143 : vector<16x256xf32>
    %145 = arith.mulf %144, %144 : vector<16x256xf32>
    %cst_32 = arith.constant dense<0.000000e+00> : vector<256xf32>
    %146 = vector.multi_reduction <add>, %145, %cst_32 [0] : vector<16x256xf32> to vector<256xf32>
    %147 = vector.shape_cast %146 : vector<256xf32> to vector<1x256xf32>
    %cst_33 = arith.constant 1.600000e+01 : f32
    %148 = vector.broadcast %cst_33 : f32 to vector<1x256xf32>
    %149 = arith.divf %147, %148 : vector<1x256xf32>
    %150 = vector.broadcast %142 : vector<1x256xf32> to vector<16x256xf32>
    %151 = arith.subf %138, %150 : vector<16x256xf32>
    %cst_34 = arith.constant 9.99999974E-6 : f32
    %152 = vector.broadcast %cst_34 : f32 to vector<1x256xf32>
    %153 = arith.addf %149, %152 : vector<1x256xf32>
    %154 = math.rsqrt %153 : vector<1x256xf32>
    %155 = vector.broadcast %154 : vector<1x256xf32> to vector<16x256xf32>
    %156 = arith.mulf %151, %155 : vector<16x256xf32>
    %c0_35 = arith.constant 0 : index
    %c0_36 = arith.constant 0 : index
    %157 = vector.load %arg9[%c0_35, %c0_36] : memref<16x1xf32, #tpu.memory_space<vmem>>, vector<16x1xf32>
    %158 = vector.broadcast %157 : vector<16x1xf32> to vector<16x256xf32>
    %159 = arith.mulf %156, %158 : vector<16x256xf32>
    %c0_37 = arith.constant 0 : index
    %c0_38 = arith.constant 0 : index
    %160 = vector.load %arg10[%c0_37, %c0_38] : memref<16x1xf32, #tpu.memory_space<vmem>>, vector<16x1xf32>
    %161 = vector.broadcast %160 : vector<16x1xf32> to vector<16x256xf32>
    %162 = arith.addf %159, %161 : vector<16x256xf32>
    %c0_39 = arith.constant 0 : index
    %c0_40 = arith.constant 0 : index
    %163 = vector.load %arg11[%c0_39, %c0_40] : memref<64x16xf32, #tpu.memory_space<vmem>>, vector<64x16xf32>
    %cst_41 = arith.constant dense<0.000000e+00> : vector<64x256xf32>
    %164 = tpu.matmul %163, %162, %cst_41 {dimension_numbers = #tpu.dot_dimension_numbers<[1], [0], [0], [1], [0, 0, 1, 1], [], []>, precision = #tpu.contract_precision<fp32>} : vector<64x16xf32>, vector<16x256xf32>, vector<64x256xf32> -> vector<64x256xf32>
    %c0_42 = arith.constant 0 : index
    %c0_43 = arith.constant 0 : index
    %165 = vector.load %arg12[%c0_42, %c0_43] : memref<64x9xf32, #tpu.memory_space<vmem>>, vector<64x9xf32>
    %166 = vector.extract_strided_slice %165 {offsets = [0, 4], sizes = [64, 1], strides = [1, 1]} : vector<64x9xf32> to vector<64x1xf32>
    %167 = vector.broadcast %166 : vector<64x1xf32> to vector<64x256xf32>
    %168 = arith.mulf %164, %167 : vector<64x256xf32>
    %c17_i32_44 = arith.constant 17 : i32
    %169 = tpu.dynamic_rotate %164 by %c17_i32_44 dim 1 : vector<64x256xf32>, i32 -> vector<64x256xf32>
    %170 = vector.extract_strided_slice %2 {offsets = [0, 0], sizes = [1, 256], strides = [1, 1]} : vector<9x256xf32> to vector<1x256xf32>
    %171 = vector.broadcast %170 : vector<1x256xf32> to vector<64x256xf32>
    %172 = arith.mulf %169, %171 : vector<64x256xf32>
    %173 = vector.extract_strided_slice %165 {offsets = [0, 0], sizes = [64, 1], strides = [1, 1]} : vector<64x9xf32> to vector<64x1xf32>
    %174 = vector.broadcast %173 : vector<64x1xf32> to vector<64x256xf32>
    %175 = arith.mulf %172, %174 : vector<64x256xf32>
    %176 = arith.addf %168, %175 : vector<64x256xf32>
    %c16_i32_45 = arith.constant 16 : i32
    %177 = tpu.dynamic_rotate %164 by %c16_i32_45 dim 1 : vector<64x256xf32>, i32 -> vector<64x256xf32>
    %178 = vector.extract_strided_slice %2 {offsets = [1, 0], sizes = [1, 256], strides = [1, 1]} : vector<9x256xf32> to vector<1x256xf32>
    %179 = vector.broadcast %178 : vector<1x256xf32> to vector<64x256xf32>
    %180 = arith.mulf %177, %179 : vector<64x256xf32>
    %181 = vector.extract_strided_slice %165 {offsets = [0, 1], sizes = [64, 1], strides = [1, 1]} : vector<64x9xf32> to vector<64x1xf32>
    %182 = vector.broadcast %181 : vector<64x1xf32> to vector<64x256xf32>
    %183 = arith.mulf %180, %182 : vector<64x256xf32>
    %184 = arith.addf %176, %183 : vector<64x256xf32>
    %c15_i32_46 = arith.constant 15 : i32
    %185 = tpu.dynamic_rotate %164 by %c15_i32_46 dim 1 : vector<64x256xf32>, i32 -> vector<64x256xf32>
    %186 = vector.extract_strided_slice %2 {offsets = [2, 0], sizes = [1, 256], strides = [1, 1]} : vector<9x256xf32> to vector<1x256xf32>
    %187 = vector.broadcast %186 : vector<1x256xf32> to vector<64x256xf32>
    %188 = arith.mulf %185, %187 : vector<64x256xf32>
    %189 = vector.extract_strided_slice %165 {offsets = [0, 2], sizes = [64, 1], strides = [1, 1]} : vector<64x9xf32> to vector<64x1xf32>
    %190 = vector.broadcast %189 : vector<64x1xf32> to vector<64x256xf32>
    %191 = arith.mulf %188, %190 : vector<64x256xf32>
    %192 = arith.addf %184, %191 : vector<64x256xf32>
    %c1_i32_47 = arith.constant 1 : i32
    %193 = tpu.dynamic_rotate %164 by %c1_i32_47 dim 1 : vector<64x256xf32>, i32 -> vector<64x256xf32>
    %194 = vector.extract_strided_slice %2 {offsets = [3, 0], sizes = [1, 256], strides = [1, 1]} : vector<9x256xf32> to vector<1x256xf32>
    %195 = vector.broadcast %194 : vector<1x256xf32> to vector<64x256xf32>
    %196 = arith.mulf %193, %195 : vector<64x256xf32>
    %197 = vector.extract_strided_slice %165 {offsets = [0, 3], sizes = [64, 1], strides = [1, 1]} : vector<64x9xf32> to vector<64x1xf32>
    %198 = vector.broadcast %197 : vector<64x1xf32> to vector<64x256xf32>
    %199 = arith.mulf %196, %198 : vector<64x256xf32>
    %200 = arith.addf %192, %199 : vector<64x256xf32>
    %c255_i32_48 = arith.constant 255 : i32
    %201 = tpu.dynamic_rotate %164 by %c255_i32_48 dim 1 : vector<64x256xf32>, i32 -> vector<64x256xf32>
    %202 = vector.extract_strided_slice %2 {offsets = [5, 0], sizes = [1, 256], strides = [1, 1]} : vector<9x256xf32> to vector<1x256xf32>
    %203 = vector.broadcast %202 : vector<1x256xf32> to vector<64x256xf32>
    %204 = arith.mulf %201, %203 : vector<64x256xf32>
    %205 = vector.extract_strided_slice %165 {offsets = [0, 5], sizes = [64, 1], strides = [1, 1]} : vector<64x9xf32> to vector<64x1xf32>
    %206 = vector.broadcast %205 : vector<64x1xf32> to vector<64x256xf32>
    %207 = arith.mulf %204, %206 : vector<64x256xf32>
    %208 = arith.addf %200, %207 : vector<64x256xf32>
    %c241_i32_49 = arith.constant 241 : i32
    %209 = tpu.dynamic_rotate %164 by %c241_i32_49 dim 1 : vector<64x256xf32>, i32 -> vector<64x256xf32>
    %210 = vector.extract_strided_slice %2 {offsets = [6, 0], sizes = [1, 256], strides = [1, 1]} : vector<9x256xf32> to vector<1x256xf32>
    %211 = vector.broadcast %210 : vector<1x256xf32> to vector<64x256xf32>
    %212 = arith.mulf %209, %211 : vector<64x256xf32>
    %213 = vector.extract_strided_slice %165 {offsets = [0, 6], sizes = [64, 1], strides = [1, 1]} : vector<64x9xf32> to vector<64x1xf32>
    %214 = vector.broadcast %213 : vector<64x1xf32> to vector<64x256xf32>
    %215 = arith.mulf %212, %214 : vector<64x256xf32>
    %216 = arith.addf %208, %215 : vector<64x256xf32>
    %c240_i32_50 = arith.constant 240 : i32
    %217 = tpu.dynamic_rotate %164 by %c240_i32_50 dim 1 : vector<64x256xf32>, i32 -> vector<64x256xf32>
    %218 = vector.extract_strided_slice %2 {offsets = [7, 0], sizes = [1, 256], strides = [1, 1]} : vector<9x256xf32> to vector<1x256xf32>
    %219 = vector.broadcast %218 : vector<1x256xf32> to vector<64x256xf32>
    %220 = arith.mulf %217, %219 : vector<64x256xf32>
    %221 = vector.extract_strided_slice %165 {offsets = [0, 7], sizes = [64, 1], strides = [1, 1]} : vector<64x9xf32> to vector<64x1xf32>
    %222 = vector.broadcast %221 : vector<64x1xf32> to vector<64x256xf32>
    %223 = arith.mulf %220, %222 : vector<64x256xf32>
    %224 = arith.addf %216, %223 : vector<64x256xf32>
    %c239_i32_51 = arith.constant 239 : i32
    %225 = tpu.dynamic_rotate %164 by %c239_i32_51 dim 1 : vector<64x256xf32>, i32 -> vector<64x256xf32>
    %226 = vector.extract_strided_slice %2 {offsets = [8, 0], sizes = [1, 256], strides = [1, 1]} : vector<9x256xf32> to vector<1x256xf32>
    %227 = vector.broadcast %226 : vector<1x256xf32> to vector<64x256xf32>
    %228 = arith.mulf %225, %227 : vector<64x256xf32>
    %229 = vector.extract_strided_slice %165 {offsets = [0, 8], sizes = [64, 1], strides = [1, 1]} : vector<64x9xf32> to vector<64x1xf32>
    %230 = vector.broadcast %229 : vector<64x1xf32> to vector<64x256xf32>
    %231 = arith.mulf %228, %230 : vector<64x256xf32>
    %232 = arith.addf %224, %231 : vector<64x256xf32>
    %233 = vector.extract_strided_slice %232 {offsets = [0, 0], sizes = [32, 256], strides = [1, 1]} : vector<64x256xf32> to vector<32x256xf32>
    %234 = arith.mulf %233, %233 : vector<32x256xf32>
    %235 = arith.mulf %233, %234 : vector<32x256xf32>
    %cst_52 = arith.constant 4.471500e-02 : f32
    %236 = vector.broadcast %cst_52 : f32 to vector<32x256xf32>
    %237 = arith.mulf %236, %235 : vector<32x256xf32>
    %238 = arith.addf %233, %237 : vector<32x256xf32>
    %cst_53 = arith.constant 0.797884583 : f32
    %239 = vector.broadcast %cst_53 : f32 to vector<32x256xf32>
    %240 = arith.mulf %239, %238 : vector<32x256xf32>
    %241 = math.tanh %240 : vector<32x256xf32>
    %cst_54 = arith.constant 1.000000e+00 : f32
    %242 = vector.broadcast %cst_54 : f32 to vector<32x256xf32>
    %243 = arith.addf %242, %241 : vector<32x256xf32>
    %cst_55 = arith.constant 5.000000e-01 : f32
    %244 = vector.broadcast %cst_55 : f32 to vector<32x256xf32>
    %245 = arith.mulf %244, %243 : vector<32x256xf32>
    %246 = arith.mulf %233, %245 : vector<32x256xf32>
    %247 = vector.extract_strided_slice %232 {offsets = [32, 0], sizes = [32, 256], strides = [1, 1]} : vector<64x256xf32> to vector<32x256xf32>
    %248 = arith.mulf %246, %247 : vector<32x256xf32>
    %c0_56 = arith.constant 0 : index
    %c0_57 = arith.constant 0 : index
    %249 = vector.load %arg13[%c0_56, %c0_57] : memref<16x32xf32, #tpu.memory_space<vmem>>, vector<16x32xf32>
    %cst_58 = arith.constant dense<0.000000e+00> : vector<16x256xf32>
    %250 = tpu.matmul %249, %248, %cst_58 {dimension_numbers = #tpu.dot_dimension_numbers<[1], [0], [0], [1], [0, 0, 1, 1], [], []>, precision = #tpu.contract_precision<fp32>} : vector<16x32xf32>, vector<32x256xf32>, vector<16x256xf32> -> vector<16x256xf32>
    %251 = arith.addf %138, %250 : vector<16x256xf32>
    %c0_59 = arith.constant 0 : index
    %c0_60 = arith.constant 0 : index
    %c0_61 = arith.constant 0 : index
    %252 = vector.load %arg14[%c0_59, %c0_60, %c0_61] : memref<1x16x256xf32, #tpu.memory_space<vmem>>, vector<1x16x256xf32>
    %253 = vector.shape_cast %252 : vector<1x16x256xf32> to vector<16x256xf32>
    %254 = vector.shape_cast %251 : vector<16x256xf32> to vector<1x16x256xf32>
    tpu.vector_store %arg14[%c0_59, %c0_60, %c0_61], %254 {strides = array<i32>} : memref<1x16x256xf32, #tpu.memory_space<vmem>>, vector<1x16x256xf32>,
    return
  }
  func.func @transform_0(%arg0: i32) -> (i32, i32, i32) {
    %c0_i32 = arith.constant 0 : i32
    %c0_i32_0 = arith.constant 0 : i32
    %c0_i32_1 = arith.constant 0 : i32
    return %arg0, %c0_i32, %c0_i32_0 : i32, i32, i32
  }
  func.func @transform_1(%arg0: i32) -> (i32, i32) {
    %c0_i32 = arith.constant 0 : i32
    %c0_i32_0 = arith.constant 0 : i32
    %c0_i32_1 = arith.constant 0 : i32
    return %c0_i32, %c0_i32_0 : i32, i32
  }
  func.func @transform_2(%arg0: i32) -> (i32, i32) {
    %c0_i32 = arith.constant 0 : i32
    %c0_i32_0 = arith.constant 0 : i32
    %c0_i32_1 = arith.constant 0 : i32
    return %c0_i32, %c0_i32_0 : i32, i32
  }
  func.func @transform_3(%arg0: i32) -> (i32, i32) {
    %c0_i32 = arith.constant 0 : i32
    %c0_i32_0 = arith.constant 0 : i32
    %c0_i32_1 = arith.constant 0 : i32
    return %c0_i32, %c0_i32_0 : i32, i32
  }
  func.func @transform_4(%arg0: i32) -> (i32, i32) {
    %c0_i32 = arith.constant 0 : i32
    %c0_i32_0 = arith.constant 0 : i32
    %c0_i32_1 = arith.constant 0 : i32
    return %c0_i32, %c0_i32_0 : i32, i32
  }
  func.func @transform_5(%arg0: i32) -> (i32, i32) {
    %c0_i32 = arith.constant 0 : i32
    %c0_i32_0 = arith.constant 0 : i32
    %c0_i32_1 = arith.constant 0 : i32
    return %c0_i32, %c0_i32_0 : i32, i32
  }
  func.func @transform_6(%arg0: i32) -> (i32, i32) {
    %c0_i32 = arith.constant 0 : i32
    %c0_i32_0 = arith.constant 0 : i32
    %c0_i32_1 = arith.constant 0 : i32
    return %c0_i32, %c0_i32_0 : i32, i32
  }
  func.func @transform_7(%arg0: i32) -> (i32, i32) {
    %c0_i32 = arith.constant 0 : i32
    %c0_i32_0 = arith.constant 0 : i32
    %c0_i32_1 = arith.constant 0 : i32
    return %c0_i32, %c0_i32_0 : i32, i32
  }
  func.func @transform_8(%arg0: i32) -> (i32, i32) {
    %c0_i32 = arith.constant 0 : i32
    %c0_i32_0 = arith.constant 0 : i32
    %c0_i32_1 = arith.constant 0 : i32
    return %c0_i32, %c0_i32_0 : i32, i32
  }
  func.func @transform_9(%arg0: i32) -> (i32, i32) {
    %c0_i32 = arith.constant 0 : i32
    %c0_i32_0 = arith.constant 0 : i32
    %c0_i32_1 = arith.constant 0 : i32
    return %c0_i32, %c0_i32_0 : i32, i32
  }
  func.func @transform_10(%arg0: i32) -> (i32, i32) {
    %c0_i32 = arith.constant 0 : i32
    %c0_i32_0 = arith.constant 0 : i32
    %c0_i32_1 = arith.constant 0 : i32
    return %c0_i32, %c0_i32_0 : i32, i32
  }
  func.func @transform_11(%arg0: i32) -> (i32, i32) {
    %c0_i32 = arith.constant 0 : i32
    %c0_i32_0 = arith.constant 0 : i32
    %c0_i32_1 = arith.constant 0 : i32
    return %c0_i32, %c0_i32_0 : i32, i32
  }
  func.func @transform_12(%arg0: i32) -> (i32, i32) {
    %c0_i32 = arith.constant 0 : i32
    %c0_i32_0 = arith.constant 0 : i32
    %c0_i32_1 = arith.constant 0 : i32
    return %c0_i32, %c0_i32_0 : i32, i32
  }
  func.func @transform_13(%arg0: i32) -> (i32, i32, i32) {
    %c0_i32 = arith.constant 0 : i32
    %c0_i32_0 = arith.constant 0 : i32
    %c0_i32_1 = arith.constant 0 : i32
    return %arg0, %c0_i32, %c0_i32_0 : i32, i32, i32
  }
}

</mosaic_0001>

<bundles_post_ra>
// kernel: transformer_block_forward.1
= control target key start
LH: loop header
LB: loop body
LE: loop exit
PB: predicated region body
PF: predicated region fallthrough
CT: control target
= control target key end

     0   :  { %s8106_s25 = smov 0   ;;  %s11258_s0 = inlined_call_operand.vmem [shape: f32[2,16,256], index: 0, kind: input, shape index: {}]   ;;  %s11259_s1 = inlined_call_operand.vmem [shape: f32[9,256], index: 1, kind: input, shape index: {}]   ;;  %s11260_s2 = inlined_call_operand.vmem [shape: f32[16,1], index: 2, kind: input, shape index: {}]   ;;  %s11261_s3 = inlined_call_operand.vmem [shape: f32[16,1], index: 3, kind: input, shape index: {}]   ;;  %s11262_s4 = inlined_call_operand.vmem [shape: f32[48,16], index: 4, kind: input, shape index: {}]   ;;  %s11263_s5 = inlined_call_operand.vmem [shape: f32[48,9], index: 5, kind: input, shape index: {}]   ;;  %s11264_s6 = inlined_call_operand.vmem [shape: f32[2,1], index: 6, kind: input, shape index: {}]   ;;  %s11265_s7 = inlined_call_operand.vmem [shape: f32[16,16], index: 7, kind: input, shape index: {}]   ;;  %s11266_s8 = inlined_call_operand.vmem [shape: f32[16,1], index: 8, kind: input, shape index: {}]   ;;  %s11267_s9 = inlined_call_operand.vmem [shape: f32[16,1], index: 9, kind: input, shape index: {}]   ;;  %s11268_s10 = inlined_call_operand.vmem [shape: f32[64,16], index: 10, kind: input, shape index: {}]   ;;  %s11269_s11 = inlined_call_operand.vmem [shape: f32[64,9], index: 11, kind: input, shape index: {}]   ;;  %s11270_s12 = inlined_call_operand.vmem [shape: f32[16,32], index: 12, kind: input, shape index: {}]   ;;  %s11271_s13 = inlined_call_operand.vmem [shape: f32[2,16,256], index: 13, kind: output, shape index: {}]  }
   0x1 LB: > { %s7492_s26 = sadd.s32 4294967295, %s8015_s25   ;;  %p7496_p0 = scmp.ge.s32.totalorder %s8015_s25, 1  ;;  %s8015_s25 = sphi %s8106_s25, %s23_s25  }
   0x2   : > { %p387_p1 = scmp.lt.s32.totalorder %s8015_s25, 3 }
   0x4   : > { %p388_p2 = pnand %p7496_p0, %p387_p1 }
   0x6   : > { %391 = sbr.rel (%p388_p2) target bundleno = 3118 (0xc2e), region = 72 }
   0xd   : > { %v514_v0 = vld [vmem:[%s11261_s3] sm:$0xff]  ;;  %v11288_v2 = vmov 0   ;;  %v515_v3 = vld [vmem:[%s11261_s3 + $0x8] sm:$0xff]  ;;  %v11274_v6 = vmov 0.0   ;;  %p431_p3 = scmp.lt.s32.totalorder %s7492_s26, 1  ;;  %vm536_vm0 = vcmask 130048  }
   0xe   : > { %v498_v1 = vld [vmem:[%s11260_s2] sm:$0xff]  ;;  %7878 = vset.pattern.permute.xlu1 %v11288_v2  ;;  %7877 = vset.pattern.permute.xlu0 %v11288_v2  ;;  %v499_v4 = vld [vmem:[%s11260_s2 + $0x8] sm:$0xff]  ;;  %v532_v62 = vld [vmem:[%s11262_s4 + $0x10] sm:$0xff]  ;;  %s8027_s14 = smov 15   ;;  %s8028_s15 = smov 17   ;;  %vm3203_vm9 = vcmask 64512  }
   0xf   : > { %518 = vperm.xlu1 %7878, %v514_v0   ;;  %502 = vperm.xlu0 %7877, %v498_v1   ;;  %v8131_v5 = vld [vmem:[%s11263_s5] sm:$0xff]  ;;  %s11606_s26 = smov (!%p431_p3, %s7492_s26), 1  ;;  %v531_v55 = vld [vmem:[%s11262_s4 + $0x8] sm:$0xff]  ;;  %s8029_s16 = smov 1   ;;  %vm6830_vm10 = vcmask 261120  }
  0x10   : > { %623 = vmatprep.mubr.f32.mxu0 %v11274_v6  ;;  %667 = vmatprep.mubr.f32.mxu1 %v11274_v6  ;;  %s11318_s20 = sshll.u32 %s11606_s26, 5  ;;  %v530_v53 = vld [vmem:[%s11262_s4] sm:$0xff]  ;;  %v541_v59 = vsel %vm536_vm0, %v531_v55, 0  ;;  %s8030_s17 = smov 16  }
  0x11   : > { %s8144_s23 = scalar_lea.vmem %s11258_s0, %s11318_s20  ;;  %v538_v54 = vsel %vm536_vm0, %v530_v53, 0  ;;  %v8166_v0 = vand.u32 4294901760, %v541_v59  ;;  %s8031_s18 = smov 127  }
  0x12   : > { %v441_v7 = vld [vmem:[%s8144_s23] sm:$0xff]  ;;  %v443_v8 = vld [vmem:[%s8144_s23 + $0x10] sm:$0xff]  ;;  %v442_v9 = vld [vmem:[%s8144_s23 + $0x8] sm:$0xff]  ;;  %v8157_v58 = vand.u32 4294901760, %v538_v54  ;;  %s11321_s19 = smov 113   ;;  %s11319_s21 = smov 112  }
  0x13   : > { %523 = vperm.xlu1 %7878, %v515_v3   ;;  %507 = vperm.xlu0 %7877, %v499_v4   ;;  %v444_v10 = vld [vmem:[%s8144_s23 + $0x18] sm:$0xff]  ;;  %v449_v11 = vadd.f32 %v443_v8, %v441_v7  ;;  %v544_v4 = vsel %vm536_vm0, %v532_v62, 0  ;;  %s8034_s22 = smov 111   ;;  %s11490_s29 = smov 113  }
  0x14   : > { %v456_v12 = vadd.f32 %v444_v10, %v442_v9  ;;  %v8164_v63 = vsub.f32 %v538_v54, %v8157_v58  ;;  %s11492_s30 = smov 112   ;;  %s11600_s28 = sshll.u32 %s11606_s26, 5 }
  0x15   : > { %v450_v13 = vrot.slane %v449_v11, 4  ;;  %s440_s20 = scalar_lea.vmem %s11271_s13, %s11600_s28 }
  0x16   : > { %v457_v14 = vrot.slane %v456_v12, 4 }
  0x17   : > { %1399 = vperm.xlu1 %7878, %v8131_v5   ;;  %v451_v15 = vadd.f32 %v450_v13, %v449_v11  ;;  %v533_v11 = vld [vmem:[%s11262_s4 + $0x18] sm:$0xff]  ;;  %v626_v13 = vand.u32 4294901760, %v8164_v63 }
  0x18   : > { %v458_v16 = vadd.f32 %v457_v14, %v456_v12  ;;  %v534_v12 = vld [vmem:[%s11262_s4 + $0x20] sm:$0xff]  ;;  %v8177_v14 = vsub.f32 %v541_v59, %v8166_v0 }
  0x19   : > { %v452_v17 = vrot.slane %v451_v15, 2 }
  0x1a   : > { %v459_v18 = vrot.slane %v458_v16, 2 }
  0x1b   : > { %v453_v19 = vadd.f32 %v452_v17, %v451_v15 }
  0x1c   : > { %v460_v20 = vadd.f32 %v459_v18, %v458_v16  ;;  %v8179_v18 = vand.u32 4294901760, %v544_v4 }
  0x1d   : > { %v454_v21 = vrot.slane %v453_v19, 1 }
  0x1e   : > { %v461_v22 = vrot.slane %v460_v20, 1 }
  0x1f   : > { %v455_v23 = vadd.f32 %v454_v21, %v453_v19  ;;  %v547_v19 = vsel %vm536_vm0, %v533_v11, 0 }
  0x20   : > { %v462_v24 = vadd.f32 %v461_v22, %v460_v20  ;;  %v550_v20 = vsel %vm536_vm0, %v534_v12, 0 }
  0x21   : > { %v464_v25 = vmul.f32 0.0625, %v455_v23 }
  0x22   : > { %v465_v26 = vmul.f32 0.0625, %v462_v24 }
  0x23   : > { %v466_v27 = vsub.f32 %v441_v7, %v464_v25  ;;  %v468_v28 = vsub.f32 %v443_v8, %v464_v25  ;;  %v535_v25 = vld [vmem:[%s11262_s4 + $0x28] sm:$0xff] }
  0x24   : > { %v467_v29 = vsub.f32 %v442_v9, %v465_v26  ;;  %v469_v30 = vsub.f32 %v444_v10, %v465_v26 }
  0x25   : > { %v470_v31 = vmul.f32 %v466_v27, %v466_v27  ;;  %v472_v32 = vmul.f32 %v468_v28, %v468_v28 }
  0x26   : > { %v471_v33 = vmul.f32 %v467_v29, %v467_v29  ;;  %v473_v34 = vmul.f32 %v469_v30, %v469_v30 }
  0x27   : > { %v474_v35 = vadd.f32 %v472_v32, %v470_v31 }
  0x28   : > { %v481_v36 = vadd.f32 %v473_v34, %v471_v33  ;;  %v8195_v33 = vsub.f32 %v544_v4, %v8179_v18  ;;  %v8197_v34 = vand.u32 4294901760, %v547_v19 }
  0x29   : > { %v475_v37 = vrot.slane %v474_v35, 4 }
  0x2a   : > { %v482_v38 = vrot.slane %v481_v36, 4 }
  0x2b   : > { %v476_v39 = vadd.f32 %v475_v37, %v474_v35  ;;  %v8199_v35 = vand.u32 4294901760, %v550_v20 }
  0x2c   : > { %v483_v40 = vadd.f32 %v482_v38, %v481_v36  ;;  %v553_v36 = vsel %vm536_vm0, %v535_v25, 0  ;;  %v8271_v25 = vld [vmem:[%s11263_s5 + $0x10] sm:$0xff] }
  0x2d   : > { %v477_v41 = vrot.slane %v476_v39, 2 }
  0x2e   : > { %v484_v42 = vrot.slane %v483_v40, 2 }
  0x2f   : > { %v478_v43 = vadd.f32 %v477_v41, %v476_v39 }
  0x30   : > { %v485_v44 = vadd.f32 %v484_v42, %v483_v40 }
  0x31   : > { %v479_v45 = vrot.slane %v478_v43, 1 }
  0x32   : > { %v486_v46 = vrot.slane %v485_v44, 1 }
  0x33   : > { %v480_v47 = vadd.f32 %v479_v45, %v478_v43  ;;  %v8208_v43 = vsub.f32 %v550_v20, %v8199_v35 }
  0x34   : > { %v487_v48 = vadd.f32 %v486_v46, %v485_v44 }
  0x35   : > { %v488_v49 = vmul.f32 0.0625, %v480_v47 }
  0x36   : > { %v489_v50 = vmul.f32 0.0625, %v487_v48  ;;  %v648_v48 = vand.u32 4294901760, %v8195_v33 }
  0x37   : > { %v490_v51 = vadd.f32 1e-05, %v488_v49  ;;  %v8220_v49 = vsub.f32 %v547_v19, %v8197_v34 }
  0x38   : > { %v491_v52 = vadd.f32 1e-05, %v489_v50  ;;  %v8222_v50 = vand.u32 4294901760, %v553_v36 }
  0x39   : > { %7959 = vrsqrt.f32 %v490_v51  ;;  %v670_v51 = vand.u32 4294901760, %v8208_v43 }
  0x3a   : > { %7961 = vrsqrt.f32 %v491_v52 }
  0x43   : > { %v7960_v56 = vpop.eup %7959 }
  0x44   : > { %v7962_v57 = vpop.eup %7961  ;;  %v494_v60 = vmul.f32 %v7960_v56, %v466_v27  ;;  %v496_v9 = vmul.f32 %v7960_v56, %v468_v28  ;;  %v627_v27 = vsub.f32 %v8164_v63, %v626_v13  ;;  %v637_v28 = vand.u32 4294901760, %v8177_v14 }
  0x45   : > { %v495_v61 = vmul.f32 %v7962_v57, %v467_v29  ;;  %v497_v10 = vmul.f32 %v7962_v57, %v469_v30  ;;  %v8236_v56 = vsub.f32 %v553_v36, %v8222_v50  ;;  %v671_v57 = vsub.f32 %v8208_v43, %v670_v51 }
  0x46   : > { %v628_v41 = vand.u32 4294901760, %v627_v27  ;;  %v638_v42 = vsub.f32 %v8177_v14, %v637_v28  ;;  %v11286_v36 = vmov 2  }
  0x47   : > { %v681_v4 = vand.u32 4294901760, %v8236_v56 }
  0x48   : > { %v639_v59 = vand.u32 4294901760, %v638_v42 }
  0x49   : > { %v682_v12 = vsub.f32 %v8236_v56, %v681_v4 }
  0x4b   : > { %v683_v19 = vand.u32 4294901760, %v682_v12 }
  0x8e   : > { %v519_v1 = vpop.permute.xlu1 %518  ;;  %v503_v3 = vpop.permute.xlu0 %502 }
  0x8f   : > { %v510_v7 = vmul.f32 %v503_v3, %v494_v60  ;;  %v511_v8 = vmul.f32 %v503_v3, %v495_v61  ;;  %v659_v3 = vand.u32 4294901760, %v8220_v49 }
  0x91   : > { %v526_v15 = vadd.f32 %v519_v1, %v510_v7  ;;  %v527_v16 = vadd.f32 %v519_v1, %v511_v8  ;;  %v649_v1 = vsub.f32 %v8195_v33, %v648_v48  ;;  %v672_v7 = vand.u32 4294901760, %v671_v57 }
  0x92   : > { %v508_v17 = vpop.permute.xlu0 %507  ;;  %v524_v26 = vpop.permute.xlu1 %523 }
  0x93   : > { %v555_v21 = vand.u32 4294901760, %v527_v16  ;;  %v557_v22 = vand.u32 4294901760, %v526_v15  ;;  %v512_v23 = vmul.f32 %v508_v17, %v496_v9  ;;  %v513_v24 = vmul.f32 %v508_v17, %v497_v10 }
  0x94   : > { %v650_v17 = vand.u32 4294901760, %v649_v1 }
  0x95   : > { %v8190_v29 = vsub.f32 %v527_v16, %v555_v21  ;;  %v8192_v30 = vsub.f32 %v526_v15, %v557_v22  ;;  %v528_v31 = vadd.f32 %v524_v26, %v512_v23  ;;  %v529_v32 = vadd.f32 %v524_v26, %v513_v24 }
  0x96   : > { %v11276_v23 = vmov 7   ;;  %v11290_v26 = vmov 4  }
  0x97   : > { %v559_v37 = vand.u32 4294901760, %v529_v32  ;;  %v561_v38 = vand.u32 4294901760, %v528_v31  ;;  %v692_v39 = vand.u32 4294901760, %v8190_v29  ;;  %v698_v40 = vand.u32 4294901760, %v8192_v30  ;;  %7884 = vset.pattern.permute.xlu0 %v11276_v23 }
  0x98   : > { %2029 = vperm.xlu0 %7884, %v8131_v5  }
  0x99   : > { %v8210_v44 = vsub.f32 %v529_v32, %v559_v37  ;;  %v8212_v45 = vsub.f32 %v528_v31, %v561_v38  ;;  %v8214_v46 = vpack.c.bf16 %v559_v37, %v555_v21  ;;  %v8216_v47 = vpack.c.bf16 %v561_v38, %v557_v22  ;;  %v8302_v32 = vld [vmem:[%s11263_s5 + $0x8] sm:$0xff]  ;;  %v8325_v38 = vld [vmem:[%s11263_s5 + $0x18] sm:$0xff] }
  0x9a   : > { %v693_v52 = vsub.f32 %v8190_v29, %v692_v39  ;;  %v699_v54 = vsub.f32 %v8192_v30, %v698_v40  ;;  %v660_v21 = vsub.f32 %v8220_v49, %v659_v3  ;;  %v11280_v22 = vmov 1  }
  0x9b   : > { %7509 = vmatprep.subr.bf16.mxu0 %v8214_v46  ;;  %7628 = vmatprep.subr.bf16.mxu1 %v8214_v46  ;;  %v704_v53 = vand.u32 4294901760, %v8210_v44  ;;  %v710_v55 = vand.u32 4294901760, %v8212_v45  ;;  %v7516_v20 = vpack.c.bf16 %v8210_v44, %v8190_v29  ;;  %v7518_v27 = vpack.c.bf16 %v8212_v45, %v8192_v30 }
  0x9c   : > { %7511 = vmatpush1.bf16.msra.mxu0 %v8216_v47  ;;  %7629 = vmatpush1.bf16.msra.mxu1 %v8216_v47  ;;  %v694_v8 = vand.u32 4294901760, %v693_v52  ;;  %v700_v10 = vand.u32 4294901760, %v699_v54  ;;  %v661_v24 = vand.u32 4294901760, %v660_v21  ;;  %v11272_v31 = vmov 8   ;;  %v8487_v54 = vpop.permute.xlu1 %1399 }
  0x9d   : > { %v705_v60 = vsub.f32 %v8210_v44, %v704_v53  ;;  %v711_v61 = vsub.f32 %v8212_v45, %v710_v55  ;;  %v8245_v62 = vpack.c.bf16 %v710_v55, %v698_v40  ;;  %7879 = vset.pattern.permute.xlu1 %v11280_v22  ;;  %2037 = vperm.xlu0 %7884, %v8271_v25   ;;  %v11282_v30 = vmov 5  }
  0x9e   : > { %1504 = vperm.xlu1 %7879, %v8131_v5   ;;  %v7524_v37 = vpack.c.bf16 %v704_v53, %v692_v39  ;;  %v11284_v29 = vmov 3  }
  0x9f   : > { %629 = vmatmul.mubr.f32.vlgmr.msra.gmra.mrb[0].mxu0 %v628_v41  ;;  %v706_v9 = vand.u32 4294901760, %v705_v60  ;;  %v712_v11 = vand.u32 4294901760, %v711_v61  ;;  %673 = vmatmul.mubr.f32.vlgmr.msra.gmra.mrb[0].mxu1 %v672_v7 }
  0xa0   : > { %634 = vmatprep.mubr.f32.mxu0 %v11274_v6  ;;  %678 = vmatprep.mubr.f32.mxu1 %v11274_v6 }
  0xa1   : > { %v7512_v15 = vpack.c.bf16 %v706_v9, %v694_v8  ;;  %v7514_v16 = vpack.c.bf16 %v712_v11, %v700_v10  ;;  %7885 = vset.pattern.permute.xlu0 %v11272_v31 }
  0xa2   : > { %7880 = vset.pattern.permute.xlu1 %v11290_v26  ;;  %2134 = vperm.xlu0 %7885, %v8131_v5  }
  0xa3   : > { %640 = vmatmul.mubr.f32.gmra.mrb[2].mxu0 %v639_v59  ;;  %7513 = vmatprep.subr.bf16.mxu0 %v7512_v15 }
  0xa4   : > { %7515 = vmatpush1.bf16.msra.mxu0 %v7514_v16  ;;  %645 = vmatprep.mubr.f32.mxu0 %v11274_v6 }
  0xa5   : > { %7517 = vmatprep.subr.bf16.mxu0 %v7516_v20  ;;  %684 = vmatmul.mubr.f32.gmra.mrb[2].mxu1 %v683_v19 }
  0xa6   : > { %1309 = vperm.xlu1 %7880, %v8271_v25   ;;  %2142 = vperm.xlu0 %7885, %v8271_v25  }
  0xa7   : > { %651 = vmatmul.mubr.f32.gmra.mrb[4].mxu0 %v650_v17 }
  0xa8   : > { %656 = vmatprep.mubr.f32.mxu0 %v11274_v6 }
  0xaa   : > { %7881 = vset.pattern.permute.xlu1 %v11288_v2  ;;  %7886 = vset.pattern.permute.xlu0 %v11290_v26 }
  0xab   : > { %662 = vmatmul.mubr.f32.gmra.mrb[6].mxu0 %v661_v24  ;;  %1407 = vperm.xlu1 %7881, %v8271_v25  }
  0xac   : > { %774 = vmatprep.mubr.f32.mxu0 %v11274_v6  ;;  %1299 = vperm.xlu0 %7886, %v8131_v5  }
  0xaf   : > { %776 = vmatmul.mubr.f32.vlgmr.msra.gmra.mrb[0].mxu0 %v8157_v58  ;;  %7882 = vset.pattern.permute.xlu1 %v11280_v22 }
  0xb0   : > { %7519 = vmatpush1.bf16.msra.mxu0 %v7518_v27  ;;  %781 = vmatprep.mubr.f32.mxu0 %v11274_v6 }
  0xb1   : > { %7521 = vmatprep.subr.bf16.mxu0 %v8214_v46  ;;  %1512 = vperm.xlu1 %7882, %v8271_v25  }
  0xb2   : > { %1304 = vperm.xlu0 %7886, %v8302_v32  }
  0xb3   : > { %783 = vmatmul.mubr.f32.gmra.mrb[2].mxu0 %v8166_v0 }
  0xb4   : > { %788 = vmatprep.mubr.f32.mxu0 %v11274_v6 }
  0xb5   : > { %7883 = vset.pattern.permute.xlu1 %v11282_v30 }
  0xb6   : > { %1819 = vperm.xlu1 %7883, %v8131_v5   ;;  %7887 = vset.pattern.permute.xlu0 %v11286_v36 }
  0xb7   : > { %790 = vmatmul.mubr.f32.gmra.mrb[4].mxu0 %v8179_v18  ;;  %1609 = vperm.xlu0 %7887, %v8131_v5  }
  0xb8   : > { %795 = vmatprep.mubr.f32.mxu0 %v11274_v6 }
  0xba   : > { %7888 = vset.pattern.permute.xlu1 %v11288_v2 }
  0xbb   : > { %797 = vmatmul.mubr.f32.gmra.mrb[6].mxu0 %v8197_v34  ;;  %1403 = vperm.xlu1 %7888, %v8302_v32  }
  0xbc   : > { %802 = vmatprep.mubr.f32.mxu0 %v11274_v6  ;;  %1617 = vperm.xlu0 %7887, %v8271_v25  }
  0xbf   : > { %804 = vmatmul.mubr.f32.gmra.mrb[8].mxu0 %v8199_v35  ;;  %7889 = vset.pattern.permute.xlu1 %v11280_v22 }
  0xc0   : > { %809 = vmatprep.mubr.f32.mxu0 %v11274_v6  ;;  %1508 = vperm.xlu1 %7889, %v8302_v32  }
  0xc1   : > { %1613 = vperm.xlu0 %7887, %v8302_v32  }
  0xc3   : > { %811 = vmatmul.mubr.f32.gmra.mrb[10].mxu0 %v8222_v50 }
  0xc4   : > { %889 = vmatprep.mubr.f32.mxu0 %v11274_v6  ;;  %7890 = vset.pattern.permute.xlu1 %v11290_v26 }
  0xc5   : > { %1314 = vperm.xlu1 %7890, %v8325_v38   ;;  %1621 = vperm.xlu0 %7887, %v8325_v38  }
  0xc7   : > { %892 = vmatmul.mubr.f32.vlgmr.msra.gmra.mrb[0].mxu0 %v8164_v63  ;;  %v11278_v63 = vmov 6  }
  0xc8   : > { %7523 = vmatpush1.bf16.msra.mxu0 %v8216_v47  ;;  %897 = vmatprep.mubr.f32.mxu0 %v11274_v6 }
  0xc9   : > { %7525 = vmatprep.subr.bf16.mxu0 %v7524_v37  ;;  %7891 = vset.pattern.permute.xlu1 %v11288_v2 }
  0xca   : > { %1411 = vperm.xlu1 %7891, %v8325_v38   ;;  %7894 = vset.pattern.permute.xlu0 %v11284_v29 }
  0xcb   : > { %900 = vmatmul.mubr.f32.gmra.mrb[2].mxu0 %v8177_v14  ;;  %1714 = vperm.xlu0 %7894, %v8131_v5  }
  0xcc   : > { %905 = vmatprep.mubr.f32.mxu0 %v11274_v6 }
  0xce   : > { %7892 = vset.pattern.permute.xlu1 %v11280_v22 }
  0xcf   : > { %908 = vmatmul.mubr.f32.gmra.mrb[4].mxu0 %v8195_v33  ;;  %1516 = vperm.xlu1 %7892, %v8325_v38  }
  0xd0   : > { %913 = vmatprep.mubr.f32.mxu0 %v11274_v6  ;;  %1722 = vperm.xlu0 %7894, %v8271_v25  }
  0xd3   : > { %916 = vmatmul.mubr.f32.gmra.mrb[6].mxu0 %v8220_v49  ;;  %7893 = vset.pattern.permute.xlu1 %v11282_v30 }
  0xd4   : > { %921 = vmatprep.mubr.f32.mxu0 %v11274_v6  ;;  %1823 = vperm.xlu1 %7893, %v8302_v32  }
  0xd5   : > { %1718 = vperm.xlu0 %7894, %v8302_v32  }
  0xd7   : > { %924 = vmatmul.mubr.f32.gmra.mrb[8].mxu0 %v8208_v43 }
  0xd8   : > { %929 = vmatprep.mubr.f32.mxu0 %v11274_v6  ;;  %7899 = vset.pattern.permute.xlu1 %v11288_v2 }
  0xd9   : > { %1726 = vperm.xlu0 %7894, %v8325_v38  }
  0xdb   : > { %932 = vmatmul.mubr.f32.gmra.mrb[10].mxu0 %v8236_v56 }
  0xdc   : > { %1006 = vmatprep.mubr.f32.mxu0 %v11274_v6 }
  0xdd   : > { %7895 = vset.pattern.permute.xlu0 %v11282_v30 }
  0xde   : > { %1827 = vperm.xlu0 %7895, %v8271_v25  }
  0xdf   : > { %1010 = vmatmul.mubr.f32.vlgmr.msra.gmra.mrb[0].mxu0 %v626_v13 }
  0xe0   : > { %7527 = vmatpush1.bf16.msra.mxu0 %v8245_v62  ;;  %1015 = vmatprep.mubr.f32.mxu0 %v11274_v6 }
  0xe1   : > { %7529 = vmatprep.subr.bf16.mxu0 %v8214_v46 }
  0xe2   : > { %1831 = vperm.xlu0 %7895, %v8325_v38  }
  0xe3   : > { %1019 = vmatmul.mubr.f32.gmra.mrb[2].mxu0 %v637_v28 }
  0xe4   : > { %1024 = vmatprep.mubr.f32.mxu0 %v11274_v6 }
  0xe6   : > { %7896 = vset.pattern.permute.xlu0 %v11278_v63 }
  0xe7   : > { %1028 = vmatmul.mubr.f32.gmra.mrb[4].mxu0 %v648_v48  ;;  %1924 = vperm.xlu0 %7896, %v8131_v5  }
  0xe8   : > { %1033 = vmatprep.mubr.f32.mxu0 %v11274_v6 }
  0xeb   : > { %1037 = vmatmul.mubr.f32.gmra.mrb[6].mxu0 %v659_v3  ;;  %1932 = vperm.xlu0 %7896, %v8271_v25  }
  0xec   : > { %1042 = vmatprep.mubr.f32.mxu0 %v11274_v6 }
  0xef   : > { %1046 = vmatmul.mubr.f32.gmra.mrb[8].mxu0 %v670_v51  ;;  %1928 = vperm.xlu0 %7896, %v8302_v32  }
  0xf0   : > { %1051 = vmatprep.mubr.f32.mxu0 %v11274_v6 }
  0xf3   : > { %1055 = vmatmul.mubr.f32.gmra.mrb[10].mxu0 %v681_v4 }
  0xf4   : > { %1137 = vmatprep.mubr.f32.mxu0 %v11274_v6 }
  0xf7   : > { %1139 = vmatmul.mubr.f32.vlgmr.msra.gmra.mrb[0].mxu0 %v8157_v58 }
  0xf8   : > { %7531 = vmatpush1.bf16.msra.mxu0 %v8216_v47  ;;  %1144 = vmatprep.mubr.f32.mxu0 %v11274_v6 }
  0xfb   : > { %1146 = vmatmul.mubr.f32.gmra.mrb[2].mxu0 %v8166_v0 }
  0xfc   : > { %1151 = vmatprep.mubr.f32.mxu0 %v11274_v6 }
  0xff   : > { %1153 = vmatmul.mubr.f32.gmra.mrb[4].mxu0 %v8179_v18 }
 0x100   : > { %1158 = vmatprep.mubr.f32.mxu0 %v11274_v6 }
 0x103   : > { %1160 = vmatmul.mubr.f32.gmra.mrb[6].mxu0 %v8197_v34 }
 0x104   : > { %1165 = vmatprep.mubr.f32.mxu0 %v11274_v6 }
 0x107   : > { %1167 = vmatmul.mubr.f32.gmra.mrb[8].mxu0 %v8199_v35 }
 0x108   : > { %1172 = vmatprep.mubr.f32.mxu0 %v11274_v6 }
 0x10b   : > { %1174 = vmatmul.mubr.f32.gmra.mrb[10].mxu0 %v8222_v50 }
 0x10c   : > { %1248 = vmatprep.mubr.f32.mxu0 %v11274_v6 }
 0x10f   : > { %1250 = vmatmul.mubr.f32.vlgmr.msra.gmra.mrb[0].mxu0 %v8157_v58 }
 0x110   : > { %1255 = vmatprep.mubr.f32.mxu0 %v11274_v6 }
 0x113   : > { %1257 = vmatmul.mubr.f32.gmra.mrb[2].mxu0 %v8166_v0 }
 0x114   : > { %1262 = vmatprep.mubr.f32.mxu0 %v11274_v6 }
 0x117   : > { %1264 = vmatmul.mubr.f32.gmra.mrb[4].mxu0 %v8179_v18  ;;  %v8438_v42 = vpop.permute.xlu0 %2029 }
 0x118   : > { %1269 = vmatprep.mubr.f32.mxu0 %v11274_v6 }
 0x11b   : > { %1271 = vmatmul.mubr.f32.gmra.mrb[6].mxu0 %v8197_v34 }
 0x11c   : > { %1276 = vmatprep.mubr.f32.mxu0 %v11274_v6 }
 0x11d   : > { %v8494_v56 = vpop.permute.xlu1 %1504 }
 0x11f   : > { %1278 = vmatmul.mubr.f32.gmra.mrb[8].mxu0 %v8199_v35 }
 0x120   : > { %1283 = vmatprep.mubr.f32.mxu0 %v11274_v6 }
 0x123   : > { %1285 = vmatmul.mubr.f32.gmra.mrb[10].mxu0 %v8222_v50  ;;  %v8456_v50 = vpop.permute.xlu0 %2037 }
 0x124   : > { %5196 = vmatprep.mubr.f32.mxu0 %v11274_v6  ;;  %11403 = vst [vmem:[#allocation8_spill] sm:$0xff] %v8456_v50  ;;  %v8616_v6 = vld [vmem:[%s11259_s1] sm:$0xff] }
 0x125   : > { %v8502_v59 = vpop.permute.xlu1 %1309 }
 0x127   : > { %v8462_v51 = vpop.permute.xlu0 %2134 }
 0x12a   : > { %v8511_v61 = vpop.permute.xlu1 %1407 }
 0x12b   : > { %v8472_v52 = vpop.permute.xlu0 %2142 }
 0x12c   : > { %11404 = vst [vmem:[#allocation9_spill] sm:$0xff] %v8472_v52 }
 0x12f   : > { %v8478_v53 = vpop.permute.xlu0 %1299 }
 0x130   : > { %v8522_v1 = vpop.permute.xlu1 %1512 }
 0x133   : > { %v8489_v55 = vpop.permute.xlu0 %1304 }
 0x135   : > { %v8532_v4 = vpop.permute.xlu1 %1819 }
 0x137   : > { %v8496_v57 = vpop.permute.xlu0 %1609 }
 0x13a   : > { %v8540_v8 = vpop.permute.xlu1 %1403 }
 0x13b   : > { %v8506_v60 = vpop.permute.xlu0 %1617 }
 0x13f   : > { %v8548_v10 = vpop.permute.xlu1 %1508 }
 0x140   : > { %v8515_v62 = vpop.permute.xlu0 %1613 }
 0x144   : > { %v8526_v3 = vpop.permute.xlu0 %1621  ;;  %v8554_v12 = vpop.permute.xlu1 %1314 }
 0x145   : > { %11405 = vst [vmem:[#allocation10_spill] sm:$0xff] %v8526_v3  ;;  %11406 = vst [vmem:[#allocation11_spill] sm:$0xff] %v8554_v12 }
 0x149   : > { %v8562_v16 = vpop.permute.xlu1 %1411 }
 0x14a   : > { %v8536_v7 = vpop.permute.xlu0 %1714  ;;  %11408 = vst [vmem:[#allocation13_spill] sm:$0xff] %v8562_v16 }
 0x14e   : > { %v8568_v19 = vpop.permute.xlu1 %1516 }
 0x14f   : > { %v8544_v9 = vpop.permute.xlu0 %1722  ;;  %11409 = vst [vmem:[#allocation14_spill] sm:$0xff] %v8568_v19 }
 0x153   : > { %v8576_v21 = vpop.permute.xlu1 %1823 }
 0x154   : > { %v8550_v11 = vpop.permute.xlu0 %1718 }
 0x158   : > { %v8556_v15 = vpop.permute.xlu0 %1726 }
 0x159   : > { %11407 = vst [vmem:[#allocation12_spill] sm:$0xff] %v8556_v15 }
 0x15d   : > { %v8564_v17 = vpop.permute.xlu0 %1827 }
 0x161   : > { %v8570_v20 = vpop.permute.xlu0 %1831 }
 0x162   : > { %11410 = vst [vmem:[#allocation15_spill] sm:$0xff] %v8570_v20 }
 0x166   : > { %v8578_v24 = vpop.permute.xlu0 %1924 }
 0x16a   : > { %v8582_v27 = vpop.permute.xlu0 %1932 }
 0x16b   : > { %11411 = vst [vmem:[#allocation16_spill] sm:$0xff] %v8582_v27 }
 0x16e   : > { %v8590_v37 = vpop.permute.xlu0 %1928 }
 0x172   : > { %v674_v5 = vpop.f32.mrb[0].mxu1 }
 0x173   : > { %v676_v58 = vpop.f32.mrb[1].mxu1 }
 0x178   : > { %v685_v0 = vpop.f32.mrb[2].mxu1 }
 0x179   : > { %v687_v13 = vpop.f32.mrb[3].mxu1 }
 0x1e2   : > { %v8406_v14 = vpop.f32.mrb[0].mxu0 }
 0x1e3   : > { %1551 = vrot.lane.b32.xlu1 %v8406_v14, %s8027_s14  ;;  %1339 = vrot.lane.b32.xlu0 %v8406_v14, %s8028_s15  ;;  %v8412_v18 = vpop.f32.mrb[1].mxu0 }
 0x1e6   : > { %v8414_v28 = vpop.f32.mrb[2].mxu0 }
 0x1e7   : > { %1656 = vrot.lane.b32.xlu1 %v8406_v14, %s8029_s16  ;;  %1446 = vrot.lane.b32.xlu0 %v8406_v14, %s8030_s17  ;;  %v8420_v33 = vpop.f32.mrb[3].mxu0 }
 0x1ea   : > { %v8422_v34 = vpop.f32.mrb[4].mxu0 }
 0x1eb   : > { %1761 = vrot.lane.b32.xlu1 %v8406_v14, %s8031_s18  ;;  %1563 = vrot.lane.b32.xlu0 %v8412_v18, %s8027_s14  ;;  %v8428_v35 = vpop.f32.mrb[5].mxu0 }
 0x1ee   : > { %v8430_v39 = vpop.f32.mrb[6].mxu0 }
 0x1ef   : > { %11397 = vst [vmem:[#allocation2_spill] sm:$0xff] %v8430_v39  ;;  %1866 = vrot.lane.b32.xlu1 %v8406_v14, %s11321_s19  ;;  %1341 = vrot.lane.b32.xlu0 %v8414_v28, %s8028_s15  ;;  %v8436_v40 = vpop.f32.mrb[7].mxu0 }
 0x1f0   : > { %11398 = vst [vmem:[#allocation3_spill] sm:$0xff] %v8436_v40 }
 0x1f2   : > { %v1279_v41 = vpop.f32.mrb[8].mxu0 }
 0x1f3   : > { %v8440_v43 = vadd.f32 %v1279_v41, %v674_v5  ;;  %1971 = vrot.lane.b32.xlu1 %v8406_v14, %s11319_s21  ;;  %1448 = vrot.lane.b32.xlu0 %v8414_v28, %s8030_s17  ;;  %v1281_v44 = vpop.f32.mrb[9].mxu0  ;;  %v1363_v5 = vlaneseq }
 0x1f4   : > { %v8446_v45 = vadd.f32 %v1281_v44, %v676_v58 }
 0x1f5   : > { %11399 = vst [vmem:[#allocation4_spill] sm:$0xff] %v8440_v43 }
 0x1f6   : > { %11400 = vst [vmem:[#allocation5_spill] sm:$0xff] %v8446_v45  ;;  %v1286_v46 = vpop.f32.mrb[10].mxu0 }
 0x1f7   : > { %v8448_v47 = vadd.f32 %v1286_v46, %v685_v0  ;;  %2076 = vrot.lane.b32.xlu1 %v8406_v14, %s8034_s22  ;;  %1565 = vrot.lane.b32.xlu0 %v8420_v33, %s8027_s14  ;;  %v1288_v48 = vpop.f32.mrb[11].mxu0 }
 0x1f8   : > { %v8454_v49 = vadd.f32 %v1288_v48, %v687_v13  ;;  %v8600_v13 = vshrl.u32 %v1363_v5, 7  ;;  %v8609_v48 = vand.u32 127, %v1363_v5 }
 0x1f9   : > { %11401 = vst [vmem:[#allocation6_spill] sm:$0xff] %v8448_v47 }
 0x1fa   : > { %11402 = vst [vmem:[#allocation7_spill] sm:$0xff] %v8454_v49  ;;  %11412 = vst [vmem:[#allocation17_spill] sm:$0xff] %v8600_v13  ;;  %v8607_v44 = vsub.s32 0, %v8600_v13  ;;  %vm1365_vm1 = vcmp.lt.s32.totalorder %v8609_v48, 17  ;;  %v1485_v22 = vsub.s32 1, %v8600_v13  ;;  %v1590_v30 = vsub.s32 2, %v8600_v13 }
 0x1fb   : > { %1351 = vrot.lane.b32.xlu1 %v8412_v18, %s8028_s15  ;;  %1343 = vrot.lane.b32.xlu0 %v8422_v34, %s8028_s15  ;;  %vm1470_vm2 = vcmp.lt.s32.totalorder %v8609_v48, 16  ;;  %vm1575_vm3 = vcmp.lt.s32.totalorder %v8609_v48, 15  ;;  %vm1680_vm4 = vcmp.lt.s32.totalorder %v8609_v48, 1  ;;  %vm1785_vm5 = vcmp.lt.s32.totalorder %v8609_v48, 127 }
 0x1fc   : > { %11413 = vst [vmem:[#allocation18_spill] sm:$0xff] %v8607_v44  ;;  %v8628_v5 = vrot.slane %v8616_v6, %v8607_v44  ;;  %v8647_v45 = vrot.slane %v8616_v6, %v1485_v22  ;;  %v8653_v43 = vrot.slane %v8616_v6, %v1590_v30  ;;  %vm1890_vm6 = vcmp.lt.s32.totalorder %v8609_v48, 113 }
 0x1fd   : > { %vm1995_vm7 = vcmp.lt.s32.totalorder %v8609_v48, 112  ;;  %vm2100_vm8 = vcmp.lt.s32.totalorder %v8609_v48, 111 }
 0x1ff   : > { %1458 = vrot.lane.b32.xlu1 %v8412_v18, %s8030_s17  ;;  %1765 = vrot.lane.b32.xlu0 %v8422_v34, %s8031_s18 }
 0x203   : > { %1668 = vrot.lane.b32.xlu1 %v8412_v18, %s8029_s16  ;;  %1870 = vrot.lane.b32.xlu0 %v8422_v34, %s11321_s19 }
 0x207   : > { %1773 = vrot.lane.b32.xlu1 %v8412_v18, %s8031_s18  ;;  %2080 = vrot.lane.b32.xlu0 %v8422_v34, %s8034_s22 }
 0x20b   : > { %1878 = vrot.lane.b32.xlu1 %v8412_v18, %s11321_s19  ;;  %1936 = vperm.xlu0 %7896, %v8325_v38  }
 0x20f   : > { %1983 = vrot.lane.b32.xlu1 %v8412_v18, %s11319_s21  ;;  %7897 = vset.pattern.permute.xlu0 %v11276_v23  ;;  %v8621_v23 = vld [vmem:[%s11259_s1 + $0x8] sm:$0xff] }
 0x210   : > { %2033 = vperm.xlu0 %7897, %v8302_v32   ;;  %v8632_v63 = vrot.slane %v8621_v23, %v8607_v44  ;;  %v8650_v20 = vrot.slane %v8621_v23, %v1485_v22  ;;  %v8656_v15 = vrot.slane %v8621_v23, %v1590_v30 }
 0x213   : > { %2088 = vrot.lane.b32.xlu1 %v8412_v18, %s8034_s22 }
 0x214   : > { %2041 = vperm.xlu0 %7897, %v8325_v38  }
 0x217   : > { %1553 = vrot.lane.b32.xlu1 %v8414_v28, %s8027_s14 }
 0x218   : > { %7898 = vset.pattern.permute.xlu0 %v11272_v31 }
 0x219   : > { %2138 = vperm.xlu0 %7898, %v8302_v32  }
 0x21b   : > { %1658 = vrot.lane.b32.xlu1 %v8414_v28, %s8029_s16 }
 0x21d   : > { %2146 = vperm.xlu0 %7898, %v8325_v38  }
 0x21f   : > { %1763 = vrot.lane.b32.xlu1 %v8414_v28, %s8031_s18 }
 0x221   : > { %1345 = vrot.lane.b32.xlu0 %v8430_v39, %s8028_s15 }
 0x222   : > { %7900 = vset.pattern.permute.xlu0 %v11288_v2 }
 0x223   : > { %1868 = vrot.lane.b32.xlu1 %v8414_v28, %s11321_s19 }
 0x225   : > { %1767 = vrot.lane.b32.xlu0 %v8430_v39, %s8031_s18 }
 0x227   : > { %1353 = vrot.lane.b32.xlu1 %v8420_v33, %s8028_s15 }
 0x229   : > { %1872 = vrot.lane.b32.xlu0 %v8430_v39, %s11321_s19 }
 0x22b   : > { %1460 = vrot.lane.b32.xlu1 %v8420_v33, %s8030_s17 }
 0x22d   : > { %2082 = vrot.lane.b32.xlu0 %v8430_v39, %s8034_s22 }
 0x22f   : > { %1670 = vrot.lane.b32.xlu1 %v8420_v33, %s8029_s16 }
 0x233   : > { %1775 = vrot.lane.b32.xlu1 %v8420_v33, %s8031_s18 }
 0x237   : > { %1880 = vrot.lane.b32.xlu1 %v8420_v33, %s11321_s19 }
 0x23b   : > { %1450 = vrot.lane.b32.xlu1 %v8422_v34, %s8030_s17 }
 0x23f   : > { %1555 = vrot.lane.b32.xlu1 %v8422_v34, %s8027_s14 }
 0x243   : > { %1660 = vrot.lane.b32.xlu1 %v8422_v34, %s8029_s16 }
 0x247   : > { %1975 = vrot.lane.b32.xlu1 %v8422_v34, %s11319_s21 }
 0x24b   : > { %1973 = vrot.lane.b32.xlu1 %v8414_v28, %s11319_s21 }
 0x24f   : > { %1985 = vrot.lane.b32.xlu1 %v8420_v33, %s11319_s21 }
 0x253   : > { %2078 = vrot.lane.b32.xlu1 %v8414_v28, %s8034_s22 }
 0x255   : > { %v1552_v25 = vpop.permute.xlu1 %1551  ;;  %v1340_v0 = vpop.permute.xlu0 %1339 }
 0x257   : > { %2090 = vrot.lane.b32.xlu1 %v8420_v33, %s8034_s22 }
 0x259   : > { %v8586_v32 = vpop.permute.xlu1 %1656  ;;  %v1447_v46 = vpop.permute.xlu0 %1446 }
 0x25b   : > { %1355 = vrot.lane.b32.xlu1 %v8428_v35, %s8028_s15 }
 0x25d   : > { %v8592_v38 = vpop.permute.xlu1 %1761  ;;  %v1564_v26 = vpop.permute.xlu0 %1563 }
 0x25f   : > { %1462 = vrot.lane.b32.xlu1 %v8428_v35, %s8030_s17 }
 0x261   : > { %v8596_v58 = vpop.permute.xlu1 %1866 }
 0x263   : > { %1567 = vrot.lane.b32.xlu1 %v8428_v35, %s8027_s14 }
 0x265   : > { %v8602_v41 = vpop.permute.xlu1 %1971 }
 0x267   : > { %1672 = vrot.lane.b32.xlu1 %v8428_v35, %s8029_s16 }
 0x269   : > { %v8611_v31 = vpop.permute.xlu1 %2076 }
 0x26b   : > { %1777 = vrot.lane.b32.xlu1 %v8428_v35, %s8031_s18 }
 0x26d   : > { %v1352_v29 = vpop.permute.xlu1 %1351 }
 0x26e   : > { %v1366_v36 = vsel %vm1365_vm1, %v1340_v0, %v1352_v29  ;;  %v1372_v2 = vsel %vm1365_vm1, %v1352_v29, %v1340_v0  ;;  %v1582_v0 = vsel %vm1575_vm3, %v1564_v26, %v1552_v25 }
 0x26f   : > { %v1386_v49 = vmul.f32 %v8628_v5, %v1372_v2  ;;  %v1387_v47 = vmul.f32 %v8632_v63, %v1366_v36  ;;  %1882 = vrot.lane.b32.xlu1 %v8428_v35, %s11321_s19  ;;  %v1695_v2 = vsub.s32 3, %v8600_v13  ;;  %v1576_v36 = vsel %vm1575_vm3, %v1552_v25, %v1564_v26 }
 0x270   : > { %v1327_v26 = vmul.f32 %v8478_v53, %v8406_v14  ;;  %v1800_v25 = vsub.s32 5, %v8600_v13 }
 0x271   : > { %v1459_v29 = vpop.permute.xlu1 %1458  ;;  %v1422_v19 = vmul.f32 %v8487_v54, %v1386_v49  ;;  %v1423_v30 = vmul.f32 %v8487_v54, %v1387_v47  ;;  %v1328_v49 = vmul.f32 %v8478_v53, %v8412_v18  ;;  %v8686_v44 = vrot.slane %v8616_v6, %v1695_v2 }
 0x272   : > { %v1471_v3 = vsel %vm1470_vm2, %v1447_v46, %v1459_v29  ;;  %v1477_v22 = vsel %vm1470_vm2, %v1459_v29, %v1447_v46  ;;  %v1905_v46 = vsub.s32 6, %v8600_v13  ;;  %v1596_v29 = vmul.f32 %v8653_v43, %v1582_v0 }
 0x273   : > { %v1491_v12 = vmul.f32 %v8647_v45, %v1477_v22  ;;  %v1492_v16 = vmul.f32 %v8650_v20, %v1471_v3  ;;  %1987 = vrot.lane.b32.xlu1 %v8428_v35, %s11319_s21  ;;  %v1597_v22 = vmul.f32 %v8656_v15, %v1576_v36  ;;  %v8689_v14 = vrot.slane %v8621_v23, %v1695_v2 }
 0x274   : > { %v1434_v52 = vadd.f32 %v1422_v19, %v1327_v26  ;;  %v1435_v50 = vadd.f32 %v1423_v30, %v1328_v49  ;;  %v8704_v19 = vrot.slane %v8621_v23, %v1800_v25  ;;  %v8707_v36 = vrot.slane %v8616_v6, %v1905_v46 }
 0x275   : > { %v1527_v47 = vmul.f32 %v8494_v56, %v1491_v12  ;;  %v1528_v54 = vmul.f32 %v8494_v56, %v1492_v16  ;;  %v1669_v3 = vpop.permute.xlu1 %1668  ;;  %v8701_v56 = vrot.slane %v8616_v6, %v1800_v25  ;;  %v1633_v26 = vmul.f32 %v8496_v57, %v1597_v22 }
 0x276   : > { %v1681_v18 = vsel %vm1680_vm4, %v8586_v32, %v1669_v3  ;;  %v1687_v53 = vsel %vm1680_vm4, %v1669_v3, %v8586_v32  ;;  %v8722_v25 = vrot.slane %v8621_v23, %v1905_v46  ;;  %v2010_v49 = vsub.s32 7, %v8600_v13 }
 0x277   : > { %2092 = vrot.lane.b32.xlu1 %v8428_v35, %s8034_s22  ;;  %v1539_v12 = vadd.f32 %v1527_v47, %v1434_v52  ;;  %v1540_v16 = vadd.f32 %v1528_v54, %v1435_v50  ;;  %v1701_v0 = vmul.f32 %v8686_v44, %v1687_v53  ;;  %v1702_v32 = vmul.f32 %v8689_v14, %v1681_v18 }
 0x278   : > { %v1632_v50 = vmul.f32 %v8496_v57, %v1596_v29 }
 0x279   : > { %v1774_v2 = vpop.permute.xlu1 %1773  ;;  %v1645_v54 = vadd.f32 %v1633_v26, %v1540_v16  ;;  %v1737_v29 = vmul.f32 %v8536_v7, %v1701_v0  ;;  %v1738_v57 = vmul.f32 %v8536_v7, %v1702_v32  ;;  %v8741_v16 = vrot.slane %v8616_v6, %v2010_v49 }
 0x27a   : > { %v1786_v30 = vsel %vm1785_vm5, %v8592_v38, %v1774_v2  ;;  %v1792_v52 = vsel %vm1785_vm5, %v1774_v2, %v8592_v38  ;;  %v1644_v47 = vadd.f32 %v1632_v50, %v1539_v12  ;;  %v8744_v7 = vrot.slane %v8621_v23, %v2010_v49 }
 0x27b   : > { %1452 = vrot.lane.b32.xlu1 %v8430_v39, %s8030_s17  ;;  %v1806_v3 = vmul.f32 %v8701_v56, %v1786_v30  ;;  %v1807_v38 = vmul.f32 %v8704_v19, %v1792_v52  ;;  %v1750_v30 = vadd.f32 %v1738_v57, %v1645_v54 }
 0x27c   : > { %v1749_v32 = vadd.f32 %v1737_v29, %v1644_v47 }
 0x27d   : > { %v1879_v18 = vpop.permute.xlu1 %1878  ;;  %v1842_v2 = vmul.f32 %v8532_v4, %v1806_v3  ;;  %v1843_v0 = vmul.f32 %v8532_v4, %v1807_v38  ;;  %v8764_v4 = vld [vmem:[%s11259_s1 + $0x10] ss:$0 sm:$0xff] }
 0x27e   : > { %v1891_v46 = vsel %vm1890_vm6, %v8596_v58, %v1879_v18  ;;  %v1897_v22 = vsel %vm1890_vm6, %v1879_v18, %v8596_v58 }
 0x27f   : > { %v1911_v53 = vmul.f32 %v8707_v36, %v1891_v46  ;;  %v1912_v12 = vmul.f32 %v8722_v25, %v1897_v22  ;;  %1557 = vrot.lane.b32.xlu1 %v8430_v39, %s8027_s14  ;;  %v1854_v47 = vadd.f32 %v1842_v2, %v1749_v32  ;;  %v1855_v54 = vadd.f32 %v1843_v0, %v1750_v30 }
 0x281   : > { %v1984_v58 = vpop.permute.xlu1 %1983  ;;  %v1947_v23 = vmul.f32 %v8578_v24, %v1911_v53  ;;  %v1948_v50 = vmul.f32 %v8578_v24, %v1912_v12 }
 0x282   : > { %v1996_v52 = vsel %vm1995_vm7, %v8602_v41, %v1984_v58  ;;  %v2002_v6 = vsel %vm1995_vm7, %v1984_v58, %v8602_v41  ;;  %v8769_v41 = vld [vmem:[%s11259_s1 + $0x18] ss:$0 sm:$0xff] }
 0x283   : > { %v2016_v26 = vmul.f32 %v8741_v16, %v1996_v52  ;;  %v2017_v49 = vmul.f32 %v8744_v7, %v2002_v6  ;;  %1662 = vrot.lane.b32.xlu1 %v8430_v39, %s8029_s16  ;;  %v1959_v57 = vadd.f32 %v1947_v23, %v1854_v47  ;;  %v1960_v46 = vadd.f32 %v1948_v50, %v1855_v54  ;;  %v1342_v50 = vpop.permute.xlu0 %1341 }
 0x285   : > { %v2052_v24 = vmul.f32 %v8438_v42, %v2016_v26  ;;  %v2053_v3 = vmul.f32 %v8438_v42, %v2017_v49  ;;  %v2089_v38 = vpop.permute.xlu1 %2088 }
 0x286   : > { %v2101_v18 = vsel %vm2100_vm8, %v8611_v31, %v2089_v38  ;;  %v2107_v29 = vsel %vm2100_vm8, %v2089_v38, %v8611_v31 }
 0x287   : > { %v2121_v22 = vmul.f32 %v8764_v4, %v2101_v18  ;;  %v2122_v53 = vmul.f32 %v8769_v41, %v2107_v29  ;;  %1977 = vrot.lane.b32.xlu1 %v8430_v39, %s11319_s21  ;;  %v2064_v0 = vadd.f32 %v2052_v24, %v1959_v57  ;;  %v2065_v58 = vadd.f32 %v2053_v3, %v1960_v46  ;;  %v1449_v49 = vpop.permute.xlu0 %1448 }
 0x288   : > { %v1329_v39 = vmul.f32 %v8489_v55, %v8414_v28 }
 0x289   : > { %v2157_v42 = vmul.f32 %v8462_v51, %v2121_v22  ;;  %v2158_v12 = vmul.f32 %v8462_v51, %v2122_v53  ;;  %v1554_v2 = vpop.permute.xlu1 %1553 }
 0x28b   : > { %1357 = vrot.lane.b32.xlu1 %v8436_v40, %s8028_s15  ;;  %v8787_v31 = vadd.f32 %v2157_v42, %v2064_v0  ;;  %v8789_v32 = vadd.f32 %v2158_v12, %v2065_v58  ;;  %v1566_v24 = vpop.permute.xlu0 %1565 }
 0x28d   : > { %11414 = vst [vmem:[#allocation19_spill] sm:$0xff] %v8787_v31  ;;  %11415 = vst [vmem:[#allocation20_spill] sm:$0xff] %v8789_v32  ;;  %v1659_v30 = vpop.permute.xlu1 %1658  ;;  %v2181_v52 = vmul.f32 %v8787_v31, %v8787_v31  ;;  %v2182_v6 = vmul.f32 %v8789_v32, %v8789_v32 }
 0x28f   : > { %1464 = vrot.lane.b32.xlu1 %v8436_v40, %s8030_s17  ;;  %v2185_v51 = vadd.f32 %v2182_v6, %v2181_v52  ;;  %v8807_v38 = vpop.permute.xlu0 %1343 }
 0x291   : > { %v1764_v23 = vpop.permute.xlu1 %1763  ;;  %2186 = vadd.xlane.f32.xlu0 %v2185_v51 }
 0x293   : > { %1569 = vrot.lane.b32.xlu1 %v8436_v40, %s8027_s14  ;;  %v8811_v57 = vpop.permute.xlu0 %1765 }
 0x295   : > { %v1869_v26 = vpop.permute.xlu1 %1868 }
 0x297   : > { %1674 = vrot.lane.b32.xlu1 %v8436_v40, %s8029_s16  ;;  %v8815_v22 = vpop.permute.xlu0 %1870 }
 0x299   : > { %v1354_v47 = vpop.permute.xlu1 %1353 }
 0x29a   : > { %v1367_v53 = vsel %vm1365_vm1, %v1342_v50, %v1354_v47  ;;  %v1373_v42 = vsel %vm1365_vm1, %v1354_v47, %v1342_v50  ;;  %v1577_v47 = vsel %vm1575_vm3, %v1554_v2, %v1566_v24 }
 0x29b   : > { %1779 = vrot.lane.b32.xlu1 %v8436_v40, %s8031_s18  ;;  %v1388_v52 = vmul.f32 %v8628_v5, %v1373_v42  ;;  %v1389_v6 = vmul.f32 %v8632_v63, %v1367_v53  ;;  %v8831_v31 = vpop.permute.xlu0 %2080 }
 0x29c   : > { %11416 = vst [vmem:[#allocation21_spill] sm:$0xff] %v8831_v31 }
 0x29d   : > { %v1461_v54 = vpop.permute.xlu1 %1460 }
 0x29e   : > { %v1472_v0 = vsel %vm1470_vm2, %v1449_v49, %v1461_v54  ;;  %v1478_v58 = vsel %vm1470_vm2, %v1461_v54, %v1449_v49  ;;  %v1424_v49 = vmul.f32 %v8540_v8, %v1388_v52  ;;  %v1425_v54 = vmul.f32 %v8540_v8, %v1389_v6 }
 0x29f   : > { %1884 = vrot.lane.b32.xlu1 %v8436_v40, %s11321_s19  ;;  %v1493_v32 = vmul.f32 %v8647_v45, %v1478_v58  ;;  %v1494_v50 = vmul.f32 %v8650_v20, %v1472_v0  ;;  %v8843_v53 = vpop.permute.xlu0 %1936  ;;  %v1330_v0 = vmul.f32 %v8489_v55, %v8420_v33 }
 0x2a0   : > { %11417 = vst [vmem:[#allocation22_spill] sm:$0xff] %v8843_v53  ;;  %v1436_v52 = vadd.f32 %v1424_v49, %v1329_v39 }
 0x2a1   : > { %v1671_v3 = vpop.permute.xlu1 %1670  ;;  %v1529_v58 = vmul.f32 %v8548_v10, %v1493_v32  ;;  %v1530_v13 = vmul.f32 %v8548_v10, %v1494_v50  ;;  %v1437_v8 = vadd.f32 %v1425_v54, %v1330_v0 }
 0x2a2   : > { %v1682_v6 = vsel %vm1680_vm4, %v1659_v30, %v1671_v3  ;;  %v1688_v53 = vsel %vm1680_vm4, %v1671_v3, %v1659_v30 }
 0x2a3   : > { %1989 = vrot.lane.b32.xlu1 %v8436_v40, %s11319_s21  ;;  %v1541_v31 = vadd.f32 %v1529_v58, %v1436_v52  ;;  %v1542_v27 = vadd.f32 %v1530_v13, %v1437_v8  ;;  %v1704_v39 = vmul.f32 %v8689_v14, %v1682_v6  ;;  %v2034_v50 = vpop.permute.xlu0 %2033 }
 0x2a5   : > { %v1776_v18 = vpop.permute.xlu1 %1775  ;;  %v1740_v0 = vmul.f32 %v8550_v11, %v1704_v39 }
 0x2a6   : > { %v1787_v33 = vsel %vm1785_vm5, %v1764_v23, %v1776_v18  ;;  %v1793_v55 = vsel %vm1785_vm5, %v1776_v18, %v1764_v23 }
 0x2a7   : > { %2094 = vrot.lane.b32.xlu1 %v8436_v40, %s8034_s22  ;;  %v1583_v40 = vsel %vm1575_vm3, %v1566_v24, %v1554_v2  ;;  %v1599_v24 = vmul.f32 %v8656_v15, %v1577_v47  ;;  %v1808_v3 = vmul.f32 %v8701_v56, %v1787_v33  ;;  %v1809_v47 = vmul.f32 %v8704_v19, %v1793_v55  ;;  %v8883_v52 = vpop.permute.xlu0 %2041 }
 0x2a8   : > { %v1598_v2 = vmul.f32 %v8653_v43, %v1583_v40  ;;  %v1703_v40 = vmul.f32 %v8686_v44, %v1688_v53 }
 0x2a9   : > { %v1881_v29 = vpop.permute.xlu1 %1880  ;;  %v1635_v32 = vmul.f32 %v8515_v62, %v1599_v24 }
 0x2aa   : > { %v1634_v10 = vmul.f32 %v8515_v62, %v1598_v2  ;;  %v1892_v30 = vsel %vm1890_vm6, %v1869_v26, %v1881_v29  ;;  %v1898_v13 = vsel %vm1890_vm6, %v1881_v29, %v1869_v26  ;;  %v1739_v53 = vmul.f32 %v8550_v11, %v1703_v40 }
 0x2ab   : > { %v1647_v49 = vadd.f32 %v1635_v32, %v1542_v27  ;;  %v1913_v58 = vmul.f32 %v8707_v36, %v1892_v30  ;;  %v1914_v26 = vmul.f32 %v8722_v25, %v1898_v13  ;;  %v1844_v29 = vmul.f32 %v8576_v21, %v1808_v3 }
 0x2ac   : > { %v1646_v18 = vadd.f32 %v1634_v10, %v1541_v31  ;;  %v1845_v2 = vmul.f32 %v8576_v21, %v1809_v47 }
 0x2ad   : > { %v8813_v46 = vpop.permute.xlu1 %1450  ;;  %v1752_v6 = vadd.f32 %v1740_v0, %v1647_v49  ;;  %v1950_v11 = vmul.f32 %v8590_v37, %v1914_v26 }
 0x2ae   : > { %v1751_v8 = vadd.f32 %v1739_v53, %v1646_v18 }
 0x2af   : > { %v1857_v55 = vadd.f32 %v1845_v2, %v1752_v6 }
 0x2b0   : > { %v1856_v33 = vadd.f32 %v1844_v29, %v1751_v8 }
 0x2b1   : > { %v8821_v12 = vpop.permute.xlu1 %1555  ;;  %v1962_v13 = vadd.f32 %v1950_v11, %v1857_v55 }
 0x2b5   : > { %v8829_v51 = vpop.permute.xlu1 %1660 }
 0x2b9   : > { %v8841_v42 = vpop.permute.xlu1 %1975 }
 0x2bd   : > { %v1974_v28 = vpop.permute.xlu1 %1973 }
 0x2c1   : > { %v1986_v23 = vpop.permute.xlu1 %1985 }
 0x2c2   : > { %v1997_v54 = vsel %vm1995_vm7, %v1974_v28, %v1986_v23  ;;  %v2003_v62 = vsel %vm1995_vm7, %v1986_v23, %v1974_v28  ;;  %v1949_v28 = vmul.f32 %v8590_v37, %v1913_v58  ;;  %v2139_v23 = vpop.permute.xlu0 %2138 }
 0x2c3   : > { %v2018_v27 = vmul.f32 %v8741_v16, %v1997_v54  ;;  %v2019_v31 = vmul.f32 %v8744_v7, %v2003_v62 }
 0x2c4   : > { %v1961_v30 = vadd.f32 %v1949_v28, %v1856_v33 }
 0x2c5   : > { %v2079_v24 = vpop.permute.xlu1 %2078  ;;  %v2054_v40 = vmul.f32 %v2034_v50, %v2018_v27  ;;  %v2055_v39 = vmul.f32 %v2034_v50, %v2019_v31 }
 0x2c7   : > { %v2066_v54 = vadd.f32 %v2054_v40, %v1961_v30  ;;  %v2067_v62 = vadd.f32 %v2055_v39, %v1962_v13  ;;  %v1332_v13 = vmul.f32 %v8502_v59, %v8428_v35 }
 0x2c9   : > { %v2091_v10 = vpop.permute.xlu1 %2090 }
 0x2ca   : > { %v2102_v21 = vsel %vm2100_vm8, %v2079_v24, %v2091_v10  ;;  %v2108_v32 = vsel %vm2100_vm8, %v2091_v10, %v2079_v24 }
 0x2cb   : > { %v2123_v3 = vmul.f32 %v8764_v4, %v2102_v21  ;;  %v2124_v47 = vmul.f32 %v8769_v41, %v2108_v32 }
 0x2cd   : > { %v2159_v18 = vmul.f32 %v2139_v23, %v2123_v3  ;;  %v2160_v37 = vmul.f32 %v2139_v23, %v2124_v47  ;;  %v1356_v49 = vpop.permute.xlu1 %1355 }
 0x2ce   : > { %v1368_v29 = vsel %vm1365_vm1, %v8807_v38, %v1356_v49  ;;  %v1374_v2 = vsel %vm1365_vm1, %v1356_v49, %v8807_v38 }
 0x2cf   : > { %v8893_v50 = vadd.f32 %v2159_v18, %v2066_v54  ;;  %v8895_v53 = vadd.f32 %v2160_v37, %v2067_v62  ;;  %v1390_v6 = vmul.f32 %v8628_v5, %v1374_v2  ;;  %v1391_v28 = vmul.f32 %v8632_v63, %v1368_v29 }
 0x2d1   : > { %v1463_v0 = vpop.permute.xlu1 %1462  ;;  %v2183_v58 = vmul.f32 %v8893_v50, %v8893_v50  ;;  %v2184_v26 = vmul.f32 %v8895_v53, %v8895_v53  ;;  %v1427_v39 = vmul.f32 %v8511_v61, %v1391_v28 }
 0x2d2   : > { %v1473_v24 = vsel %vm1470_vm2, %v8813_v46, %v1463_v0  ;;  %v1479_v8 = vsel %vm1470_vm2, %v1463_v0, %v8813_v46  ;;  %v1426_v46 = vmul.f32 %v8511_v61, %v1390_v6 }
 0x2d3   : > { %v2188_v27 = vadd.f32 %v2184_v26, %v2183_v58  ;;  %v1495_v11 = vmul.f32 %v8647_v45, %v1479_v8  ;;  %v1496_v33 = vmul.f32 %v8650_v20, %v1473_v24  ;;  %v1439_v49 = vadd.f32 %v1427_v39, %v1332_v13  ;;  %v11420_v13 = vld [vmem:[#allocation21_spill] sm:$0xff] }
 0x2d5   : > { %v1568_v31 = vpop.permute.xlu1 %1567  ;;  %2189 = vadd.xlane.f32.xlu0 %v2188_v27  ;;  %v1531_v61 = vmul.f32 %v8522_v1, %v1495_v11  ;;  %v1532_v3 = vmul.f32 %v8522_v1, %v1496_v33 }
 0x2d6   : > { %v1578_v38 = vsel %vm1575_vm3, %v8821_v12, %v1568_v31  ;;  %v1584_v55 = vsel %vm1575_vm3, %v1568_v31, %v8821_v12  ;;  %v1331_v12 = vmul.f32 %v8502_v59, %v8422_v34 }
 0x2d7   : > { %v1600_v32 = vmul.f32 %v8653_v43, %v1584_v55  ;;  %v1601_v30 = vmul.f32 %v8656_v15, %v1578_v38  ;;  %v1544_v54 = vadd.f32 %v1532_v3, %v1439_v49  ;;  %v11418_v38 = vld [vmem:[#allocation16_spill] sm:$0xff] }
 0x2d8   : > { %v1438_v37 = vadd.f32 %v1426_v46, %v1331_v12 }
 0x2d9   : > { %v1673_v40 = vpop.permute.xlu1 %1672  ;;  %v1636_v35 = vmul.f32 %v8506_v60, %v1600_v32  ;;  %v1637_v59 = vmul.f32 %v8506_v60, %v1601_v30 }
 0x2da   : > { %v1683_v10 = vsel %vm1680_vm4, %v8829_v51, %v1673_v40  ;;  %v1689_v21 = vsel %vm1680_vm4, %v1673_v40, %v8829_v51  ;;  %v1543_v1 = vadd.f32 %v1531_v61, %v1438_v37  ;;  %v11421_v37 = vld [vmem:[#allocation9_spill] sm:$0xff] }
 0x2db   : > { %v1705_v23 = vmul.f32 %v8686_v44, %v1689_v21  ;;  %v1706_v18 = vmul.f32 %v8689_v14, %v1683_v10  ;;  %v1649_v24 = vadd.f32 %v1637_v59, %v1544_v54  ;;  %v11419_v21 = vld [vmem:[#allocation8_spill] sm:$0xff] }
 0x2dc   : > { %v1648_v31 = vadd.f32 %v1636_v35, %v1543_v1 }
 0x2dd   : > { %v1778_v47 = vpop.permute.xlu1 %1777  ;;  %v1741_v26 = vmul.f32 %v8544_v9, %v1705_v23  ;;  %v1742_v29 = vmul.f32 %v8544_v9, %v1706_v18 }
 0x2de   : > { %v1788_v51 = vsel %vm1785_vm5, %v8811_v57, %v1778_v47  ;;  %v1794_v34 = vsel %vm1785_vm5, %v1778_v47, %v8811_v57 }
 0x2df   : > { %v1810_v62 = vmul.f32 %v8701_v56, %v1788_v51  ;;  %v1811_v0 = vmul.f32 %v8704_v19, %v1794_v34  ;;  %v1753_v9 = vadd.f32 %v1741_v26, %v1648_v31  ;;  %v1754_v11 = vadd.f32 %v1742_v29, %v1649_v24  ;;  %v11422_v31 = vld [vmem:[#allocation17_spill] sm:$0xff] }
 0x2e0   : > { %v8035_v26 = vmov 1966171168  }
 0x2e1   : > { %v1883_v58 = vpop.permute.xlu1 %1882  ;;  %v1846_v8 = vmul.f32 %v8564_v17, %v1810_v62  ;;  %v1847_v6 = vmul.f32 %v8564_v17, %v1811_v0  ;;  %v3172_v29 = vunpack.c.l.s4 %v8035_v26 }
 0x2e2   : > { %v1893_v57 = vsel %vm1890_vm6, %v8815_v22, %v1883_v58  ;;  %v1899_v2 = vsel %vm1890_vm6, %v1883_v58, %v8815_v22 }
 0x2e3   : > { %v1915_v60 = vmul.f32 %v8707_v36, %v1893_v57  ;;  %v1916_v27 = vmul.f32 %v8722_v25, %v1899_v2  ;;  %v1858_v17 = vadd.f32 %v1846_v8, %v1753_v9  ;;  %v1859_v10 = vadd.f32 %v1847_v6, %v1754_v11  ;;  %v9001_v8 = vld.sshfl [vmem:[%s11264_s6] sm:$0x11 pattern:$0x75316420]  ;;  %v9003_v6 = vpop.permute.xlu0 %2146 }
 0x2e5   : > { %v1988_v28 = vpop.permute.xlu1 %1987  ;;  %v1951_v55 = vmul.f32 %v11418_v38, %v1915_v60  ;;  %v1952_v40 = vmul.f32 %v11418_v38, %v1916_v27  ;;  %v3173_v60 = vunpack.c.0.s8 %v3172_v29  ;;  %v11429_v29 = vld [vmem:[#allocation14_spill] sm:$0xff] }
 0x2e6   : > { %v1998_v33 = vsel %vm1995_vm7, %v8841_v42, %v1988_v28  ;;  %v2004_v22 = vsel %vm1995_vm7, %v1988_v28, %v8841_v42 }
 0x2e7   : > { %v2020_v46 = vmul.f32 %v8741_v16, %v1998_v33  ;;  %v2021_v39 = vmul.f32 %v8744_v7, %v2004_v22  ;;  %v1963_v3 = vadd.f32 %v1951_v55, %v1858_v17  ;;  %v1964_v47 = vadd.f32 %v1952_v40, %v1859_v10  ;;  %v11423_v33 = vld [vmem:[#allocation18_spill] sm:$0xff]  ;;  %v1346_v38 = vpop.permute.xlu0 %1345 }
 0x2e8   : > { %v8996_v24 = vsub.s32 %v3173_v60, %v11422_v31 }
 0x2e9   : > { %v2056_v32 = vmul.f32 %v11419_v21, %v2020_v46  ;;  %v2057_v30 = vmul.f32 %v11419_v21, %v2021_v39  ;;  %v2093_v12 = vpop.permute.xlu1 %2092 }
 0x2ea   : > { %v2103_v61 = vsel %vm2100_vm8, %v11420_v13, %v2093_v12  ;;  %v2109_v42 = vsel %vm2100_vm8, %v2093_v12, %v11420_v13  ;;  %v3177_v9 = vrot.slane %v9001_v8, %v8996_v24 }
 0x2eb   : > { %v2125_v23 = vmul.f32 %v8764_v4, %v2103_v61  ;;  %v2126_v18 = vmul.f32 %v8769_v41, %v2109_v42  ;;  %v2068_v51 = vadd.f32 %v2056_v32, %v1963_v3  ;;  %v2069_v34 = vadd.f32 %v2057_v30, %v1964_v47  ;;  %v9021_v32 = vld [vmem:[%s11263_s5 + $0x20] sm:$0xff]  ;;  %v1768_v47 = vpop.permute.xlu0 %1767 }
 0x2ec   : > { %v3188_v22 = vrot.slane %v3177_v9, %v11423_v33  ;;  %v11424_v3 = vmov 4  }
 0x2ed   : > { %v2161_v49 = vmul.f32 %v11421_v37, %v2125_v23  ;;  %v2162_v35 = vmul.f32 %v11421_v37, %v2126_v18  ;;  %v1453_v59 = vpop.permute.xlu1 %1452  ;;  %v11425_v23 = vld [vmem:[#allocation13_spill] sm:$0xff] }
 0x2ef   : > { %v8985_v1 = vadd.f32 %v2161_v49, %v2068_v51  ;;  %v8987_v54 = vadd.f32 %v2162_v35, %v2069_v34 }
 0x2f1   : > { %v1558_v62 = vpop.permute.xlu1 %1557  ;;  %v2199_v0 = vmul.f32 %v8985_v1, %v8985_v1  ;;  %v2200_v58 = vmul.f32 %v8987_v54, %v8987_v54 }
 0x2f3   : > { %v2203_v57 = vadd.f32 %v2200_v58, %v2199_v0  ;;  %v11428_v58 = vld [vmem:[#allocation3_spill] sm:$0xff] }
 0x2f5   : > { %v1663_v2 = vpop.permute.xlu1 %1662  ;;  %2204 = vadd.xlane.f32.xlu1 %v2203_v57 }
 0x2f9   : > { %v8993_v27 = vpop.permute.xlu1 %1977 }
 0x2fd   : > { %v1358_v28 = vpop.permute.xlu1 %1357 }
 0x2fe   : > { %v1369_v55 = vsel %vm1365_vm1, %v1346_v38, %v1358_v28  ;;  %v1375_v40 = vsel %vm1365_vm1, %v1358_v28, %v1346_v38 }
 0x2ff   : > { %v1392_v10 = vmul.f32 %v8628_v5, %v1375_v40  ;;  %v1393_v21 = vmul.f32 %v8632_v63, %v1369_v55  ;;  %v11430_v55 = vmov 0   ;;  %v11431_v40 = vld [vmem:[#allocation10_spill] sm:$0xff] }
 0x301   : > { %v1465_v11 = vpop.permute.xlu1 %1464  ;;  %v1428_v18 = vmul.f32 %v11425_v23, %v1392_v10  ;;  %v1429_v51 = vmul.f32 %v11425_v23, %v1393_v21 }
 0x302   : > { %v1474_v39 = vsel %vm1470_vm2, %v1453_v59, %v1465_v11  ;;  %v1480_v17 = vsel %vm1470_vm2, %v1465_v11, %v1453_v59  ;;  %v11426_v59 = vld [vmem:[#allocation2_spill] sm:$0xff] }
 0x303   : > { %v1497_v30 = vmul.f32 %v8647_v45, %v1480_v17  ;;  %v1498_v12 = vmul.f32 %v8650_v20, %v1474_v39  ;;  %v1873_v17 = vpop.permute.xlu0 %1872 }
 0x305   : > { %v1570_v46 = vpop.permute.xlu1 %1569  ;;  %v1533_v57 = vmul.f32 %v11429_v29, %v1497_v30  ;;  %v1534_v60 = vmul.f32 %v11429_v29, %v1498_v12 }
 0x306   : > { %3194 = vperm.xlu1 %7899, %v3188_v22   ;;  %v1579_v13 = vsel %vm1575_vm3, %v1558_v62, %v1570_v46  ;;  %v1585_v61 = vsel %vm1575_vm3, %v1570_v46, %v1558_v62  ;;  %v11427_v62 = vld [vmem:[#allocation11_spill] sm:$0xff] }
 0x307   : > { %v1602_v49 = vmul.f32 %v8653_v43, %v1585_v61  ;;  %v1603_v35 = vmul.f32 %v8656_v15, %v1579_v13  ;;  %v1333_v0 = vmul.f32 %v11427_v62, %v11426_v59  ;;  %v1334_v26 = vmul.f32 %v11427_v62, %v11428_v58  ;;  %v11432_v61 = vld [vmem:[#allocation12_spill] sm:$0xff]  ;;  %v11434_v59 = vld [vmem:[#allocation15_spill] sm:$0xff] }
 0x309   : > { %v1675_v42 = vpop.permute.xlu1 %1674  ;;  %v1440_v22 = vadd.f32 %v1428_v18, %v1333_v0  ;;  %v1441_v38 = vadd.f32 %v1429_v51, %v1334_v26  ;;  %v1638_v46 = vmul.f32 %v11431_v40, %v1602_v49  ;;  %v1639_v39 = vmul.f32 %v11431_v40, %v1603_v35  ;;  %v11433_v35 = vld [vmem:[#allocation4_spill] sm:$0xff]  ;;  %v2083_v40 = vpop.permute.xlu0 %2082 }
 0x30a   : > { %7901 = vset.pattern.permute.xlu1 %v11424_v3  ;;  %v1684_v34 = vsel %vm1680_vm4, %v1663_v2, %v1675_v42  ;;  %v1690_v37 = vsel %vm1680_vm4, %v1675_v42, %v1663_v2  ;;  %v11435_v26 = vmov 2  }
 0x30b   : > { %1319 = vperm.xlu1 %7901, %v9021_v32   ;;  %v1707_v28 = vmul.f32 %v8686_v44, %v1690_v37  ;;  %v1708_v2 = vmul.f32 %v8689_v14, %v1684_v34  ;;  %v1545_v10 = vadd.f32 %v1533_v57, %v1440_v22  ;;  %v1546_v21 = vadd.f32 %v1534_v60, %v1441_v38  ;;  %v11437_v38 = vld [vmem:[#allocation5_spill] sm:$0xff] }
 0x30d   : > { %v1780_v31 = vpop.permute.xlu1 %1779  ;;  %v1743_v42 = vmul.f32 %v11432_v61, %v1707_v28  ;;  %v1650_v37 = vadd.f32 %v1638_v46, %v1545_v10  ;;  %v1651_v49 = vadd.f32 %v1639_v39, %v1546_v21  ;;  %v11436_v28 = vld [vmem:[#allocation22_spill] sm:$0xff] }
 0x30e   : > { %v1789_v9 = vsel %vm1785_vm5, %v1768_v47, %v1780_v31  ;;  %v1795_v11 = vsel %vm1785_vm5, %v1780_v31, %v1768_v47  ;;  %v1744_v47 = vmul.f32 %v11432_v61, %v1708_v2 }
 0x30f   : > { %7902 = vset.pattern.permute.xlu1 %v11430_v55  ;;  %v1812_v30 = vmul.f32 %v8701_v56, %v1789_v9  ;;  %v1813_v12 = vmul.f32 %v8704_v19, %v1795_v11  ;;  %v1755_v29 = vadd.f32 %v1743_v42, %v1650_v37 }
 0x310   : > { %1415 = vperm.xlu1 %7902, %v9021_v32   ;;  %v1756_v57 = vadd.f32 %v1744_v47, %v1651_v49 }
 0x311   : > { %v1885_v13 = vpop.permute.xlu1 %1884  ;;  %v1848_v62 = vmul.f32 %v11434_v59, %v1812_v30  ;;  %v1849_v0 = vmul.f32 %v11434_v59, %v1813_v12  ;;  %v11438_v59 = vmov 3  }
 0x312   : > { %v1894_v23 = vsel %vm1890_vm6, %v1873_v17, %v1885_v13  ;;  %v1900_v18 = vsel %vm1890_vm6, %v1885_v13, %v1873_v17 }
 0x313   : > { %v1917_v51 = vmul.f32 %v8707_v36, %v1894_v23  ;;  %v1918_v34 = vmul.f32 %v8722_v25, %v1900_v18  ;;  %v1860_v46 = vadd.f32 %v1848_v62, %v1755_v29  ;;  %v1861_v39 = vadd.f32 %v1849_v0, %v1756_v57  ;;  %v11439_v0 = vld [vmem:[#allocation20_spill] sm:$0xff] }
 0x314   : > { %1347 = vrot.lane.b32.xlu1 %v11433_v35, %s8028_s15  ;;  %v11440_v29 = vmov 5  }
 0x315   : > { %v1990_v58 = vpop.permute.xlu1 %1989  ;;  %7904 = vset.pattern.permute.xlu1 %v11435_v26  ;;  %v1953_v2 = vmul.f32 %v11436_v28, %v1917_v51  ;;  %v1954_v9 = vmul.f32 %v11436_v28, %v1918_v34 }
 0x316   : > { %v1999_v60 = vsel %vm1995_vm7, %v8993_v27, %v1990_v58  ;;  %v2005_v31 = vsel %vm1995_vm7, %v1990_v58, %v8993_v27 }
 0x317   : > { %v2022_v11 = vmul.f32 %v8741_v16, %v1999_v60  ;;  %v2023_v22 = vmul.f32 %v8744_v7, %v2005_v31  ;;  %v1965_v12 = vadd.f32 %v1953_v2, %v1860_v46  ;;  %v1966_v13 = vadd.f32 %v1954_v9, %v1861_v39  ;;  %v11444_v46 = vld [vmem:[#allocation19_spill] sm:$0xff] }
 0x318   : > { %1359 = vrot.lane.b32.xlu1 %v11437_v38, %s8028_s15  ;;  %v3170_v60 = vcombine.high %v9001_v8, %v9001_v8  ;;  %v11442_v8 = vmov 6  }
 0x319   : > { %v2058_v17 = vmul.f32 %v8883_v52, %v2022_v11  ;;  %v2059_v10 = vmul.f32 %v8883_v52, %v2023_v22  ;;  %v2095_v21 = vpop.permute.xlu1 %2094 }
 0x31a   : > { %v2104_v27 = vsel %vm2100_vm8, %v2083_v40, %v2095_v21  ;;  %v2110_v30 = vsel %vm2100_vm8, %v2095_v21, %v2083_v40  ;;  %v3184_v2 = vrot.slane %v3170_v60, %v8996_v24  ;;  %v11441_v24 = vmov 1   ;;  %v9158_v40 = vld [vmem:[%s11263_s5 + $0x28] sm:$0xff] }
 0x31b   : > { %v2127_v61 = vmul.f32 %v8764_v4, %v2104_v27  ;;  %v2128_v42 = vmul.f32 %v8769_v41, %v2110_v30  ;;  %v2070_v52 = vadd.f32 %v2058_v17, %v1965_v12  ;;  %v2071_v18 = vadd.f32 %v2059_v10, %v1966_v13 }
 0x31c   : > { %1625 = vperm.xlu1 %7904, %v9021_v32   ;;  %v3192_v22 = vrot.slane %v3184_v2, %v11423_v33  ;;  %v11443_v33 = vmov 7  }
 0x31d   : > { %v2163_v47 = vmul.f32 %v9003_v6, %v2127_v61  ;;  %v2164_v23 = vmul.f32 %v9003_v6, %v2128_v42 }
 0x31e   : > { %v2187_v51 = vpop.xlane.xlu0 %2186 }
 0x31f   : > { %v2191_v34 = vmax.f32 %v2187_v51, 1e-24  ;;  %v9093_v37 = vadd.f32 %v2163_v47, %v2070_v52  ;;  %v9095_v49 = vadd.f32 %v2164_v23, %v2071_v18 }
 0x320   : > { %1454 = vrot.lane.b32.xlu1 %v11433_v35, %s8030_s17 }
 0x321   : > { %7963 = vrsqrt.f32 %v2191_v34  ;;  %v2201_v4 = vmul.f32 %v9093_v37, %v9093_v37  ;;  %v2202_v41 = vmul.f32 %v9095_v49, %v9095_v49  ;;  %7905 = vset.pattern.permute.xlu1 %v11438_v59 }
 0x323   : > { %v2206_v6 = vadd.f32 %v2202_v41, %v2201_v4 }
 0x324   : > { %1466 = vrot.lane.b32.xlu1 %v11437_v38, %s8030_s17 }
 0x325   : > { %2207 = vadd.xlane.f32.xlu0 %v2206_v6 }
 0x328   : > { %1730 = vperm.xlu1 %7905, %v9021_v32  }
 0x32b   : > { %v7964_v62 = vpop.eup %7963 }
 0x32c   : > { %1559 = vrot.lane.b32.xlu1 %v11433_v35, %s8027_s14  ;;  %v2196_v58 = vmul.f32 %v7964_v62, %v11439_v0  ;;  %v2195_v39 = vmul.f32 %v7964_v62, %v11444_v46 }
 0x32d   : > { %7906 = vset.pattern.permute.xlu1 %v11440_v29 }
 0x32e   : > { %v9111_v57 = vand.u32 4294901760, %v2196_v58  ;;  %v2289_v21 = vand.u32 4294901760, %v2195_v39 }
 0x330   : > { %1571 = vrot.lane.b32.xlu1 %v11437_v38, %s8027_s14  ;;  %v9118_v31 = vsub.f32 %v2196_v58, %v9111_v57  ;;  %v2290_v27 = vsub.f32 %v2195_v39, %v2289_v21 }
 0x332   : > { %v2285_v28 = vand.u32 4294901760, %v9118_v31  ;;  %v2291_v30 = vand.u32 4294901760, %v2290_v27 }
 0x334   : > { %1835 = vperm.xlu1 %7906, %v9021_v32   ;;  %v2286_v9 = vsub.f32 %v9118_v31, %v2285_v28  ;;  %v2292_v23 = vsub.f32 %v2290_v27, %v2291_v30 }
 0x336   : > { %v2287_v11 = vand.u32 4294901760, %v2286_v9  ;;  %v2293_v51 = vand.u32 4294901760, %v2292_v23 }
 0x338   : > { %2288 = vmatprep.mubr.f32.mxu1 %v2287_v11  ;;  %1664 = vrot.lane.b32.xlu1 %v11433_v35, %s8029_s16 }
 0x339   : > { %7909 = vset.pattern.permute.xlu1 %v11424_v3 }
 0x33b   : > { %3198 = vperm.xlu0 %7900, %v3192_v22  }
 0x33c   : > { %1676 = vrot.lane.b32.xlu1 %v11437_v38, %s8029_s16 }
 0x33f   : > { %7903 = vset.pattern.permute.xlu0 %v11441_v24 }
 0x340   : > { %1520 = vperm.xlu0 %7903, %v9021_v32   ;;  %1769 = vrot.lane.b32.xlu1 %v11433_v35, %s8031_s18 }
 0x344   : > { %7907 = vset.pattern.permute.xlu0 %v11442_v8  ;;  %1781 = vrot.lane.b32.xlu1 %v11437_v38, %s8031_s18 }
 0x345   : > { %1940 = vperm.xlu0 %7907, %v9021_v32  }
 0x348   : > { %1874 = vrot.lane.b32.xlu1 %v11433_v35, %s11321_s19 }
 0x349   : > { %7908 = vset.pattern.permute.xlu0 %v11443_v33 }
 0x34a   : > { %2045 = vperm.xlu0 %7908, %v9021_v32  }
 0x34c   : > { %1886 = vrot.lane.b32.xlu1 %v11437_v38, %s11321_s19 }
 0x34e   : > { %2084 = vrot.lane.b32.xlu0 %v11433_v35, %s8034_s22 }
 0x34f   : > { %7913 = vset.pattern.permute.xlu0 %v11438_v59 }
 0x350   : > { %1979 = vrot.lane.b32.xlu1 %v11433_v35, %s11319_s21 }
 0x354   : > { %1991 = vrot.lane.b32.xlu1 %v11437_v38, %s11319_s21 }
 0x358   : > { %2096 = vrot.lane.b32.xlu1 %v11437_v38, %s8034_s22 }
 0x35c   : > { %1324 = vperm.xlu1 %7909, %v9158_v40  }
 0x360   : > { %7910 = vset.pattern.permute.xlu1 %v11430_v55 }
 0x361   : > { %1419 = vperm.xlu1 %7910, %v9158_v40  }
 0x362   : > { %v2190_v41 = vpop.xlane.xlu0 %2189 }
 0x363   : > { %v2192_v0 = vmax.f32 %v2190_v41, 1e-24 }
 0x365   : > { %7911 = vset.pattern.permute.xlu1 %v11441_v24 }
 0x382   : > { %v2205_v17 = vpop.xlane.xlu1 %2204 }
 0x383   : > { %v2209_v10 = vmax.f32 %v2205_v17, 1e-24 }
 0x385   : > { %7965 = vrsqrt.f32 %v2209_v10 }
 0x386   : > { %7967 = vrsqrt.f32 %v2192_v0 }
 0x38f   : > { %v7966_v12 = vpop.eup %7965 }
 0x390   : > { %v2214_v13 = vmul.f32 %v7966_v12, %v8987_v54  ;;  %v2213_v61 = vmul.f32 %v7966_v12, %v8985_v1  ;;  %v7968_v1 = vpop.eup %7967 }
 0x391   : > { %v2198_v60 = vmul.f32 %v7968_v1, %v8895_v53  ;;  %v2197_v9 = vmul.f32 %v7968_v1, %v8893_v50 }
 0x392   : > { %v2217_v42 = vand.u32 4294901760, %v2214_v13  ;;  %v2219_v47 = vand.u32 4294901760, %v2213_v61 }
 0x393   : > { %v2755_v2 = vand.u32 4294901760, %v2198_v60  ;;  %v2761_v39 = vand.u32 4294901760, %v2197_v9 }
 0x394   : > { %2218 = vmatprep.subr.mxu1 %v2217_v42  ;;  %v2306_v52 = vsub.f32 %v2213_v61, %v2219_v47  ;;  %v2300_v18 = vsub.f32 %v2214_v13, %v2217_v42 }
 0x395   : > { %2220 = vmatpush1.xpose.msra.mxu1 %v2219_v47  ;;  %v2756_v46 = vsub.f32 %v2198_v60, %v2755_v2  ;;  %v11447_v60 = vld [vmem:[#allocation7_spill] sm:$0xff] }
 0x396   : > { %v2301_v34 = vand.u32 4294901760, %v2300_v18  ;;  %v2307_v4 = vand.u32 4294901760, %v2306_v52 }
 0x397   : > { %v2757_v17 = vand.u32 4294901760, %v2756_v46 }
 0x398   : > { %2294 = vmatmul.mubr.f32.vlgmr.msra.gmra.mrb[4].mxu1 %v2293_v51  ;;  %v2302_v6 = vsub.f32 %v2300_v18, %v2301_v34  ;;  %v2308_v62 = vsub.f32 %v2306_v52, %v2307_v4 }
 0x399   : > { %2374 = vmatprep.mubr.f32.mxu1 %v9111_v57  ;;  %v2758_v53 = vsub.f32 %v2756_v46, %v2757_v17 }
 0x39a   : > { %v2303_v54 = vand.u32 4294901760, %v2302_v6  ;;  %v2309_v58 = vand.u32 4294901760, %v2308_v62 }
 0x39c   : > { %2304 = vmatprep.subr.mxu1 %v2303_v54 }
 0x39d   : > { %2310 = vmatpush1.xpose.msra.mxu1 %v2309_v58  ;;  %v11446_v58 = vld [vmem:[#allocation6_spill] sm:$0xff] }
 0x39e   : > { %2383 = vmatprep.subr.mxu1 %v2300_v18 }
 0x3a0   : > { %2376 = vmatmul.mubr.f32.vlgmr.msra.gmra.mrb[4].mxu1 %v2289_v21 }
 0x3a1   : > { %2386 = vmatpush1.xpose.msra.mxu1 %v2306_v52  ;;  %2451 = vmatprep.mubr.f32.mxu1 %v9118_v31  ;;  %v2762_v31 = vsub.f32 %v2197_v9, %v2761_v39 }
 0x3a2   : > { %2460 = vmatprep.subr.mxu1 %v2217_v42 }
 0x3a8   : > { %2454 = vmatmul.mubr.f32.vlgmr.msra.gmra.mrb[4].mxu1 %v2290_v27  ;;  %v2759_v27 = vand.u32 4294901760, %v2758_v53 }
 0x3a9   : > { %2462 = vmatpush1.xpose.msra.mxu1 %v2219_v47  ;;  %2528 = vmatprep.mubr.f32.mxu1 %v2285_v28  ;;  %v2763_v28 = vand.u32 4294901760, %v2762_v31 }
 0x3aa   : > { %2540 = vmatprep.subr.mxu1 %v2301_v34 }
 0x3ab   : > { %v2764_v61 = vsub.f32 %v2762_v31, %v2763_v28 }
 0x3ad   : > { %v2765_v23 = vand.u32 4294901760, %v2764_v61 }
 0x3b0   : > { %2532 = vmatmul.mubr.f32.vlgmr.msra.gmra.mrb[4].mxu1 %v2291_v30 }
 0x3b1   : > { %2544 = vmatpush1.xpose.msra.mxu1 %v2307_v4  ;;  %2608 = vmatprep.mubr.f32.mxu1 %v9111_v57 }
 0x3b2   : > { %2616 = vmatprep.subr.mxu1 %v2217_v42  ;;  %v2208_v11 = vpop.xlane.xlu0 %2207 }
 0x3b3   : > { %v2210_v22 = vmax.f32 %v2208_v11, 1e-24 }
 0x3b5   : > { %7969 = vrsqrt.f32 %v2210_v22 }
 0x3b8   : > { %2610 = vmatmul.mubr.f32.vlgmr.msra.gmra.mrb[4].mxu1 %v2289_v21 }
 0x3b9   : > { %2618 = vmatpush1.xpose.msra.mxu1 %v2219_v47  ;;  %2682 = vmatprep.mubr.f32.mxu1 %v9111_v57 }
 0x3ba   : > { %v3199_v22 = vpop.permute.xlu0 %3198 }
 0x3bf   : > { %v7970_v10 = vpop.eup %7969 }
 0x3c0   : > { %2684 = vmatmul.mubr.f32.vlgmr.msra.gmra.mrb[4].mxu1 %v2289_v21  ;;  %v2216_v30 = vmul.f32 %v7970_v10, %v9095_v49  ;;  %v2215_v50 = vmul.f32 %v7970_v10, %v9093_v37  ;;  %v11445_v37 = vmov 0.0   ;;  %v3195_v49 = vpop.permute.xlu1 %3194 }
 0x3c1   : > { %2760 = vmatprep.mubr.f32.mxu1 %v2759_v27 }
 0x3c2   : > { %v2689_v12 = vand.u32 4294901760, %v2216_v30  ;;  %v2691_v13 = vand.u32 4294901760, %v2215_v50 }
 0x3c4   : > { %2690 = vmatprep.subr.mxu1 %v2689_v12  ;;  %v2778_v42 = vsub.f32 %v2215_v50, %v2691_v13  ;;  %v2772_v47 = vsub.f32 %v2216_v30, %v2689_v12  ;;  %v9179_v0 = vpop.permute.xlu1 %1319  ;;  %v11448_v50 = vmov 8  }
 0x3c5   : > { %2692 = vmatpush1.xpose.msra.mxu1 %v2691_v13 }
 0x3c6   : > { %v2773_v57 = vand.u32 4294901760, %v2772_v47  ;;  %v2779_v52 = vand.u32 4294901760, %v2778_v42 }
 0x3c8   : > { %2766 = vmatmul.mubr.f32.vlgmr.msra.gmra.mrb[6].mxu1 %v2765_v23  ;;  %v2774_v18 = vsub.f32 %v2772_v47, %v2773_v57  ;;  %v2780_v51 = vsub.f32 %v2778_v42, %v2779_v52  ;;  %v9182_v54 = vpop.permute.xlu1 %1415 }
 0x3c9   : > { %2846 = vmatprep.mubr.f32.mxu1 %v2755_v2 }
 0x3ca   : > { %v2775_v21 = vand.u32 4294901760, %v2774_v18  ;;  %v2781_v34 = vand.u32 4294901760, %v2780_v51 }
 0x3cc   : > { %2776 = vmatprep.subr.mxu1 %v2775_v21  ;;  %v1348_v1 = vpop.permute.xlu1 %1347 }
 0x3cd   : > { %2782 = vmatpush1.xpose.msra.mxu1 %v2781_v34 }
 0x3ce   : > { %2855 = vmatprep.subr.mxu1 %v2772_v47 }
 0x3d0   : > { %2848 = vmatmul.mubr.f32.vlgmr.msra.gmra.mrb[6].mxu1 %v2761_v39 }
 0x3d1   : > { %2858 = vmatpush1.xpose.msra.mxu1 %v2778_v42  ;;  %2923 = vmatprep.mubr.f32.mxu1 %v2756_v46 }
 0x3d2   : > { %2932 = vmatprep.subr.mxu1 %v2689_v12 }
 0x3d8   : > { %2926 = vmatmul.mubr.f32.vlgmr.msra.gmra.mrb[6].mxu1 %v2762_v31 }
 0x3d9   : > { %2934 = vmatpush1.xpose.msra.mxu1 %v2691_v13  ;;  %3000 = vmatprep.mubr.f32.mxu1 %v2757_v17 }
 0x3da   : > { %3012 = vmatprep.subr.mxu1 %v2773_v57 }
 0x3e0   : > { %3004 = vmatmul.mubr.f32.vlgmr.msra.gmra.mrb[6].mxu1 %v2763_v28 }
 0x3e1   : > { %3016 = vmatpush1.xpose.msra.mxu1 %v2779_v52  ;;  %3080 = vmatprep.mubr.f32.mxu1 %v2755_v2 }
 0x3e2   : > { %3088 = vmatprep.subr.mxu1 %v2689_v12 }
 0x3e8   : > { %3082 = vmatmul.mubr.f32.vlgmr.msra.gmra.mrb[6].mxu1 %v2761_v39 }
 0x3e9   : > { %3090 = vmatpush1.xpose.msra.mxu1 %v2691_v13  ;;  %3154 = vmatprep.mubr.f32.mxu1 %v2755_v2  ;;  %v1360_v2 = vpop.permute.xlu1 %1359 }
 0x3ed   : > { %v9193_v9 = vpop.permute.xlu1 %1625 }
 0x3f0   : > { %3156 = vmatmul.mubr.f32.vlgmr.msra.gmra.mrb[6].mxu1 %v2761_v39 }
 0x3f1   : > { %3295 = vmatprep.mubr.f32.mxu1 %v11445_v37  ;;  %v1455_v11 = vpop.permute.xlu1 %1454 }
 0x3f5   : > { %v1467_v53 = vpop.permute.xlu1 %1466 }
 0x3f9   : > { %v9209_v28 = vpop.permute.xlu1 %1730 }
 0x3fd   : > { %v1560_v10 = vpop.permute.xlu1 %1559 }
 0x401   : > { %v1572_v27 = vpop.permute.xlu1 %1571 }
 0x405   : > { %v9212_v30 = vpop.permute.xlu1 %1835 }
 0x409   : > { %v1665_v12 = vpop.permute.xlu1 %1664 }
 0x40d   : > { %v1677_v13 = vpop.permute.xlu1 %1676 }
 0x411   : > { %v1770_v61 = vpop.permute.xlu1 %1769 }
 0x415   : > { %v1782_v42 = vpop.permute.xlu1 %1781 }
 0x419   : > { %v1875_v47 = vpop.permute.xlu1 %1874 }
 0x41d   : > { %v1887_v23 = vpop.permute.xlu1 %1886 }
 0x421   : > { %v9218_v57 = vpop.permute.xlu1 %1979 }
 0x425   : > { %v9220_v52 = vpop.permute.xlu1 %1991 }
 0x429   : > { %v9222_v18 = vpop.permute.xlu1 %2096 }
 0x42d   : > { %v9224_v51 = vpop.permute.xlu1 %1324 }
 0x431   : > { %v9226_v21 = vpop.permute.xlu1 %1419 }
 0x493   : > { %v2685_v4 = vpop.f32.mrb[4].mxu1 }
 0x494   : > { %v3201_v41 = vmul.f32 %v3195_v49, %v2685_v4  ;;  %v2687_v6 = vpop.f32.mrb[5].mxu1 }
 0x496   : > { %v3204_v62 = vsel %vm3203_vm9, %v3201_v41, -inf }
 0x497   : > { %3205 = vmax.xlane.f32.xlu1 %v3204_v62  ;;  %v1521_v62 = vpop.permute.xlu0 %1520 }
 0x4a8   : > { %1524 = vperm.xlu1 %7911, %v9158_v40  }
 0x4ac   : > { %1349 = vrot.lane.b32.xlu1 %v11446_v58, %s8028_s15 }
 0x4ad   : > { %7912 = vset.pattern.permute.xlu1 %v11435_v26 }
 0x4b0   : > { %1361 = vrot.lane.b32.xlu1 %v11447_v60, %s8028_s15 }
 0x4b4   : > { %1629 = vperm.xlu1 %7912, %v9158_v40  }
 0x4b8   : > { %1456 = vrot.lane.b32.xlu1 %v11446_v58, %s8030_s17 }
 0x4b9   : > { %7915 = vset.pattern.permute.xlu1 %v11440_v29 }
 0x4bc   : > { %1468 = vrot.lane.b32.xlu1 %v11447_v60, %s8030_s17 }
 0x4c0   : > { %1561 = vrot.lane.b32.xlu1 %v11446_v58, %s8027_s14 }
 0x4c3   : > { %v3157_v46 = vpop.f32.mrb[6].mxu1 }
 0x4c4   : > { %1573 = vrot.lane.b32.xlu1 %v11447_v60, %s8027_s14  ;;  %v9201_v39 = vmul.f32 %v3199_v22, %v3157_v46  ;;  %v3159_v17 = vpop.f32.mrb[7].mxu1  ;;  %v1376_v22 = vsel %vm1365_vm1, %v1360_v2, %v1348_v1  ;;  %v1370_v46 = vsel %vm1365_vm1, %v1348_v1, %v1360_v2 }
 0x4c5   : > { %v1941_v17 = vpop.permute.xlu0 %1940 }
 0x4c6   : > { %v3207_v31 = vsel %vm3203_vm9, %v9201_v39, -inf }
 0x4c7   : > { %3208 = vmax.xlane.f32.xlu0 %v3207_v31  ;;  %v1395_v31 = vmul.f32 %v8632_v63, %v1370_v46  ;;  %v1335_v46 = vmul.f32 %v11433_v35, %v9179_v0  ;;  %v1691_v35 = vsel %vm1680_vm4, %v1677_v13, %v1665_v12 }
 0x4c8   : > { %1839 = vperm.xlu1 %7915, %v9158_v40  }
 0x4c9   : > { %v2046_v2 = vpop.permute.xlu0 %2045 }
 0x4cc   : > { %1666 = vrot.lane.b32.xlu1 %v11446_v58, %s8029_s16 }
 0x4cd   : > { %7916 = vset.pattern.permute.xlu1 %v11442_v8 }
 0x4dd   : > { %1734 = vperm.xlu0 %7913, %v9158_v40  }
 0x4e1   : > { %7914 = vset.pattern.permute.xlu0 %v11448_v50 }
 0x4e2   : > { %2150 = vperm.xlu0 %7914, %v9021_v32  }
 0x4e6   : > { %2154 = vperm.xlu0 %7914, %v9158_v40  }
 0x4ea   : > { %7918 = vset.pattern.permute.xlu0 %v11430_v55 }
 0x524   : > { %v3206_v32 = vpop.xlane.xlu1 %3205 }
 0x525   : > { %v3210_v34 = vsub.f32 %v3201_v41, %v3206_v32  ;;  %v1394_v41 = vmul.f32 %v8628_v5, %v1376_v22  ;;  %v1481_v32 = vsel %vm1470_vm2, %v1467_v53, %v1455_v11  ;;  %v1586_v22 = vsel %vm1575_vm3, %v1572_v27, %v1560_v10 }
 0x526   : > { %v1499_v1 = vmul.f32 %v8647_v45, %v1481_v32 }
 0x527   : > { %v3212_v49 = vmul.f32 1.442695, %v3210_v34  ;;  %v1475_v34 = vsel %vm1470_vm2, %v1455_v11, %v1467_v53  ;;  %v1580_v11 = vsel %vm1575_vm3, %v1560_v10, %v1572_v27  ;;  %v1685_v10 = vsel %vm1680_vm4, %v1665_v12, %v1677_v13 }
 0x528   : > { %v1500_v50 = vmul.f32 %v8650_v20, %v1475_v34  ;;  %v1535_v53 = vmul.f32 %v1521_v62, %v1499_v1  ;;  %v1605_v32 = vmul.f32 %v8656_v15, %v1580_v11  ;;  %v1710_v1 = vmul.f32 %v8689_v14, %v1685_v10 }
 0x529   : > { %7971 = vpow2.f32 %v3212_v49  ;;  %v1430_v49 = vmul.f32 %v9182_v54, %v1394_v41  ;;  %v1336_v41 = vmul.f32 %v11437_v38, %v9179_v0  ;;  %v2085_v38 = vpop.permute.xlu0 %2084  ;;  %v1796_v12 = vsel %vm1785_vm5, %v1782_v42, %v1770_v61 }
 0x52a   : > { %v1536_v8 = vmul.f32 %v1521_v62, %v1500_v50  ;;  %v1709_v62 = vmul.f32 %v8686_v44, %v1691_v35  ;;  %v1901_v11 = vsel %vm1890_vm6, %v1887_v23, %v1875_v47 }
 0x533   : > { %v9228_v4 = vpop.eup %7971 }
 0x534   : > { %v3216_v6 = vsel %vm3203_vm9, %v9228_v4, 0.0 }
 0x535   : > { %3217 = vadd.xlane.f32.xlu1 %v3216_v6  ;;  %v1431_v6 = vmul.f32 %v9182_v54, %v1395_v31  ;;  %v1604_v54 = vmul.f32 %v8653_v43, %v1586_v22  ;;  %v1442_v31 = vadd.f32 %v1430_v49, %v1335_v46  ;;  %v1641_v49 = vmul.f32 %v9193_v9, %v1605_v32 }
 0x536   : > { %v1895_v46 = vsel %vm1890_vm6, %v1875_v47, %v1887_v23  ;;  %v1920_v23 = vmul.f32 %v8722_v25, %v1901_v11 }
 0x537   : > { %v1443_v34 = vadd.f32 %v1431_v6, %v1336_v41  ;;  %v1547_v27 = vadd.f32 %v1535_v53, %v1442_v31  ;;  %v1640_v50 = vmul.f32 %v9193_v9, %v1604_v54  ;;  %v1790_v6 = vsel %vm1785_vm5, %v1770_v61, %v1782_v42 }
 0x538   : > { %v1745_v9 = vmul.f32 %v9209_v28, %v1709_v62  ;;  %v1814_v41 = vmul.f32 %v8701_v56, %v1790_v6  ;;  %v1815_v54 = vmul.f32 %v8704_v19, %v1796_v12  ;;  %v1746_v61 = vmul.f32 %v9209_v28, %v1710_v1 }
 0x539   : > { %v1548_v0 = vadd.f32 %v1536_v8, %v1443_v34  ;;  %v1652_v13 = vadd.f32 %v1640_v50, %v1547_v27  ;;  %v2000_v42 = vsel %vm1995_vm7, %v9218_v57, %v9220_v52  ;;  %v2111_v50 = vsel %vm2100_vm8, %v9222_v18, %v2085_v38 }
 0x53a   : > { %v1850_v28 = vmul.f32 %v9212_v30, %v1814_v41  ;;  %v1851_v35 = vmul.f32 %v9212_v30, %v1815_v54  ;;  %v2024_v34 = vmul.f32 %v8741_v16, %v2000_v42 }
 0x53b   : > { %v1653_v8 = vadd.f32 %v1641_v49, %v1548_v0  ;;  %v1757_v31 = vadd.f32 %v1745_v9, %v1652_v13  ;;  %v2105_v0 = vsel %vm2100_vm8, %v2085_v38, %v9222_v18  ;;  %v9322_v18 = vld [vmem:[%s11259_s1 + $0x18] ss:$0 sm:$0xff] }
 0x53c   : > { %v2060_v49 = vmul.f32 %v2046_v2, %v2024_v34  ;;  %v2130_v38 = vmul.f32 %v9322_v18, %v2111_v50 }
 0x53d   : > { %v1758_v32 = vadd.f32 %v1746_v61, %v1653_v8  ;;  %v1862_v30 = vadd.f32 %v1850_v28, %v1757_v31  ;;  %v1525_v31 = vpop.permute.xlu1 %1524 }
 0x53f   : > { %v1863_v62 = vadd.f32 %v1851_v35, %v1758_v32 }
 0x541   : > { %v1350_v32 = vpop.permute.xlu1 %1349 }
 0x545   : > { %v1362_v28 = vpop.permute.xlu1 %1361 }
 0x546   : > { %1678 = vrot.lane.b32.xlu1 %v11447_v60, %s8029_s16 }
 0x549   : > { %v9350_v35 = vpop.permute.xlu1 %1629 }
 0x54a   : > { %1944 = vperm.xlu1 %7916, %v9158_v40  }
 0x54d   : > { %v1457_v34 = vpop.permute.xlu1 %1456 }
 0x54e   : > { %1771 = vrot.lane.b32.xlu1 %v11446_v58, %s8031_s18 }
 0x54f   : > { %7917 = vset.pattern.permute.xlu1 %v11443_v33 }
 0x552   : > { %1783 = vrot.lane.b32.xlu1 %v11447_v60, %s8031_s18 }
 0x554   : > { %v3209_v22 = vpop.xlane.xlu0 %3208 }
 0x555   : > { %v3211_v53 = vsub.f32 %v9201_v39, %v3209_v22  ;;  %v2006_v39 = vsel %vm1995_vm7, %v9220_v52, %v9218_v57  ;;  %v1956_v52 = vmul.f32 %v1941_v17, %v1920_v23 }
 0x556   : > { %2049 = vperm.xlu1 %7917, %v9158_v40   ;;  %v1919_v40 = vmul.f32 %v8707_v36, %v1895_v46  ;;  %v2025_v10 = vmul.f32 %v8744_v7, %v2006_v39 }
 0x557   : > { %v3214_v47 = vmul.f32 1.442695, %v3211_v53  ;;  %v1968_v12 = vadd.f32 %v1956_v52, %v1863_v62 }
 0x558   : > { %v1955_v57 = vmul.f32 %v1941_v17, %v1919_v40  ;;  %v2061_v1 = vmul.f32 %v2046_v2, %v2025_v10  ;;  %v9316_v17 = vld [vmem:[%s11259_s1 + $0x10] ss:$0 sm:$0xff]  ;;  %v1469_v10 = vpop.permute.xlu1 %1468 }
 0x559   : > { %7973 = vpow2.f32 %v3214_v47  ;;  %v2129_v13 = vmul.f32 %v9316_v17, %v2105_v0 }
 0x55a   : > { %1876 = vrot.lane.b32.xlu1 %v11446_v58, %s11321_s19  ;;  %v1967_v6 = vadd.f32 %v1955_v57, %v1862_v30  ;;  %v2073_v8 = vadd.f32 %v2061_v1, %v1968_v12 }
 0x55b   : > { %7919 = vset.pattern.permute.xlu1 %v11430_v55 }
 0x55c   : > { %v9303_v27 = vpop.permute.xlu0 %1734  ;;  %v2072_v2 = vadd.f32 %v2060_v49, %v1967_v6  ;;  %v1562_v57 = vpop.permute.xlu1 %1561 }
 0x55e   : > { %1888 = vrot.lane.b32.xlu1 %v11447_v60, %s11321_s19 }
 0x560   : > { %v1574_v52 = vpop.permute.xlu1 %1573 }
 0x561   : > { %v2151_v22 = vpop.permute.xlu0 %2150 }
 0x562   : > { %1981 = vrot.lane.b32.xlu1 %v11446_v58, %s11319_s21  ;;  %v2165_v46 = vmul.f32 %v2151_v22, %v2129_v13  ;;  %v2166_v11 = vmul.f32 %v2151_v22, %v2130_v38 }
 0x563   : > { %v9327_v53 = vpop.eup %7973 }
 0x564   : > { %v2177_v9 = vadd.f32 %v2165_v46, %v2072_v2  ;;  %v2178_v41 = vadd.f32 %v2166_v11, %v2073_v8  ;;  %v3219_v54 = vsel %vm3203_vm9, %v9327_v53, 0.0  ;;  %v9352_v0 = vpop.permute.xlu1 %1839 }
 0x565   : > { %3220 = vadd.xlane.f32.xlu0 %v3219_v54 }
 0x566   : > { %1993 = vrot.lane.b32.xlu1 %v11447_v60, %s11319_s21  ;;  %v9333_v61 = vand.u32 4294901760, %v2178_v41  ;;  %v9335_v42 = vand.u32 4294901760, %v2177_v9 }
 0x568   : > { %v9338_v39 = vsub.f32 %v2178_v41, %v9333_v61  ;;  %3230 = vmatprep.subr.mxu1 %v9333_v61  ;;  %v1667_v50 = vpop.permute.xlu1 %1666  ;;  %v9357_v6 = vsub.f32 %v2177_v9, %v9335_v42 }
 0x569   : > { %3232 = vmatpush1.msra.mxu1 %v9335_v42 }
 0x56a   : > { %2098 = vrot.lane.b32.xlu1 %v11447_v60, %s8034_s22  ;;  %v11317_v47 = vand.u32 4294901760, %v9338_v39  ;;  %v11315_v8 = vand.u32 4294901760, %v9357_v6 }
 0x56c   : > { %v3310_v40 = vsub.f32 %v9338_v39, %v11317_v47  ;;  %v3316_v9 = vsub.f32 %v9357_v6, %v11315_v8 }
 0x56e   : > { %v3311_v23 = vand.u32 4294901760, %v3310_v40  ;;  %v3317_v40 = vand.u32 4294901760, %v3316_v9 }
 0x570   : > { %3312 = vmatprep.subr.mxu1 %v3311_v23 }
 0x57b   : > { %2086 = vrot.lane.b32.xlu0 %v11446_v58, %s8034_s22 }
 0x5c2   : > { %v3218_v30 = vpop.xlane.xlu1 %3217 }
 0x5c3   : > { %7975 = vrcp.f32 %v3218_v30 }
 0x5c6   : > { %v1679_v62 = vpop.permute.xlu1 %1678 }
 0x5ca   : > { %v9354_v49 = vpop.permute.xlu1 %1944 }
 0x5cd   : > { %v7976_v1 = vpop.eup %7975 }
 0x5ce   : > { %v3224_v12 = vmul.f32 %v7976_v1, %v9228_v4  ;;  %v1772_v13 = vpop.permute.xlu1 %1771  ;;  %v1371_v1 = vsel %vm1365_vm1, %v1350_v32, %v1362_v28 }
 0x5d0   : > { %v3227_v38 = vsel %vm3203_vm9, %v3224_v12, 0  ;;  %v1377_v12 = vsel %vm1365_vm1, %v1362_v28, %v1350_v32  ;;  %v1581_v28 = vsel %vm1575_vm3, %v1562_v57, %v1574_v52 }
 0x5d1   : > { %v9361_v22 = vand.u32 4294901760, %v3227_v38  ;;  %v1396_v9 = vmul.f32 %v8628_v5, %v1377_v12 }
 0x5d2   : > { %v1784_v2 = vpop.permute.xlu1 %1783 }
 0x5d3   : > { %v9365_v46 = vsub.f32 %v3227_v38, %v9361_v22  ;;  %v1482_v38 = vsel %vm1470_vm2, %v1469_v10, %v1457_v34  ;;  %v1432_v12 = vmul.f32 %v9226_v21, %v1396_v9  ;;  %v1791_v9 = vsel %vm1785_vm5, %v1772_v13, %v1784_v2 }
 0x5d4   : > { %v1501_v32 = vmul.f32 %v8647_v45, %v1482_v38  ;;  %v1692_v38 = vsel %vm1680_vm4, %v1679_v62, %v1667_v50 }
 0x5d5   : > { %v11316_v11 = vand.u32 4294901760, %v9365_v46 }
 0x5d6   : > { %v9368_v41 = vpop.permute.xlu1 %2049 }
 0x5d7   : > { %v3299_v4 = vsub.f32 %v9365_v46, %v11316_v11 }
 0x5d9   : > { %v3300_v54 = vand.u32 4294901760, %v3299_v4  ;;  %v1397_v4 = vmul.f32 %v8632_v63, %v1371_v1 }
 0x5da   : > { %v1877_v23 = vpop.permute.xlu1 %1876 }
 0x5db   : > { %3301 = vmatmul.mubr.f32.vlgmr.msra.gmra.mrb[8].mxu1 %v3300_v54  ;;  %v1476_v54 = vsel %vm1470_vm2, %v1457_v34, %v1469_v10  ;;  %v1433_v1 = vmul.f32 %v9226_v21, %v1397_v4  ;;  %v1607_v34 = vmul.f32 %v8656_v15, %v1581_v28  ;;  %v1686_v10 = vsel %vm1680_vm4, %v1667_v50, %v1679_v62  ;;  %v2155_v28 = vpop.permute.xlu0 %2154 }
 0x5dc   : > { %3318 = vmatpush1.msra.mxu1 %v3317_v40  ;;  %3381 = vmatprep.mubr.f32.mxu1 %v11445_v37  ;;  %v1587_v40 = vsel %vm1575_vm3, %v1574_v52, %v1562_v57  ;;  %v1502_v11 = vmul.f32 %v8650_v20, %v1476_v54  ;;  %v1337_v57 = vmul.f32 %v11446_v58, %v9224_v51 }
 0x5dd   : > { %3391 = vmatprep.subr.mxu1 %v9338_v39  ;;  %v1606_v47 = vmul.f32 %v8653_v43, %v1587_v40  ;;  %v1338_v52 = vmul.f32 %v11447_v60, %v9224_v51  ;;  %v1537_v54 = vmul.f32 %v1525_v31, %v1501_v32  ;;  %v1797_v4 = vsel %vm1785_vm5, %v1784_v2, %v1772_v13 }
 0x5de   : > { %v1889_v30 = vpop.permute.xlu1 %1888  ;;  %v1538_v21 = vmul.f32 %v1525_v31, %v1502_v11  ;;  %v1444_v50 = vadd.f32 %v1432_v12, %v1337_v57  ;;  %v1711_v58 = vmul.f32 %v8686_v44, %v1692_v38  ;;  %v1712_v60 = vmul.f32 %v8689_v14, %v1686_v10 }
 0x5df   : > { %v1445_v62 = vadd.f32 %v1433_v1, %v1338_v52  ;;  %v11449_v32 = vand.u32 4294901760, %v9338_v39  ;;  %v1642_v31 = vmul.f32 %v9350_v35, %v1606_v47  ;;  %v1643_v11 = vmul.f32 %v9350_v35, %v1607_v34 }
 0x5e0   : > { %v1896_v13 = vsel %vm1890_vm6, %v1877_v23, %v1889_v30  ;;  %v1902_v2 = vsel %vm1890_vm6, %v1889_v30, %v1877_v23  ;;  %v1816_v40 = vmul.f32 %v8701_v56, %v1791_v9  ;;  %v1817_v12 = vmul.f32 %v8704_v19, %v1797_v4 }
 0x5e1   : > { %v1549_v1 = vadd.f32 %v1537_v54, %v1444_v50  ;;  %v1550_v10 = vadd.f32 %v1538_v21, %v1445_v62  ;;  %v1747_v35 = vmul.f32 %v9303_v27, %v1711_v58  ;;  %v1748_v34 = vmul.f32 %v9303_v27, %v1712_v60 }
 0x5e2   : > { %v1982_v8 = vpop.permute.xlu1 %1981  ;;  %v1921_v38 = vmul.f32 %v8707_v36, %v1896_v13  ;;  %v1922_v23 = vmul.f32 %v8722_v25, %v1902_v2  ;;  %v1852_v52 = vmul.f32 %v9352_v0, %v1816_v40  ;;  %v1853_v54 = vmul.f32 %v9352_v0, %v1817_v12 }
 0x5e3   : > { %3383 = vmatmul.mubr.f32.vlgmr.msra.gmra.mrb[8].mxu1 %v9361_v22  ;;  %v1654_v30 = vadd.f32 %v1642_v31, %v1549_v1  ;;  %v1655_v57 = vadd.f32 %v1643_v11, %v1550_v10  ;;  %v11451_v27 = vand.u32 4294901760, %v9357_v6 }
 0x5e4   : > { %3394 = vmatpush1.msra.mxu1 %v9357_v6  ;;  %3457 = vmatprep.mubr.f32.mxu1 %v11445_v37  ;;  %v1957_v58 = vmul.f32 %v9354_v49, %v1921_v38  ;;  %v1958_v0 = vmul.f32 %v9354_v49, %v1922_v23 }
 0x5e5   : > { %3467 = vmatprep.subr.mxu1 %v9333_v61  ;;  %v1759_v50 = vadd.f32 %v1747_v35, %v1654_v30  ;;  %v1760_v62 = vadd.f32 %v1748_v34, %v1655_v57 }
 0x5e6   : > { %v1994_v51 = vpop.permute.xlu1 %1993 }
 0x5e7   : > { %v2001_v39 = vsel %vm1995_vm7, %v1982_v8, %v1994_v51  ;;  %v2007_v47 = vsel %vm1995_vm7, %v1994_v51, %v1982_v8  ;;  %v11450_v8 = vand.u32 4294901760, %v9365_v46  ;;  %v1864_v60 = vadd.f32 %v1852_v52, %v1759_v50  ;;  %v4763_v50 = vld [vmem:[%s11266_s8 + $0x8] sm:$0xff] }
 0x5e8   : > { %v2026_v21 = vmul.f32 %v8741_v16, %v2001_v39  ;;  %v2027_v9 = vmul.f32 %v8744_v7, %v2007_v47  ;;  %v1865_v51 = vadd.f32 %v1853_v54, %v1760_v62  ;;  %4771 = vperm.xlu1 %7919, %v4763_v50   ;;  %v4779_v62 = vld [vmem:[%s11267_s9 + $0x8] sm:$0xff] }
 0x5e9   : > { %v1969_v2 = vadd.f32 %v1957_v58, %v1864_v60  ;;  %v4778_v58 = vld [vmem:[%s11267_s9] sm:$0xff] }
 0x5ea   : > { %v2099_v31 = vpop.permute.xlu1 %2098  ;;  %v1970_v40 = vadd.f32 %v1958_v0, %v1865_v51  ;;  %v4162_v51 = vld [vmem:[%s11265_s7] sm:$0xff] }
 0x5eb   : > { %3460 = vmatmul.mubr.f32.vlgmr.msra.gmra.mrb[8].mxu1 %v9365_v46  ;;  %v2063_v46 = vmul.f32 %v9368_v41, %v2027_v9 }
 0x5ec   : > { %3469 = vmatpush1.msra.mxu1 %v9335_v42  ;;  %3532 = vmatprep.mubr.f32.mxu1 %v11445_v37 }
 0x5ed   : > { %3545 = vmatprep.subr.mxu1 %v11449_v32  ;;  %v2062_v32 = vmul.f32 %v9368_v41, %v2026_v21  ;;  %v2075_v1 = vadd.f32 %v2063_v46, %v1970_v40  ;;  %4782 = vperm.xlu1 %7919, %v4778_v58   ;;  %v4163_v46 = vld [vmem:[%s11265_s7 + $0x8] sm:$0xff] }
 0x5ef   : > { %v2074_v12 = vadd.f32 %v2062_v32, %v1969_v2  ;;  %v4165_v32 = vsel %vm536_vm0, %v4162_v51, 0 }
 0x5f1   : > { %7920 = vset.pattern.permute.xlu1 %v11424_v3 }
 0x5f2   : > { %v3221_v4 = vpop.xlane.xlu0 %3220 }
 0x5f3   : > { %3536 = vmatmul.mubr.f32.vlgmr.msra.gmra.mrb[8].mxu1 %v11450_v8  ;;  %7977 = vrcp.f32 %v3221_v4 }
 0x5f4   : > { %3549 = vmatpush1.msra.mxu1 %v11451_v27  ;;  %3612 = vmatprep.mubr.f32.mxu1 %v11445_v37 }
 0x5f5   : > { %3621 = vmatprep.subr.mxu1 %v9333_v61 }
 0x5f6   : > { %v2087_v11 = vpop.permute.xlu0 %2086 }
 0x5f7   : > { %v2106_v6 = vsel %vm2100_vm8, %v2087_v11, %v2099_v31  ;;  %v2112_v13 = vsel %vm2100_vm8, %v2099_v31, %v2087_v11  ;;  %v9491_v31 = vand.u32 4294901760, %v4165_v32  ;;  %v4168_v11 = vsel %vm536_vm0, %v4163_v46, 0 }
 0x5f8   : > { %v2131_v49 = vmul.f32 %v9316_v17, %v2106_v6  ;;  %v2132_v61 = vmul.f32 %v9322_v18, %v2112_v13  ;;  %v9495_v2 = vand.u32 4294901760, %v4168_v11 }
 0x5f9   : > { %v4240_v13 = vsub.f32 %v4165_v32, %v9491_v31 }
 0x5fa   : > { %v2167_v10 = vmul.f32 %v2155_v28, %v2131_v49  ;;  %v2168_v39 = vmul.f32 %v2155_v28, %v2132_v61 }
 0x5fb   : > { %3614 = vmatmul.mubr.f32.vlgmr.msra.gmra.mrb[8].mxu1 %v9361_v22  ;;  %v4241_v49 = vand.u32 4294901760, %v4240_v13 }
 0x5fc   : > { %3623 = vmatpush1.msra.mxu1 %v9335_v42  ;;  %3686 = vmatprep.mubr.f32.mxu1 %v11445_v37  ;;  %v2179_v41 = vadd.f32 %v2167_v10, %v2074_v12  ;;  %v2180_v47 = vadd.f32 %v2168_v39, %v2075_v1  ;;  %v4251_v12 = vsub.f32 %v4168_v11, %v9495_v2 }
 0x5fd   : > { %v7978_v35 = vpop.eup %7977 }
 0x5fe   : > { %v3225_v34 = vmul.f32 %v7978_v35, %v9327_v53  ;;  %v3697_v38 = vand.u32 4294901760, %v2180_v47  ;;  %v3699_v23 = vand.u32 4294901760, %v2179_v41 }
 0x600   : > { %3698 = vmatprep.subr.mxu1 %v3697_v38  ;;  %v3776_v17 = vsub.f32 %v2180_v47, %v3697_v38  ;;  %v3695_v18 = vsel %vm3203_vm9, %v3225_v34, 0  ;;  %v3782_v30 = vsub.f32 %v2179_v41, %v3699_v23  ;;  %v4242_v47 = vsub.f32 %v4240_v13, %v4241_v49 }
 0x601   : > { %v3764_v57 = vand.u32 4294901760, %v3695_v18 }
 0x602   : > { %v3777_v28 = vand.u32 4294901760, %v3776_v17  ;;  %v3783_v52 = vand.u32 4294901760, %v3782_v30 }
 0x603   : > { %3688 = vmatmul.mubr.f32.vlgmr.msra.gmra.mrb[8].mxu1 %v9361_v22  ;;  %v3765_v42 = vsub.f32 %v3695_v18, %v3764_v57  ;;  %v4762_v22 = vld [vmem:[%s11266_s8] sm:$0xff] }
 0x604   : > { %3700 = vmatpush1.msra.mxu1 %v3699_v23  ;;  %3763 = vmatprep.mubr.f32.mxu1 %v11445_v37  ;;  %v3778_v54 = vsub.f32 %v3776_v17, %v3777_v28  ;;  %v3784_v53 = vsub.f32 %v3782_v30, %v3783_v52 }
 0x605   : > { %v3766_v21 = vand.u32 4294901760, %v3765_v42  ;;  %4766 = vperm.xlu0 %7918, %v4762_v22  }
 0x606   : > { %v3779_v9 = vand.u32 4294901760, %v3778_v54  ;;  %v3785_v27 = vand.u32 4294901760, %v3784_v53 }
 0x607   : > { %v3767_v4 = vsub.f32 %v3765_v42, %v3766_v21 }
 0x608   : > { %3780 = vmatprep.subr.mxu1 %v3779_v9 }
 0x609   : > { %v3768_v8 = vand.u32 4294901760, %v3767_v4  ;;  %4787 = vperm.xlu0 %7918, %v4779_v62  }
 0x60b   : > { %3769 = vmatmul.mubr.f32.vlgmr.msra.gmra.mrb[10].mxu1 %v3768_v8 }
 0x60c   : > { %3786 = vmatpush1.msra.mxu1 %v3785_v27  ;;  %3849 = vmatprep.mubr.f32.mxu1 %v11445_v37 }
 0x60d   : > { %3859 = vmatprep.subr.mxu1 %v3776_v17  ;;  %7921 = vset.pattern.permute.xlu0 %v11424_v3 }
 0x613   : > { %3851 = vmatmul.mubr.f32.vlgmr.msra.gmra.mrb[10].mxu1 %v3764_v57 }
 0x614   : > { %3862 = vmatpush1.msra.mxu1 %v3782_v30  ;;  %3925 = vmatprep.mubr.f32.mxu1 %v11445_v37 }
 0x615   : > { %3935 = vmatprep.subr.mxu1 %v3697_v38 }
 0x61b   : > { %3928 = vmatmul.mubr.f32.vlgmr.msra.gmra.mrb[10].mxu1 %v3765_v42  ;;  %v4243_v42 = vand.u32 4294901760, %v4242_v47 }
 0x61c   : > { %3937 = vmatpush1.msra.mxu1 %v3699_v23  ;;  %4000 = vmatprep.mubr.f32.mxu1 %v11445_v37 }
 0x61d   : > { %4013 = vmatprep.subr.mxu1 %v3777_v28 }
 0x623   : > { %4004 = vmatmul.mubr.f32.vlgmr.msra.gmra.mrb[10].mxu1 %v3766_v21 }
 0x624   : > { %4017 = vmatpush1.msra.mxu1 %v3783_v52  ;;  %4080 = vmatprep.mubr.f32.mxu1 %v11445_v37 }
 0x625   : > { %4089 = vmatprep.subr.mxu1 %v3697_v38  ;;  %v4252_v38 = vand.u32 4294901760, %v4251_v12 }
 0x627   : > { %v4253_v9 = vsub.f32 %v4251_v12, %v4252_v38 }
 0x629   : > { %v4254_v58 = vand.u32 4294901760, %v4253_v9 }
 0x62b   : > { %4082 = vmatmul.mubr.f32.vlgmr.msra.gmra.mrb[10].mxu1 %v3764_v57 }
 0x62c   : > { %4091 = vmatpush1.msra.mxu1 %v3699_v23  ;;  %4154 = vmatprep.mubr.f32.mxu1 %v11445_v37 }
 0x633   : > { %4156 = vmatmul.mubr.f32.vlgmr.msra.gmra.mrb[10].mxu1 %v3764_v57 }
 0x634   : > { %4238 = vmatprep.mubr.f32.mxu1 %v11445_v37 }
 0x6d6   : > { %v3689_v0 = vpop.f32.mrb[8].mxu1 }
 0x6d7   : > { %v3691_v60 = vpop.f32.mrb[9].mxu1  ;;  %v4172_v6 = vand.u32 4294901760, %v3689_v0 }
 0x6d8   : > { %v4170_v3 = vand.u32 4294901760, %v3691_v60 }
 0x6d9   : > { %v4268_v40 = vsub.f32 %v3689_v0, %v4172_v6 }
 0x6da   : > { %v4262_v61 = vsub.f32 %v3691_v60, %v4170_v3 }
 0x6db   : > { %v4269_v10 = vand.u32 4294901760, %v4268_v40 }
 0x6dc   : > { %v4263_v35 = vand.u32 4294901760, %v4262_v61 }
 0x6dd   : > { %v4270_v57 = vsub.f32 %v4268_v40, %v4269_v10 }
 0x6de   : > { %v4264_v54 = vsub.f32 %v4262_v61, %v4263_v35 }
 0x6df   : > { %v4271_v50 = vand.u32 4294901760, %v4270_v57 }
 0x6e0   : > { %v4265_v0 = vand.u32 4294901760, %v4264_v54 }
 0x706   : > { %v4157_v1 = vpop.f32.mrb[10].mxu1 }
 0x707   : > { %v4176_v39 = vand.u32 4294901760, %v4157_v1  ;;  %v4159_v41 = vpop.f32.mrb[11].mxu1 }
 0x708   : > { %v4174_v34 = vand.u32 4294901760, %v4159_v41 }
 0x709   : > { %v7534_v23 = vpack.c.bf16 %v4176_v39, %v4172_v6  ;;  %v4280_v17 = vsub.f32 %v4157_v1, %v4176_v39 }
 0x70a   : > { %v7532_v18 = vpack.c.bf16 %v4174_v34, %v4170_v3  ;;  %v4274_v30 = vsub.f32 %v4159_v41, %v4174_v34 }
 0x70b   : > { %v4281_v28 = vand.u32 4294901760, %v4280_v17  ;;  %v7542_v52 = vpack.c.bf16 %v4280_v17, %v4268_v40  ;;  %v8002_v40 = vld [vmem:[%s8144_s23 + $0x10] sm:$0xff] }
 0x70c   : > { %v4275_v21 = vand.u32 4294901760, %v4274_v30  ;;  %7533 = vmatprep.subr.bf16.mxu1 %v7532_v18  ;;  %v7540_v53 = vpack.c.bf16 %v4274_v30, %v4262_v61 }
 0x70d   : > { %v4282_v4 = vsub.f32 %v4280_v17, %v4281_v28  ;;  %7535 = vmatpush1.bf16.msra.mxu1 %v7534_v23  ;;  %v7550_v8 = vpack.c.bf16 %v4281_v28, %v4269_v10 }
 0x70e   : > { %v4276_v27 = vsub.f32 %v4274_v30, %v4275_v21  ;;  %v7548_v22 = vpack.c.bf16 %v4275_v21, %v4263_v35 }
 0x70f   : > { %v4283_v62 = vand.u32 4294901760, %v4282_v4 }
 0x710   : > { %4244 = vmatmul.mubr.f32.vlgmr.msra.gmra.mrb[12].mxu1 %v4243_v42  ;;  %v4277_v60 = vand.u32 4294901760, %v4276_v27 }
 0x711   : > { %4249 = vmatprep.mubr.f32.mxu1 %v11445_v37  ;;  %v7538_v51 = vpack.c.bf16 %v4283_v62, %v4271_v50 }
 0x712   : > { %v7536_v32 = vpack.c.bf16 %v4277_v60, %v4265_v0 }
 0x714   : > { %4255 = vmatmul.mubr.f32.gmra.mrb[14].mxu1 %v4254_v58  ;;  %7537 = vmatprep.subr.bf16.mxu1 %v7536_v32 }
 0x715   : > { %7539 = vmatpush1.bf16.msra.mxu1 %v7538_v51  ;;  %4345 = vmatprep.mubr.f32.mxu1 %v11445_v37 }
 0x716   : > { %7541 = vmatprep.subr.bf16.mxu1 %v7540_v53 }
 0x718   : > { %4347 = vmatmul.mubr.f32.vlgmr.msra.gmra.mrb[12].mxu1 %v9491_v31 }
 0x719   : > { %7543 = vmatpush1.bf16.msra.mxu1 %v7542_v52  ;;  %4352 = vmatprep.mubr.f32.mxu1 %v11445_v37 }
 0x71a   : > { %7545 = vmatprep.subr.bf16.mxu1 %v7532_v18 }
 0x71c   : > { %4354 = vmatmul.mubr.f32.gmra.mrb[14].mxu1 %v9495_v2 }
 0x71d   : > { %4432 = vmatprep.mubr.f32.mxu1 %v11445_v37 }
 0x720   : > { %4435 = vmatmul.mubr.f32.vlgmr.msra.gmra.mrb[12].mxu1 %v4240_v13  ;;  %v8001_v13 = vld [vmem:[%s8144_s23] sm:$0xff] }
 0x721   : > { %7547 = vmatpush1.bf16.msra.mxu1 %v7534_v23  ;;  %4440 = vmatprep.mubr.f32.mxu1 %v11445_v37 }
 0x722   : > { %7549 = vmatprep.subr.bf16.mxu1 %v7548_v22 }
 0x724   : > { %4443 = vmatmul.mubr.f32.gmra.mrb[14].mxu1 %v4251_v12  ;;  %v8003_v12 = vld [vmem:[%s8144_s23 + $0x8] sm:$0xff] }
 0x725   : > { %4517 = vmatprep.mubr.f32.mxu1 %v11445_v37 }
 0x728   : > { %4521 = vmatmul.mubr.f32.vlgmr.msra.gmra.mrb[12].mxu1 %v4241_v49 }
 0x729   : > { %7551 = vmatpush1.bf16.msra.mxu1 %v7550_v8  ;;  %4526 = vmatprep.mubr.f32.mxu1 %v11445_v37 }
 0x72a   : > { %7553 = vmatprep.subr.bf16.mxu1 %v7532_v18 }
 0x72c   : > { %4530 = vmatmul.mubr.f32.gmra.mrb[14].mxu1 %v4252_v38 }
 0x72d   : > { %4612 = vmatprep.mubr.f32.mxu1 %v11445_v37 }
 0x730   : > { %4614 = vmatmul.mubr.f32.vlgmr.msra.gmra.mrb[12].mxu1 %v9491_v31 }
 0x731   : > { %7555 = vmatpush1.bf16.msra.mxu1 %v7534_v23  ;;  %4619 = vmatprep.mubr.f32.mxu1 %v11445_v37 }
 0x734   : > { %4621 = vmatmul.mubr.f32.gmra.mrb[14].mxu1 %v9495_v2 }
 0x735   : > { %4695 = vmatprep.mubr.f32.mxu1 %v11445_v37 }
 0x738   : > { %4697 = vmatmul.mubr.f32.vlgmr.msra.gmra.mrb[12].mxu1 %v9491_v31  ;;  %v8004_v31 = vld [vmem:[%s8144_s23 + $0x18] sm:$0xff] }
 0x739   : > { %4702 = vmatprep.mubr.f32.mxu1 %v11445_v37 }
 0x73c   : > { %4704 = vmatmul.mubr.f32.gmra.mrb[14].mxu1 %v9495_v2 }
 0x73d   : > { %4894 = vmatprep.mubr.f32.mxu1 %v11445_v37 }
 0x80b   : > { %v4698_v46 = vpop.f32.mrb[12].mxu1 }
 0x80c   : > { %v4700_v11 = vpop.f32.mrb[13].mxu1  ;;  %v9517_v3 = vadd.f32 %v8001_v13, %v4698_v46 }
 0x80d   : > { %v9523_v1 = vadd.f32 %v8003_v12, %v4700_v11  ;;  %v9539_v11 = vld [vmem:[%s11269_s11] sm:$0xff]  ;;  %v9545_v12 = vld [vmem:[%s11269_s11 + $0x10] sm:$0xff] }
 0x80e   : > { %11452 = vst [vmem:[#allocation16_spill] sm:$0xff] %v9517_v3  ;;  %5670 = vperm.xlu1 %7920, %v9539_v11  }
 0x80f   : > { %v4705_v6 = vpop.f32.mrb[14].mxu1  ;;  %11454 = vst [vmem:[#allocation21_spill] sm:$0xff] %v9523_v1 }
 0x810   : > { %v9520_v49 = vadd.f32 %v8002_v40, %v4705_v6  ;;  %v4707_v61 = vpop.f32.mrb[15].mxu1 }
 0x811   : > { %v9526_v10 = vadd.f32 %v8004_v31, %v4707_v61 }
 0x812   : > { %11453 = vst [vmem:[#allocation8_spill] sm:$0xff] %v9520_v49  ;;  %v4714_v2 = vadd.f32 %v9520_v49, %v9517_v3  ;;  %5680 = vperm.xlu1 %7920, %v9545_v12  }
 0x813   : > { %11455 = vst [vmem:[#allocation9_spill] sm:$0xff] %v9526_v10  ;;  %v4721_v39 = vadd.f32 %v9526_v10, %v9523_v1 }
 0x814   : > { %v4715_v41 = vrot.slane %v4714_v2, 4 }
 0x815   : > { %v4722_v47 = vrot.slane %v4721_v39, 4 }
 0x816   : > { %v4716_v35 = vadd.f32 %v4715_v41, %v4714_v2 }
 0x817   : > { %v4723_v34 = vadd.f32 %v4722_v47, %v4721_v39  ;;  %v9551_v47 = vld [vmem:[%s11269_s11 + $0x18] sm:$0xff] }
 0x818   : > { %v4717_v38 = vrot.slane %v4716_v35, 2  ;;  %5685 = vperm.xlu1 %7920, %v9551_v47  }
 0x819   : > { %v4724_v23 = vrot.slane %v4723_v34, 2 }
 0x81a   : > { %v4718_v17 = vadd.f32 %v4717_v38, %v4716_v35 }
 0x81b   : > { %v4725_v18 = vadd.f32 %v4724_v23, %v4723_v34  ;;  %v4794_v34 = vld [vmem:[%s11268_s10] sm:$0xff] }
 0x81c   : > { %v4719_v30 = vrot.slane %v4718_v17, 1 }
 0x81d   : > { %v4726_v57 = vrot.slane %v4725_v18, 1 }
 0x81e   : > { %v4720_v28 = vadd.f32 %v4719_v30, %v4718_v17  ;;  %v4803_v17 = vsel %vm536_vm0, %v4794_v34, 0 }
 0x81f   : > { %v4727_v52 = vadd.f32 %v4726_v57, %v4725_v18  ;;  %v9561_v18 = vld [vmem:[%s11269_s11 + $0x28] sm:$0xff]  ;;  %v9564_v30 = vand.u32 4294901760, %v4803_v17  ;;  %v9569_v57 = vld [vmem:[%s11269_s11 + $0x38] sm:$0xff] }
 0x820   : > { %v4728_v42 = vmul.f32 0.0625, %v4720_v28  ;;  %5695 = vperm.xlu1 %7920, %v9561_v18   ;;  %v4795_v28 = vld [vmem:[%s11268_s10 + $0x8] sm:$0xff] }
 0x821   : > { %v4729_v54 = vmul.f32 0.0625, %v4727_v52  ;;  %v9576_v52 = vsub.f32 %v4803_v17, %v9564_v30 }
 0x822   : > { %v4732_v21 = vsub.f32 %v9520_v49, %v4728_v42  ;;  %v4730_v9 = vsub.f32 %v9517_v3, %v4728_v42  ;;  %v4767_v42 = vpop.permute.xlu0 %4766 }
 0x823   : > { %v4733_v53 = vsub.f32 %v9526_v10, %v4729_v54  ;;  %v4731_v4 = vsub.f32 %v9523_v1, %v4729_v54  ;;  %v4772_v54 = vpop.permute.xlu1 %4771 }
 0x824   : > { %v4736_v8 = vmul.f32 %v4732_v21, %v4732_v21  ;;  %v4734_v27 = vmul.f32 %v4730_v9, %v4730_v9  ;;  %5705 = vperm.xlu1 %7920, %v9569_v57  }
 0x825   : > { %v4737_v22 = vmul.f32 %v4733_v53, %v4733_v53  ;;  %v4735_v50 = vmul.f32 %v4731_v4, %v4731_v4 }
 0x826   : > { %v4738_v62 = vadd.f32 %v4736_v8, %v4734_v27  ;;  %v4806_v8 = vsel %vm536_vm0, %v4795_v28, 0 }
 0x827   : > { %v4745_v58 = vadd.f32 %v4737_v22, %v4735_v50  ;;  %v4796_v22 = vld [vmem:[%s11268_s10 + $0x10] sm:$0xff] }
 0x828   : > { %v4739_v0 = vrot.slane %v4738_v62, 4  ;;  %7923 = vset.pattern.permute.xlu1 %v11430_v55 }
 0x829   : > { %v4746_v60 = vrot.slane %v4745_v58, 4 }
 0x82a   : > { %v4740_v51 = vadd.f32 %v4739_v0, %v4738_v62  ;;  %v11324_v0 = vand.u32 4294901760, %v9576_v52 }
 0x82b   : > { %v4747_v32 = vadd.f32 %v4746_v60, %v4745_v58 }
 0x82c   : > { %v4741_v46 = vrot.slane %v4740_v51, 2 }
 0x82d   : > { %v4748_v6 = vrot.slane %v4747_v32, 2 }
 0x82e   : > { %v4742_v13 = vadd.f32 %v4741_v46, %v4740_v51 }
 0x82f   : > { %v4749_v40 = vadd.f32 %v4748_v6, %v4747_v32  ;;  %v9584_v32 = vand.u32 4294901760, %v4806_v8 }
 0x830   : > { %v4743_v61 = vrot.slane %v4742_v13, 1 }
 0x831   : > { %v4750_v31 = vrot.slane %v4749_v40, 1  ;;  %v9601_v34 = vsub.f32 %v4806_v8, %v9584_v32 }
 0x832   : > { %v4744_v2 = vadd.f32 %v4743_v61, %v4742_v13  ;;  %v4809_v13 = vsel %vm536_vm0, %v4796_v22, 0 }
 0x833   : > { %v4751_v39 = vadd.f32 %v4750_v31, %v4749_v40  ;;  %v9590_v40 = vld [vmem:[%s11269_s11 + $0x8] sm:$0xff] }
 0x834   : > { %v4752_v41 = vmul.f32 0.0625, %v4744_v2  ;;  %v4788_v2 = vpop.permute.xlu0 %4787  ;;  %5793 = vperm.xlu1 %7923, %v9590_v40   ;;  %5675 = vperm.xlu0 %7921, %v9590_v40  }
 0x835   : > { %v4753_v35 = vmul.f32 0.0625, %v4751_v39  ;;  %v4797_v39 = vld [vmem:[%s11268_s10 + $0x18] sm:$0xff] }
 0x836   : > { %v4754_v38 = vadd.f32 1e-05, %v4752_v41 }
 0x837   : > { %v4755_v23 = vadd.f32 1e-05, %v4753_v35 }
 0x838   : > { %7979 = vrsqrt.f32 %v4754_v38  ;;  %v9603_v38 = vand.u32 4294901760, %v4809_v13  ;;  %5797 = vperm.xlu1 %7923, %v9545_v12  }
 0x839   : > { %7981 = vrsqrt.f32 %v4755_v23 }
 0x842   : > { %v7980_v27 = vpop.eup %7979 }
 0x843   : > { %v7982_v50 = vpop.eup %7981  ;;  %v4758_v62 = vmul.f32 %v7980_v27, %v4730_v9  ;;  %v4760_v58 = vmul.f32 %v7980_v27, %v4732_v21  ;;  %v4783_v9 = vpop.permute.xlu1 %4782  ;;  %v11323_v27 = vand.u32 4294901760, %v9601_v34 }
 0x844   : > { %v4759_v60 = vmul.f32 %v7982_v50, %v4731_v4  ;;  %v4761_v51 = vmul.f32 %v7982_v50, %v4733_v53  ;;  %v4898_v4 = vsub.f32 %v9576_v52, %v11324_v0  ;;  %v9654_v0 = vld [vmem:[%s11269_s11 + $0x30] sm:$0xff] }
 0x845   : > { %v4774_v46 = vmul.f32 %v4767_v42, %v4758_v62  ;;  %v4776_v6 = vmul.f32 %v4772_v54, %v4760_v58 }
 0x846   : > { %v4775_v61 = vmul.f32 %v4767_v42, %v4759_v60  ;;  %v4777_v31 = vmul.f32 %v4772_v54, %v4761_v51  ;;  %v4812_v54 = vsel %vm536_vm0, %v4797_v39, 0  ;;  %v4899_v62 = vand.u32 4294901760, %v4898_v4 }
 0x847   : > { %v4792_v21 = vadd.f32 %v4788_v2, %v4776_v6  ;;  %v4790_v53 = vadd.f32 %v4783_v9, %v4774_v46  ;;  %v9615_v51 = vsub.f32 %v4809_v13, %v9603_v38  ;;  %v4798_v46 = vld [vmem:[%s11268_s10 + $0x20] sm:$0xff]  ;;  %v4909_v4 = vsub.f32 %v9601_v34, %v11323_v27 }
 0x848   : > { %v4793_v41 = vadd.f32 %v4788_v2, %v4777_v31  ;;  %v4791_v35 = vadd.f32 %v4783_v9, %v4775_v61  ;;  %v9624_v2 = vand.u32 4294901760, %v4812_v54  ;;  %v9629_v9 = vld [vmem:[%s11269_s11 + $0x20] sm:$0xff] }
 0x849   : > { %v4832_v23 = vand.u32 4294901760, %v4792_v21  ;;  %v4828_v17 = vand.u32 4294901760, %v4790_v53  ;;  %5805 = vperm.xlu1 %7923, %v9629_v9   ;;  %5690 = vperm.xlu0 %7921, %v9629_v9   ;;  %v4910_v10 = vand.u32 4294901760, %v4909_v4 }
 0x84a   : > { %v4830_v28 = vand.u32 4294901760, %v4793_v41  ;;  %v4826_v42 = vand.u32 4294901760, %v4791_v35 }
 0x84b   : > { %v9608_v22 = vsub.f32 %v4792_v21, %v4832_v23  ;;  %v9610_v50 = vsub.f32 %v4790_v53, %v4828_v17  ;;  %v9622_v31 = vpack.c.bf16 %v4832_v23, %v4828_v17  ;;  %v4815_v23 = vsel %vm536_vm0, %v4798_v46, 0 }
 0x84c   : > { %v4996_v58 = vsub.f32 %v4793_v41, %v4830_v28  ;;  %v4984_v8 = vsub.f32 %v4791_v35, %v4826_v42  ;;  %v9612_v60 = vpack.c.bf16 %v4830_v28, %v4826_v42  ;;  %v4799_v42 = vld [vmem:[%s11268_s10 + $0x28] sm:$0xff] }
 0x84d   : > { %v11325_v6 = vand.u32 4294901760, %v9608_v22  ;;  %v11326_v61 = vand.u32 4294901760, %v9610_v50  ;;  %v7566_v39 = vpack.c.bf16 %v9608_v22, %v9610_v50  ;;  %v4818_v27 = vsel %vm536_vm0, %v4799_v42, 0  ;;  %5813 = vperm.xlu1 %7923, %v9654_v0   ;;  %5700 = vperm.xlu0 %7921, %v9654_v0  }
 0x84e   : > { %7557 = vmatprep.subr.bf16.mxu1 %v9612_v60  ;;  %v7564_v13 = vpack.c.bf16 %v4996_v58, %v4984_v8  ;;  %v4985_v21 = vand.u32 4294901760, %v4984_v8  ;;  %v4997_v53 = vand.u32 4294901760, %v4996_v58 }
 0x84f   : > { %7559 = vmatpush1.bf16.msra.mxu1 %v9622_v31  ;;  %v4992_v41 = vsub.f32 %v9610_v50, %v11326_v61  ;;  %v5004_v35 = vsub.f32 %v9608_v22, %v11325_v6 }
 0x850   : > { %7565 = vmatprep.subr.bf16.mxu0 %v7564_v13  ;;  %v4986_v17 = vsub.f32 %v4984_v8, %v4985_v21  ;;  %v4998_v28 = vsub.f32 %v4996_v58, %v4997_v53  ;;  %v9658_v58 = vsub.f32 %v4812_v54, %v9624_v2  ;;  %v9660_v8 = vand.u32 4294901760, %v4815_v23 }
 0x851   : > { %7567 = vmatpush1.bf16.msra.mxu0 %v7566_v39  ;;  %v4993_v6 = vand.u32 4294901760, %v4992_v41  ;;  %v5005_v61 = vand.u32 4294901760, %v5004_v35  ;;  %v7572_v41 = vpack.c.bf16 %v4997_v53, %v4985_v21  ;;  %v11456_v35 = vand.u32 4294901760, %v9615_v51  ;;  %7924 = vset.pattern.permute.xlu1 %v11441_v24 }
 0x852   : > { %7569 = vmatprep.subr.bf16.mxu0 %v9612_v60  ;;  %v4987_v46 = vand.u32 4294901760, %v4986_v17  ;;  %v4999_v13 = vand.u32 4294901760, %v4998_v28  ;;  %4900 = vmatmul.mubr.f32.vlgmr.msra.gmra.mrb[16].mxu1 %v4899_v62  ;;  %v4800_v62 = vld [vmem:[%s11268_s10 + $0x30] sm:$0xff]  ;;  %v4930_v54 = vand.u32 4294901760, %v9658_v58  ;;  %v9677_v21 = vsub.f32 %v4815_v23, %v9660_v8 }
 0x853   : > { %4905 = vmatprep.mubr.f32.mxu1 %v11445_v37  ;;  %v4920_v17 = vsub.f32 %v9615_v51, %v11456_v35  ;;  %v7562_v4 = vpack.c.bf16 %v5005_v61, %v4993_v6  ;;  %v9679_v53 = vand.u32 4294901760, %v4818_v27  ;;  %v4821_v28 = vsel %vm536_vm0, %v4800_v62, 0  ;;  %v4801_v6 = vld [vmem:[%s11268_s10 + $0x38] sm:$0xff]  ;;  %5917 = vperm.xlu1 %7924, %v9539_v11  }
 0x854   : > { %5199 = vmatmul.mubr.f32.vlgmr.msra.gmra.mrb[12].mxu0 %v9576_v52  ;;  %v7560_v39 = vpack.c.bf16 %v4999_v13, %v4987_v46  ;;  %v4941_v42 = vand.u32 4294901760, %v9677_v21  ;;  %v4931_v23 = vsub.f32 %v9658_v58, %v4930_v54  ;;  %v9696_v13 = vand.u32 4294901760, %v4821_v28  ;;  %7922 = vset.pattern.permute.xlu0 %v11430_v55 }
 0x855   : > { %7571 = vmatpush1.bf16.msra.mxu0 %v9622_v31  ;;  %5204 = vmatprep.mubr.f32.mxu0 %v11445_v37  ;;  %v4921_v61 = vand.u32 4294901760, %v4920_v17  ;;  %v9694_v46 = vsub.f32 %v4818_v27, %v9679_v53 }
 0x856   : > { %7561 = vmatprep.subr.bf16.mxu1 %v7560_v39  ;;  %7573 = vmatprep.subr.bf16.mxu0 %v7572_v41  ;;  %v4932_v39 = vand.u32 4294901760, %v4931_v23  ;;  %v4942_v27 = vsub.f32 %v9677_v21, %v4941_v42  ;;  %v9710_v55 = vsub.f32 %v4821_v28, %v9696_v13 }
 0x857   : > { %7563 = vmatpush1.bf16.msra.mxu1 %v7562_v4  ;;  %5789 = vperm.xlu0 %7922, %v9539_v11   ;;  %v4952_v41 = vand.u32 4294901760, %v9694_v46 }
 0x858   : > { %5207 = vmatmul.mubr.f32.gmra.mrb[14].mxu0 %v9601_v34  ;;  %4911 = vmatmul.mubr.f32.gmra.mrb[18].mxu1 %v4910_v10  ;;  %v4824_v10 = vsel %vm536_vm0, %v4801_v6, 0  ;;  %v4943_v35 = vand.u32 4294901760, %v4942_v27  ;;  %v4963_v17 = vand.u32 4294901760, %v9710_v55 }
 0x859   : > { %5212 = vmatprep.mubr.f32.mxu0 %v11445_v37  ;;  %4916 = vmatprep.mubr.f32.mxu1 %v11445_v37  ;;  %v9712_v62 = vand.u32 4294901760, %v4824_v10  ;;  %v4953_v4 = vsub.f32 %v9694_v46, %v4952_v41 }
 0x85a   : > { %7926 = vset.pattern.permute.xlu1 %v11435_v26  ;;  %v4964_v23 = vsub.f32 %v9710_v55, %v4963_v17 }
 0x85b   : > { %6045 = vperm.xlu1 %7926, %v9539_v11   ;;  %5801 = vperm.xlu0 %7922, %v9551_v47   ;;  %v9725_v28 = vsub.f32 %v4824_v10, %v9712_v62  ;;  %v4954_v6 = vand.u32 4294901760, %v4953_v4  ;;  %v11458_v4 = vand.u32 4294901760, %v9608_v22  ;;  %v11460_v22 = vand.u32 4294901760, %v9601_v34 }
 0x85c   : > { %5215 = vmatmul.mubr.f32.gmra.mrb[16].mxu0 %v9615_v51  ;;  %4922 = vmatmul.mubr.f32.gmra.mrb[20].mxu1 %v4921_v61  ;;  %v4965_v10 = vand.u32 4294901760, %v4964_v23  ;;  %v11459_v23 = vand.u32 4294901760, %v9576_v52  ;;  %v11461_v52 = vand.u32 4294901760, %v9615_v51  ;;  %v11462_v34 = vmov 6  }
 0x85d   : > { %5220 = vmatprep.mubr.f32.mxu0 %v11445_v37  ;;  %4927 = vmatprep.mubr.f32.mxu1 %v11445_v37  ;;  %v4974_v61 = vand.u32 4294901760, %v9725_v28 }
 0x85f   : > { %6049 = vperm.xlu1 %7926, %v9590_v40   ;;  %5809 = vperm.xlu0 %7922, %v9561_v18  }
 0x860   : > { %5223 = vmatmul.mubr.f32.gmra.mrb[18].mxu0 %v9658_v58  ;;  %4933 = vmatmul.mubr.f32.gmra.mrb[22].mxu1 %v4932_v39  ;;  %v4975_v39 = vsub.f32 %v9725_v28, %v4974_v61 }
 0x861   : > { %5228 = vmatprep.mubr.f32.mxu0 %v11445_v37  ;;  %4938 = vmatprep.mubr.f32.mxu1 %v11445_v37 }
 0x862   : > { %v4976_v27 = vand.u32 4294901760, %v4975_v39 }
 0x863   : > { %7927 = vset.pattern.permute.xlu1 %v11441_v24  ;;  %5817 = vperm.xlu0 %7922, %v9569_v57  }
 0x864   : > { %5231 = vmatmul.mubr.f32.gmra.mrb[20].mxu0 %v9677_v21  ;;  %4944 = vmatmul.mubr.f32.gmra.mrb[24].mxu1 %v4943_v35  ;;  %v11457_v35 = vand.u32 4294901760, %v9610_v50  ;;  %v11463_v50 = vmov 8  }
 0x865   : > { %5236 = vmatprep.mubr.f32.mxu0 %v11445_v37  ;;  %4949 = vmatprep.mubr.f32.mxu1 %v11445_v37 }
 0x866   : > { %5929 = vperm.xlu1 %7927, %v9551_v47  }
 0x867   : > { %7925 = vset.pattern.permute.xlu0 %v11441_v24 }
 0x868   : > { %5239 = vmatmul.mubr.f32.gmra.mrb[22].mxu0 %v9694_v46  ;;  %4955 = vmatmul.mubr.f32.gmra.mrb[26].mxu1 %v4954_v6  ;;  %v7574_v6 = vpack.c.bf16 %v11458_v4, %v11457_v35 }
 0x869   : > { %5244 = vmatprep.mubr.f32.mxu0 %v11445_v37  ;;  %4960 = vmatprep.mubr.f32.mxu1 %v11445_v37 }
 0x86a   : > { %7928 = vset.pattern.permute.xlu1 %v11438_v59  ;;  %5921 = vperm.xlu0 %7925, %v9590_v40  }
 0x86b   : > { %6177 = vperm.xlu1 %7928, %v9590_v40  }
 0x86c   : > { %5247 = vmatmul.mubr.f32.gmra.mrb[24].mxu0 %v9710_v55  ;;  %4966 = vmatmul.mubr.f32.gmra.mrb[28].mxu1 %v4965_v10 }
 0x86d   : > { %5252 = vmatprep.mubr.f32.mxu0 %v11445_v37  ;;  %4971 = vmatprep.mubr.f32.mxu1 %v11445_v37 }
 0x86e   : > { %5925 = vperm.xlu0 %7925, %v9545_v12  }
 0x86f   : > { %7929 = vset.pattern.permute.xlu1 %v11435_v26 }
 0x870   : > { %5255 = vmatmul.mubr.f32.gmra.mrb[26].mxu0 %v9725_v28  ;;  %4977 = vmatmul.mubr.f32.gmra.mrb[30].mxu1 %v4976_v27 }
 0x871   : > { %5329 = vmatprep.mubr.f32.mxu0 %v11445_v37  ;;  %5067 = vmatprep.mubr.f32.mxu1 %v11445_v37 }
 0x872   : > { %6053 = vperm.xlu1 %7929, %v9545_v12   ;;  %5933 = vperm.xlu0 %7925, %v9629_v9  }
 0x874   : > { %5333 = vmatmul.mubr.f32.vlgmr.msra.gmra.mrb[12].mxu0 %v11459_v23  ;;  %5069 = vmatmul.mubr.f32.vlgmr.msra.gmra.mrb[16].mxu1 %v9564_v30 }
 0x875   : > { %7575 = vmatpush1.bf16.msra.mxu0 %v7574_v6  ;;  %5338 = vmatprep.mubr.f32.mxu0 %v11445_v37 }
 0x876   : > { %7577 = vmatprep.subr.bf16.mxu0 %v9612_v60  ;;  %5074 = vmatprep.mubr.f32.mxu1 %v11445_v37 }
 0x877   : > { %7930 = vset.pattern.permute.xlu1 %v11440_v29  ;;  %7939 = vset.pattern.permute.xlu0 %v11435_v26 }
 0x878   : > { %5342 = vmatmul.mubr.f32.gmra.mrb[14].mxu0 %v11460_v22  ;;  %5076 = vmatmul.mubr.f32.gmra.mrb[18].mxu1 %v9584_v32 }
 0x879   : > { %5347 = vmatprep.mubr.f32.mxu0 %v11445_v37  ;;  %5081 = vmatprep.mubr.f32.mxu1 %v11445_v37 }
 0x87a   : > { %6301 = vperm.xlu1 %7930, %v9539_v11   ;;  %6057 = vperm.xlu0 %7939, %v9551_v47  }
 0x87c   : > { %5351 = vmatmul.mubr.f32.gmra.mrb[16].mxu0 %v11461_v52  ;;  %5083 = vmatmul.mubr.f32.gmra.mrb[20].mxu1 %v9603_v38 }
 0x87d   : > { %5356 = vmatprep.mubr.f32.mxu0 %v11445_v37  ;;  %5088 = vmatprep.mubr.f32.mxu1 %v11445_v37 }
 0x87e   : > { %6305 = vperm.xlu1 %7930, %v9590_v40   ;;  %6065 = vperm.xlu0 %7939, %v9561_v18  }
 0x880   : > { %5360 = vmatmul.mubr.f32.gmra.mrb[18].mxu0 %v4930_v54  ;;  %5090 = vmatmul.mubr.f32.gmra.mrb[22].mxu1 %v9624_v2 }
 0x881   : > { %5365 = vmatprep.mubr.f32.mxu0 %v11445_v37  ;;  %5095 = vmatprep.mubr.f32.mxu1 %v11445_v37 }
 0x882   : > { %7931 = vset.pattern.permute.xlu1 %v11438_v59  ;;  %6073 = vperm.xlu0 %7939, %v9569_v57  }
 0x883   : > { %6185 = vperm.xlu1 %7931, %v9551_v47  }
 0x884   : > { %5369 = vmatmul.mubr.f32.gmra.mrb[20].mxu0 %v4941_v42  ;;  %5097 = vmatmul.mubr.f32.gmra.mrb[24].mxu1 %v9660_v8 }
 0x885   : > { %5374 = vmatprep.mubr.f32.mxu0 %v11445_v37  ;;  %5102 = vmatprep.mubr.f32.mxu1 %v11445_v37 }
 0x886   : > { %7945 = vset.pattern.permute.xlu0 %v11438_v59 }
 0x887   : > { %7932 = vset.pattern.permute.xlu1 %v11462_v34  ;;  %6173 = vperm.xlu0 %7945, %v9539_v11  }
 0x888   : > { %5378 = vmatmul.mubr.f32.gmra.mrb[22].mxu0 %v4952_v41  ;;  %5104 = vmatmul.mubr.f32.gmra.mrb[26].mxu1 %v9679_v53 }
 0x889   : > { %5383 = vmatprep.mubr.f32.mxu0 %v11445_v37  ;;  %5109 = vmatprep.mubr.f32.mxu1 %v11445_v37 }
 0x88a   : > { %6429 = vperm.xlu1 %7932, %v9539_v11  }
 0x88b   : > { %6181 = vperm.xlu0 %7945, %v9545_v12  }
 0x88c   : > { %5387 = vmatmul.mubr.f32.gmra.mrb[24].mxu0 %v4963_v17  ;;  %5111 = vmatmul.mubr.f32.gmra.mrb[28].mxu1 %v9696_v13 }
 0x88d   : > { %5392 = vmatprep.mubr.f32.mxu0 %v11445_v37  ;;  %5116 = vmatprep.mubr.f32.mxu1 %v11445_v37 }
 0x88e   : > { %7933 = vset.pattern.permute.xlu1 %v11440_v29 }
 0x88f   : > { %6313 = vperm.xlu1 %7933, %v9551_v47   ;;  %6189 = vperm.xlu0 %7945, %v9629_v9  }
 0x890   : > { %5396 = vmatmul.mubr.f32.gmra.mrb[26].mxu0 %v4974_v61  ;;  %5118 = vmatmul.mubr.f32.gmra.mrb[30].mxu1 %v9712_v62 }
 0x891   : > { %5478 = vmatprep.mubr.f32.mxu0 %v11445_v37  ;;  %6909 = vmatprep.mubr.f32.mxu1 %v11445_v37 }
 0x893   : > { %7934 = vset.pattern.permute.xlu1 %v11443_v33  ;;  %6197 = vperm.xlu0 %7945, %v9654_v0  }
 0x894   : > { %5480 = vmatmul.mubr.f32.vlgmr.msra.gmra.mrb[12].mxu0 %v9564_v30  ;;  %6557 = vperm.xlu1 %7934, %v9539_v11  }
 0x895   : > { %7579 = vmatpush1.bf16.msra.mxu0 %v9622_v31  ;;  %5485 = vmatprep.mubr.f32.mxu0 %v11445_v37 }
 0x897   : > { %7947 = vset.pattern.permute.xlu0 %v11440_v29 }
 0x898   : > { %5487 = vmatmul.mubr.f32.gmra.mrb[14].mxu0 %v9584_v32  ;;  %7935 = vset.pattern.permute.xlu1 %v11462_v34 }
 0x899   : > { %5492 = vmatprep.mubr.f32.mxu0 %v11445_v37  ;;  %6441 = vperm.xlu1 %7935, %v9551_v47  }
 0x89a   : > { %6309 = vperm.xlu0 %7947, %v9545_v12  }
 0x89c   : > { %5494 = vmatmul.mubr.f32.gmra.mrb[16].mxu0 %v9603_v38 }
 0x89d   : > { %5499 = vmatprep.mubr.f32.mxu0 %v11445_v37  ;;  %7936 = vset.pattern.permute.xlu1 %v11463_v50 }
 0x89e   : > { %6685 = vperm.xlu1 %7936, %v9539_v11   ;;  %6325 = vperm.xlu0 %7947, %v9654_v0  }
 0x8a0   : > { %5501 = vmatmul.mubr.f32.gmra.mrb[18].mxu0 %v9624_v2 }
 0x8a1   : > { %5506 = vmatprep.mubr.f32.mxu0 %v11445_v37 }
 0x8a2   : > { %7937 = vset.pattern.permute.xlu1 %v11443_v33  ;;  %7950 = vset.pattern.permute.xlu0 %v11462_v34 }
 0x8a3   : > { %6569 = vperm.xlu1 %7937, %v9551_v47   ;;  %6433 = vperm.xlu0 %7950, %v9590_v40  }
 0x8a4   : > { %5508 = vmatmul.mubr.f32.gmra.mrb[20].mxu0 %v9660_v8 }
 0x8a5   : > { %5513 = vmatprep.mubr.f32.mxu0 %v11445_v37 }
 0x8a7   : > { %7938 = vset.pattern.permute.xlu1 %v11463_v50  ;;  %6437 = vperm.xlu0 %7950, %v9545_v12  }
 0x8a8   : > { %5515 = vmatmul.mubr.f32.gmra.mrb[22].mxu0 %v9679_v53  ;;  %6693 = vperm.xlu1 %7938, %v9545_v12  }
 0x8a9   : > { %5520 = vmatprep.mubr.f32.mxu0 %v11445_v37 }
 0x8ab   : > { %6449 = vperm.xlu0 %7950, %v9561_v18  }
 0x8ac   : > { %5522 = vmatmul.mubr.f32.gmra.mrb[24].mxu0 %v9696_v13  ;;  %7940 = vset.pattern.permute.xlu1 %v11441_v24 }
 0x8ad   : > { %5527 = vmatprep.mubr.f32.mxu0 %v11445_v37  ;;  %5937 = vperm.xlu1 %7940, %v9561_v18  }
 0x8af   : > { %6453 = vperm.xlu0 %7950, %v9654_v0  }
 0x8b0   : > { %5529 = vmatmul.mubr.f32.gmra.mrb[26].mxu0 %v9712_v62 }
 0x8b1   : > { %5603 = vmatprep.mubr.f32.mxu0 %v11445_v37  ;;  %7941 = vset.pattern.permute.xlu1 %v11435_v26 }
 0x8b2   : > { %6061 = vperm.xlu1 %7941, %v9629_v9  }
 0x8b3   : > { %7953 = vset.pattern.permute.xlu0 %v11443_v33 }
 0x8b4   : > { %5605 = vmatmul.mubr.f32.vlgmr.msra.gmra.mrb[12].mxu0 %v9564_v30  ;;  %6561 = vperm.xlu0 %7953, %v9590_v40   ;;  %v9930_v30 = vpop.permute.xlu0 %5675 }
 0x8b5   : > { %5610 = vmatprep.mubr.f32.mxu0 %v11445_v37 }
 0x8b6   : > { %7942 = vset.pattern.permute.xlu1 %v11441_v24 }
 0x8b7   : > { %5941 = vperm.xlu1 %7942, %v9654_v0  }
 0x8b8   : > { %5612 = vmatmul.mubr.f32.gmra.mrb[14].mxu0 %v9584_v32  ;;  %6565 = vperm.xlu0 %7953, %v9545_v12  }
 0x8b9   : > { %5617 = vmatprep.mubr.f32.mxu0 %v11445_v37 }
 0x8bb   : > { %5945 = vperm.xlu1 %7942, %v9569_v57  }
 0x8bc   : > { %5619 = vmatmul.mubr.f32.gmra.mrb[16].mxu0 %v9603_v38  ;;  %6577 = vperm.xlu0 %7953, %v9561_v18  }
 0x8bd   : > { %5624 = vmatprep.mubr.f32.mxu0 %v11445_v37 }
 0x8bf   : > { %7943 = vset.pattern.permute.xlu1 %v11438_v59 }
 0x8c0   : > { %5626 = vmatmul.mubr.f32.gmra.mrb[18].mxu0 %v9624_v2  ;;  %6193 = vperm.xlu1 %7943, %v9561_v18  }
 0x8c1   : > { %5631 = vmatprep.mubr.f32.mxu0 %v11445_v37  ;;  %6581 = vperm.xlu0 %7953, %v9654_v0  }
 0x8c4   : > { %5633 = vmatmul.mubr.f32.gmra.mrb[20].mxu0 %v9660_v8  ;;  %7944 = vset.pattern.permute.xlu1 %v11435_v26  ;;  %v9912_v26 = vpop.permute.xlu1 %5670 }
 0x8c5   : > { %5638 = vmatprep.mubr.f32.mxu0 %v11445_v37  ;;  %6069 = vperm.xlu1 %7944, %v9654_v0  }
 0x8c6   : > { %7956 = vset.pattern.permute.xlu0 %v11463_v50 }
 0x8c7   : > { %6689 = vperm.xlu0 %7956, %v9590_v40  }
 0x8c8   : > { %5640 = vmatmul.mubr.f32.gmra.mrb[22].mxu0 %v9679_v53  ;;  %v9934_v40 = vpop.permute.xlu0 %5690 }
 0x8c9   : > { %5645 = vmatprep.mubr.f32.mxu0 %v11445_v37  ;;  %7946 = vset.pattern.permute.xlu1 %v11440_v29  ;;  %11470 = vst [vmem:[#allocation14_spill] sm:$0xff] %v9934_v40 }
 0x8ca   : > { %6317 = vperm.xlu1 %7946, %v9629_v9  }
 0x8cb   : > { %6697 = vperm.xlu0 %7956, %v9551_v47  }
 0x8cc   : > { %5647 = vmatmul.mubr.f32.gmra.mrb[24].mxu0 %v9696_v13  ;;  %v9938_v31 = vpop.permute.xlu0 %5700 }
 0x8cd   : > { %5652 = vmatprep.mubr.f32.mxu0 %v11445_v37  ;;  %11471 = vst [vmem:[#allocation10_spill] sm:$0xff] %v9938_v31 }
 0x8ce   : > { %6321 = vperm.xlu1 %7946, %v9561_v18  }
 0x8cf   : > { %6705 = vperm.xlu0 %7956, %v9561_v18  }
 0x8d0   : > { %5654 = vmatmul.mubr.f32.gmra.mrb[26].mxu0 %v9712_v62 }
 0x8d2   : > { %7948 = vset.pattern.permute.xlu1 %v11438_v59  ;;  %v9914_v59 = vpop.permute.xlu1 %5680 }
 0x8d3   : > { %6201 = vperm.xlu1 %7948, %v9569_v57   ;;  %6713 = vperm.xlu0 %7956, %v9569_v57   ;;  %11464 = vst [vmem:[#allocation17_spill] sm:$0xff] %v9914_v59 }
 0x8d6   : > { %v9944_v53 = vpop.permute.xlu0 %5789 }
 0x8d7   : > { %7949 = vset.pattern.permute.xlu1 %v11462_v34 }
 0x8d8   : > { %6445 = vperm.xlu1 %7949, %v9629_v9  }
 0x8da   : > { %v9948_v41 = vpop.permute.xlu0 %5801 }
 0x8db   : > { %11473 = vst [vmem:[#allocation4_spill] sm:$0xff] %v9948_v41 }
 0x8dc   : > { %7951 = vset.pattern.permute.xlu1 %v11440_v29  ;;  %v9916_v29 = vpop.permute.xlu1 %5685 }
 0x8dd   : > { %6329 = vperm.xlu1 %7951, %v9569_v57   ;;  %11465 = vst [vmem:[#allocation18_spill] sm:$0xff] %v9916_v29 }
 0x8de   : > { %v9954_v10 = vpop.permute.xlu0 %5809 }
 0x8df   : > { %11475 = vst [vmem:[#allocation22_spill] sm:$0xff] %v9954_v10 }
 0x8e0   : > { %v9918_v24 = vpop.permute.xlu1 %5695 }
 0x8e1   : > { %7952 = vset.pattern.permute.xlu1 %v11443_v33  ;;  %11466 = vst [vmem:[#allocation13_spill] sm:$0xff] %v9918_v24 }
 0x8e2   : > { %6573 = vperm.xlu1 %7952, %v9629_v9   ;;  %v9962_v4 = vpop.permute.xlu0 %5817 }
 0x8e3   : > { %11476 = vst [vmem:[#allocation5_spill] sm:$0xff] %v9962_v4 }
 0x8e4   : > { %v9920_v11 = vpop.permute.xlu1 %5705 }
 0x8e5   : > { %11467 = vst [vmem:[#allocation2_spill] sm:$0xff] %v9920_v11 }
 0x8e6   : > { %7954 = vset.pattern.permute.xlu1 %v11462_v34 }
 0x8e7   : > { %6457 = vperm.xlu1 %7954, %v9569_v57  }
 0x8e8   : > { %v9922_v12 = vpop.permute.xlu1 %5793 }
 0x8e9   : > { %v9966_v23 = vpop.permute.xlu0 %5921 }
 0x8eb   : > { %7955 = vset.pattern.permute.xlu1 %v11463_v50 }
 0x8ec   : > { %6701 = vperm.xlu1 %7955, %v9629_v9   ;;  %v9924_v47 = vpop.permute.xlu1 %5797 }
 0x8ed   : > { %v9970_v52 = vpop.permute.xlu0 %5925 }
 0x8ee   : > { %11478 = vst [vmem:[#allocation19_spill] sm:$0xff] %v9970_v52 }
 0x8f0   : > { %7957 = vset.pattern.permute.xlu1 %v11443_v33  ;;  %v9926_v33 = vpop.permute.xlu1 %5805 }
 0x8f1   : > { %6585 = vperm.xlu1 %7957, %v9569_v57   ;;  %11468 = vst [vmem:[#allocation11_spill] sm:$0xff] %v9926_v33 }
 0x8f4   : > { %v9928_v18 = vpop.permute.xlu1 %5813 }
 0x8f5   : > { %7958 = vset.pattern.permute.xlu1 %v11463_v50  ;;  %11469 = vst [vmem:[#allocation3_spill] sm:$0xff] %v9928_v18  ;;  %v9974_v50 = vpop.permute.xlu0 %5933 }
 0x8f6   : > { %6709 = vperm.xlu1 %7958, %v9654_v0   ;;  %11479 = vst [vmem:[#allocation6_spill] sm:$0xff] %v9974_v50 }
 0x8f8   : > { %v9932_v57 = vpop.permute.xlu1 %5917 }
 0x8f9   : > { %v9978_v1 = vpop.permute.xlu0 %6057 }
 0x8fa   : > { %11481 = vst [vmem:[#allocation23_spill] sm:$0xff] %v9978_v1 }
 0x8fc   : > { %v9936_v38 = vpop.permute.xlu1 %6045 }
 0x8fd   : > { %v9982_v37 = vpop.permute.xlu0 %6065 }
 0x8fe   : > { %11482 = vst [vmem:[#allocation24_spill] sm:$0xff] %v9982_v37 }
 0x900   : > { %v9940_v2 = vpop.permute.xlu1 %6049 }
 0x901   : > { %v9994_v24 = vpop.permute.xlu0 %6073 }
 0x902   : > { %11484 = vst [vmem:[#allocation26_spill] sm:$0xff] %v9994_v24 }
 0x904   : > { %v9942_v8 = vpop.permute.xlu1 %5929 }
 0x905   : > { %11472 = vst [vmem:[#allocation12_spill] sm:$0xff] %v9942_v8 }
 0x908   : > { %v9946_v13 = vpop.permute.xlu1 %6177 }
 0x90c   : > { %v9950_v17 = vpop.permute.xlu1 %6053 }
 0x90d   : > { %11474 = vst [vmem:[#allocation15_spill] sm:$0xff] %v9950_v17 }
 0x910   : > { %v9960_v35 = vpop.permute.xlu1 %6301 }
 0x914   : > { %v9964_v6 = vpop.permute.xlu1 %6305 }
 0x918   : > { %v9968_v22 = vpop.permute.xlu1 %6185 }
 0x919   : > { %11477 = vst [vmem:[#allocation20_spill] sm:$0xff] %v9968_v22 }
 0x91c   : > { %v9972_v34 = vpop.permute.xlu1 %6429 }
 0x920   : > { %v9976_v49 = vpop.permute.xlu1 %6313 }
 0x921   : > { %11480 = vst [vmem:[#allocation7_spill] sm:$0xff] %v9976_v49 }
 0x924   : > { %v9980_v3 = vpop.permute.xlu1 %6557 }
 0x928   : > { %v9986_v18 = vpop.permute.xlu1 %6441 }
 0x929   : > { %11483 = vst [vmem:[#allocation25_spill] sm:$0xff] %v9986_v18  ;;  %v10008_v18 = vpop.permute.xlu0 %6173 }
 0x947   : > { %v5070_v0 = vpop.f32.mrb[16].mxu1 }
 0x948   : > { %v5072_v32 = vpop.f32.mrb[17].mxu1 }
 0x94b   : > { %v5077_v60 = vpop.f32.mrb[18].mxu1 }
 0x94c   : > { %v5079_v51 = vpop.f32.mrb[19].mxu1 }
 0x94f   : > { %v5084_v9 = vpop.f32.mrb[20].mxu1 }
 0x950   : > { %v5086_v58 = vpop.f32.mrb[21].mxu1 }
 0x953   : > { %v5091_v54 = vpop.f32.mrb[22].mxu1 }
 0x954   : > { %v5093_v21 = vpop.f32.mrb[23].mxu1 }
 0x957   : > { %v5098_v42 = vpop.f32.mrb[24].mxu1 }
 0x958   : > { %v5100_v46 = vpop.f32.mrb[25].mxu1 }
 0x95b   : > { %v5105_v55 = vpop.f32.mrb[26].mxu1 }
 0x95c   : > { %v5107_v62 = vpop.f32.mrb[27].mxu1 }
 0x95f   : > { %v5112_v28 = vpop.f32.mrb[28].mxu1 }
 0x960   : > { %v9952_v61 = vpop.f32.mrb[29].mxu1 }
 0x963   : > { %v9956_v39 = vpop.f32.mrb[30].mxu1 }
 0x964   : > { %v9958_v27 = vpop.f32.mrb[31].mxu1 }
 0x987   : > { %v5606_v11 = vpop.f32.mrb[12].mxu0 }
 0x988   : > { %v9984_v4 = vadd.f32 %v5606_v11, %v5070_v0  ;;  %v5608_v31 = vpop.f32.mrb[13].mxu0  ;;  %v10004_v11 = vpop.permute.xlu1 %6685 }
 0x989   : > { %v9988_v10 = vadd.f32 %v5608_v31, %v5072_v32  ;;  %11485 = vst [vmem:[#allocation27_spill] sm:$0xff] %v10004_v11 }
 0x98a   : > { %5852 = vrot.lane.b32.xlu1 %v9984_v4, %s8030_s17  ;;  %5724 = vrot.lane.b32.xlu0 %v9984_v4, %s8028_s15 }
 0x98b   : > { %v5613_v50 = vpop.f32.mrb[14].mxu0 }
 0x98c   : > { %v9996_v40 = vadd.f32 %v5613_v50, %v5077_v60  ;;  %v5615_v37 = vpop.f32.mrb[15].mxu0  ;;  %v10018_v50 = vpop.permute.xlu1 %6569 }
 0x98d   : > { %v9998_v33 = vadd.f32 %v5615_v37, %v5079_v51  ;;  %11489 = vst [vmem:[#allocation31_spill] sm:$0xff] %v10018_v50 }
 0x98e   : > { %5980 = vrot.lane.b32.xlu1 %v9984_v4, %s8027_s14  ;;  %6108 = vrot.lane.b32.xlu0 %v9984_v4, %s8029_s16 }
 0x98f   : > { %v5620_v0 = vpop.f32.mrb[16].mxu0 }
 0x990   : > { %v10006_v32 = vadd.f32 %v5620_v0, %v5084_v9  ;;  %v5622_v31 = vpop.f32.mrb[17].mxu0  ;;  %v10026_v9 = vpop.permute.xlu0 %6181 }
 0x991   : > { %v10010_v24 = vadd.f32 %v5622_v31, %v5086_v58  ;;  %11491 = vst [vmem:[#allocation32_spill] sm:$0xff] %v10026_v9 }
 0x992   : > { %11486 = vst [vmem:[#allocation28_spill] sm:$0xff] %v10006_v32  ;;  %6620 = vrot.lane.b32.xlu1 %v9984_v4, %s8034_s22  ;;  %6236 = vrot.lane.b32.xlu0 %v9984_v4, %s8031_s18 }
 0x993   : > { %11487 = vst [vmem:[#allocation29_spill] sm:$0xff] %v10010_v24  ;;  %v5627_v37 = vpop.f32.mrb[18].mxu0 }
 0x994   : > { %v10016_v60 = vadd.f32 %v5627_v37, %v5091_v54  ;;  %v5629_v51 = vpop.f32.mrb[19].mxu0  ;;  %v10036_v54 = vpop.permute.xlu1 %6693 }
 0x995   : > { %v10020_v49 = vadd.f32 %v5629_v51, %v5093_v21  ;;  %11493 = vst [vmem:[#allocation33_spill] sm:$0xff] %v10036_v54  ;;  %v10040_v50 = vpop.permute.xlu0 %6189 }
 0x996   : > { %11488 = vst [vmem:[#allocation30_spill] sm:$0xff] %v10016_v60  ;;  %6364 = vrot.lane.b32.xlu0 %v9984_v4, %s11490_s29  ;;  %5868 = vrot.lane.b32.xlu1 %v9988_v10, %s8030_s17  ;;  %11494 = vst [vmem:[#allocation34_spill] sm:$0xff] %v10040_v50 }
 0x997   : > { %v5634_v58 = vpop.f32.mrb[20].mxu0 }
 0x998   : > { %v10028_v0 = vadd.f32 %v5634_v58, %v5098_v42  ;;  %v5636_v31 = vpop.f32.mrb[21].mxu0 }
 0x999   : > { %v10030_v22 = vadd.f32 %v5636_v31, %v5100_v46  ;;  %v10050_v31 = vpop.permute.xlu1 %5937 }
 0x99a   : > { %6492 = vrot.lane.b32.xlu0 %v9984_v4, %s11492_s30  ;;  %5996 = vrot.lane.b32.xlu1 %v9988_v10, %s8027_s14  ;;  %11495 = vst [vmem:[#allocation35_spill] sm:$0xff] %v10050_v31 }
 0x99b   : > { %v5641_v21 = vpop.f32.mrb[22].mxu0 }
 0x99c   : > { %v10038_v37 = vadd.f32 %v5641_v21, %v5105_v55  ;;  %v5643_v51 = vpop.f32.mrb[23].mxu0 }
 0x99d   : > { %v10042_v1 = vadd.f32 %v5643_v51, %v5107_v62  ;;  %v10059_v62 = vpop.permute.xlu0 %6197 }
 0x99e   : > { %6636 = vrot.lane.b32.xlu1 %v9988_v10, %s8034_s22  ;;  %5740 = vrot.lane.b32.xlu0 %v9988_v10, %s8028_s15  ;;  %11496 = vst [vmem:[#allocation36_spill] sm:$0xff] %v10059_v62 }
 0x99f   : > { %v5648_v42 = vpop.f32.mrb[24].mxu0 }
 0x9a0   : > { %v10048_v46 = vadd.f32 %v5648_v42, %v5112_v28  ;;  %v5650_v58 = vpop.f32.mrb[25].mxu0 }
 0x9a1   : > { %v10053_v55 = vadd.f32 %v5650_v58, %v9952_v61  ;;  %v10071_v61 = vpop.permute.xlu1 %6061  ;;  %v10073_v58 = vpop.permute.xlu0 %6309 }
 0x9a2   : > { %6124 = vrot.lane.b32.xlu0 %v9988_v10, %s8029_s16  ;;  %5726 = vrot.lane.b32.xlu1 %v9996_v40, %s8028_s15  ;;  %11499 = vst [vmem:[#allocation39_spill] sm:$0xff] %v10071_v61  ;;  %11500 = vst [vmem:[#allocation40_spill] sm:$0xff] %v10073_v58 }
 0x9a3   : > { %v5655_v21 = vpop.f32.mrb[26].mxu0 }
 0x9a4   : > { %v10062_v51 = vadd.f32 %v5655_v21, %v9956_v39  ;;  %v5657_v28 = vpop.f32.mrb[27].mxu0 }
 0x9a5   : > { %v10065_v42 = vadd.f32 %v5657_v28, %v9958_v27  ;;  %v10079_v39 = vpop.permute.xlu1 %5941  ;;  %v10085_v27 = vpop.permute.xlu0 %6325 }
 0x9a6   : > { %11497 = vst [vmem:[#allocation37_spill] sm:$0xff] %v10062_v51  ;;  %6252 = vrot.lane.b32.xlu0 %v9988_v10, %s8031_s18  ;;  %6110 = vrot.lane.b32.xlu1 %v9996_v40, %s8029_s16  ;;  %11501 = vst [vmem:[#allocation41_spill] sm:$0xff] %v10079_v39 }
 0x9a7   : > { %11498 = vst [vmem:[#allocation38_spill] sm:$0xff] %v10065_v42  ;;  %11502 = vst [vmem:[#allocation42_spill] sm:$0xff] %v10085_v27 }
 0x9a9   : > { %v10091_v21 = vpop.permute.xlu1 %5945  ;;  %v10093_v28 = vpop.permute.xlu0 %6433 }
 0x9aa   : > { %6380 = vrot.lane.b32.xlu0 %v9988_v10, %s11490_s29  ;;  %6238 = vrot.lane.b32.xlu1 %v9996_v40, %s8031_s18  ;;  %11503 = vst [vmem:[#allocation43_spill] sm:$0xff] %v10091_v21 }
 0x9ad   : > { %v10099_v62 = vpop.permute.xlu1 %6193  ;;  %v10105_v27 = vpop.permute.xlu0 %6437 }
 0x9ae   : > { %6508 = vrot.lane.b32.xlu0 %v9988_v10, %s11492_s30  ;;  %6366 = vrot.lane.b32.xlu1 %v9996_v40, %s11490_s29  ;;  %11504 = vst [vmem:[#allocation44_spill] sm:$0xff] %v10099_v62  ;;  %11505 = vst [vmem:[#allocation45_spill] sm:$0xff] %v10105_v27 }
 0x9b1   : > { %v10107_v39 = vpop.permute.xlu1 %6069  ;;  %v10113_v21 = vpop.permute.xlu0 %6449 }
 0x9b2   : > { %5854 = vrot.lane.b32.xlu0 %v9996_v40, %s8030_s17  ;;  %6494 = vrot.lane.b32.xlu1 %v9996_v40, %s11492_s30  ;;  %11506 = vst [vmem:[#allocation46_spill] sm:$0xff] %v10107_v39  ;;  %11507 = vst [vmem:[#allocation47_spill] sm:$0xff] %v10113_v21 }
 0x9b5   : > { %v10119_v62 = vpop.permute.xlu1 %6317  ;;  %v10125_v39 = vpop.permute.xlu0 %6453 }
 0x9b6   : > { %5982 = vrot.lane.b32.xlu0 %v9996_v40, %s8027_s14  ;;  %5742 = vrot.lane.b32.xlu1 %v9998_v33, %s8028_s15  ;;  %11508 = vst [vmem:[#allocation48_spill] sm:$0xff] %v10119_v62  ;;  %11509 = vst [vmem:[#allocation49_spill] sm:$0xff] %v10125_v39 }
 0x9b9   : > { %v10127_v31 = vpop.permute.xlu1 %6321  ;;  %v10133_v21 = vpop.permute.xlu0 %6561 }
 0x9ba   : > { %6622 = vrot.lane.b32.xlu0 %v9996_v40, %s8034_s22  ;;  %6126 = vrot.lane.b32.xlu1 %v9998_v33, %s8029_s16  ;;  %11510 = vst [vmem:[#allocation50_spill] sm:$0xff] %v10127_v31 }
 0x9bd   : > { %v10135_v50 = vpop.permute.xlu1 %6201  ;;  %v10145_v39 = vpop.permute.xlu0 %6565 }
 0x9be   : > { %5870 = vrot.lane.b32.xlu0 %v9998_v33, %s8030_s17  ;;  %6254 = vrot.lane.b32.xlu1 %v9998_v33, %s8031_s18  ;;  %11511 = vst [vmem:[#allocation51_spill] sm:$0xff] %v10135_v50  ;;  %11512 = vst [vmem:[#allocation52_spill] sm:$0xff] %v10145_v39 }
 0x9c1   : > { %v10147_v31 = vpop.permute.xlu1 %6445  ;;  %v10153_v50 = vpop.permute.xlu0 %6577 }
 0x9c2   : > { %5998 = vrot.lane.b32.xlu0 %v9998_v33, %s8027_s14  ;;  %6382 = vrot.lane.b32.xlu1 %v9998_v33, %s11490_s29  ;;  %11513 = vst [vmem:[#allocation53_spill] sm:$0xff] %v10147_v31  ;;  %11514 = vst [vmem:[#allocation54_spill] sm:$0xff] %v10153_v50 }
 0x9c5   : > { %v10155_v62 = vpop.permute.xlu1 %6329  ;;  %v10165_v31 = vpop.permute.xlu0 %6581 }
 0x9c6   : > { %6638 = vrot.lane.b32.xlu0 %v9998_v33, %s8034_s22  ;;  %6510 = vrot.lane.b32.xlu1 %v9998_v33, %s11492_s30  ;;  %11515 = vst [vmem:[#allocation55_spill] sm:$0xff] %v10155_v62  ;;  %11516 = vst [vmem:[#allocation56_spill] sm:$0xff] %v10165_v31 }
 0x9c9   : > { %v10167_v61 = vpop.permute.xlu1 %6573  ;;  %v10173_v62 = vpop.permute.xlu0 %6689 }
 0x9ca   : > { %5856 = vrot.lane.b32.xlu1 %v10006_v32, %s8030_s17  ;;  %5728 = vrot.lane.b32.xlu0 %v10006_v32, %s8028_s15  ;;  %11517 = vst [vmem:[#allocation57_spill] sm:$0xff] %v10167_v61 }
 0x9cd   : > { %v10175_v50 = vpop.permute.xlu1 %6457  ;;  %v10185_v31 = vpop.permute.xlu0 %6697 }
 0x9ce   : > { %5984 = vrot.lane.b32.xlu1 %v10006_v32, %s8027_s14  ;;  %6624 = vrot.lane.b32.xlu0 %v10006_v32, %s8034_s22  ;;  %11518 = vst [vmem:[#allocation58_spill] sm:$0xff] %v10175_v50  ;;  %11519 = vst [vmem:[#allocation59_spill] sm:$0xff] %v10185_v31 }
 0x9d1   : > { %v10187_v61 = vpop.permute.xlu1 %6701  ;;  %v10193_v50 = vpop.permute.xlu0 %6705 }
 0x9d2   : > { %6112 = vrot.lane.b32.xlu1 %v10006_v32, %s8029_s16  ;;  %5744 = vrot.lane.b32.xlu0 %v10010_v24, %s8028_s15  ;;  %11520 = vst [vmem:[#allocation60_spill] sm:$0xff] %v10187_v61  ;;  %11521 = vst [vmem:[#allocation61_spill] sm:$0xff] %v10193_v50 }
 0x9d5   : > { %v10195_v8 = vpop.permute.xlu1 %6585  ;;  %v10205_v61 = vpop.permute.xlu0 %6713 }
 0x9d6   : > { %6240 = vrot.lane.b32.xlu1 %v10006_v32, %s8031_s18  ;;  %6000 = vrot.lane.b32.xlu0 %v10010_v24, %s8027_s14  ;;  %11522 = vst [vmem:[#allocation62_spill] sm:$0xff] %v10195_v8  ;;  %11523 = vst [vmem:[#allocation63_spill] sm:$0xff] %v10205_v61 }
 0x9d9   : > { %v10207_v31 = vpop.permute.xlu1 %6709 }
 0x9da   : > { %6368 = vrot.lane.b32.xlu1 %v10006_v32, %s11490_s29  ;;  %6128 = vrot.lane.b32.xlu0 %v10010_v24, %s8029_s16  ;;  %11524 = vst [vmem:[#allocation64_spill] sm:$0xff] %v10207_v31 }
 0x9de   : > { %6496 = vrot.lane.b32.xlu1 %v10006_v32, %s11492_s30  ;;  %6256 = vrot.lane.b32.xlu0 %v10010_v24, %s8031_s18 }
 0x9e2   : > { %5872 = vrot.lane.b32.xlu1 %v10010_v24, %s8030_s17  ;;  %6512 = vrot.lane.b32.xlu0 %v10010_v24, %s11492_s30 }
 0x9e6   : > { %6384 = vrot.lane.b32.xlu1 %v10010_v24, %s11490_s29  ;;  %6640 = vrot.lane.b32.xlu0 %v10010_v24, %s8034_s22 }
 0x9ea   : > { %5858 = vrot.lane.b32.xlu0 %v10016_v60, %s8030_s17  ;;  %5730 = vrot.lane.b32.xlu1 %v10016_v60, %s8028_s15 }
 0x9ee   : > { %6370 = vrot.lane.b32.xlu0 %v10016_v60, %s11490_s29  ;;  %5986 = vrot.lane.b32.xlu1 %v10016_v60, %s8027_s14 }
 0x9f2   : > { %6114 = vrot.lane.b32.xlu1 %v10016_v60, %s8029_s16  ;;  %5874 = vrot.lane.b32.xlu0 %v10020_v49, %s8030_s17 }
 0x9f6   : > { %6242 = vrot.lane.b32.xlu1 %v10016_v60, %s8031_s18  ;;  %6386 = vrot.lane.b32.xlu0 %v10020_v49, %s11490_s29 }
 0x9fa   : > { %6498 = vrot.lane.b32.xlu1 %v10016_v60, %s11492_s30  ;;  %5732 = vrot.lane.b32.xlu0 %v10028_v0, %s8028_s15 }
 0x9fc   : > { %v5853_v8 = vpop.permute.xlu1 %5852  ;;  %v5725_v50 = vpop.permute.xlu0 %5724 }
 0x9fe   : > { %6626 = vrot.lane.b32.xlu1 %v10016_v60, %s8034_s22  ;;  %6116 = vrot.lane.b32.xlu0 %v10028_v0, %s8029_s16 }
 0xa00   : > { %v5981_v41 = vpop.permute.xlu1 %5980  ;;  %v6109_v29 = vpop.permute.xlu0 %6108 }
 0xa02   : > { %5746 = vrot.lane.b32.xlu1 %v10020_v49, %s8028_s15  ;;  %6244 = vrot.lane.b32.xlu0 %v10028_v0, %s8031_s18 }
 0xa04   : > { %v10221_v61 = vpop.permute.xlu1 %6620  ;;  %v6237_v31 = vpop.permute.xlu0 %6236 }
 0xa05   : > { %11525 = vst [vmem:[#allocation65_spill] sm:$0xff] %v10221_v61 }
 0xa06   : > { %6002 = vrot.lane.b32.xlu1 %v10020_v49, %s8027_s14  ;;  %6372 = vrot.lane.b32.xlu0 %v10028_v0, %s11490_s29 }
 0xa08   : > { %v10227_v60 = vpop.permute.xlu0 %6364  ;;  %v5869_v11 = vpop.permute.xlu1 %5868 }
 0xa09   : > { %v5884_v61 = vsel %vm1470_vm2, %v5853_v8, %v5869_v11  ;;  %v5892_v27 = vsel %vm1470_vm2, %v5869_v11, %v5853_v8 }
 0xa0a   : > { %6130 = vrot.lane.b32.xlu1 %v10020_v49, %s8029_s16  ;;  %6500 = vrot.lane.b32.xlu0 %v10028_v0, %s11492_s30  ;;  %v5900_v58 = vmul.f32 %v5892_v27, %v8647_v45  ;;  %v5901_v42 = vmul.f32 %v5884_v61, %v8650_v20  ;;  %v5708_v61 = vmul.f32 %v9984_v4, %v9912_v26 }
 0xa0c   : > { %v10233_v54 = vpop.permute.xlu0 %6492  ;;  %v5997_v39 = vpop.permute.xlu1 %5996  ;;  %v5948_v59 = vmul.f32 %v9932_v57, %v5900_v58  ;;  %v5949_v4 = vmul.f32 %v9932_v57, %v5901_v42 }
 0xa0d   : > { %v6012_v52 = vsel %vm1575_vm3, %v5981_v41, %v5997_v39  ;;  %v6020_v24 = vsel %vm1575_vm3, %v5997_v39, %v5981_v41 }
 0xa0e   : > { %6258 = vrot.lane.b32.xlu1 %v10020_v49, %s8031_s18  ;;  %5748 = vrot.lane.b32.xlu0 %v10030_v22, %s8028_s15  ;;  %v6028_v41 = vmul.f32 %v6020_v24, %v8653_v43 }
 0xa10   : > { %v10245_v9 = vpop.permute.xlu1 %6636  ;;  %v5741_v17 = vpop.permute.xlu0 %5740  ;;  %v6076_v57 = vmul.f32 %v9936_v38, %v6028_v41 }
 0xa11   : > { %11526 = vst [vmem:[#allocation66_spill] sm:$0xff] %v10245_v9  ;;  %v5756_v8 = vsel %vm1365_vm1, %v5725_v50, %v5741_v17  ;;  %v5764_v11 = vsel %vm1365_vm1, %v5741_v17, %v5725_v50  ;;  %v5709_v9 = vmul.f32 %v9988_v10, %v9912_v26  ;;  %v6029_v17 = vmul.f32 %v6012_v52, %v8656_v15 }
 0xa12   : > { %v5772_v32 = vmul.f32 %v5764_v11, %v8628_v5  ;;  %v5773_v27 = vmul.f32 %v5756_v8, %v8632_v63  ;;  %6514 = vrot.lane.b32.xlu1 %v10020_v49, %s11492_s30  ;;  %6132 = vrot.lane.b32.xlu0 %v10030_v22, %s8029_s16 }
 0xa14   : > { %v5820_v50 = vmul.f32 %v9944_v53, %v5772_v32  ;;  %v5821_v39 = vmul.f32 %v9944_v53, %v5773_v27  ;;  %v6125_v8 = vpop.permute.xlu0 %6124  ;;  %v10269_v11 = vpop.permute.xlu1 %5726  ;;  %v6077_v53 = vmul.f32 %v9936_v38, %v6029_v17 }
 0xa15   : > { %v6140_v26 = vsel %vm1680_vm4, %v6109_v29, %v6125_v8  ;;  %v6148_v10 = vsel %vm1680_vm4, %v6125_v8, %v6109_v29 }
 0xa16   : > { %v5836_v24 = vadd.f32 %v5820_v50, %v5708_v61  ;;  %v5837_v51 = vadd.f32 %v5821_v39, %v5709_v9  ;;  %v6156_v52 = vmul.f32 %v6148_v10, %v8686_v44  ;;  %v6157_v32 = vmul.f32 %v6140_v26, %v8689_v14  ;;  %6642 = vrot.lane.b32.xlu1 %v10020_v49, %s8034_s22 }
 0xa17   : > { %6260 = vrot.lane.b32.xlu0 %v10030_v22, %s8031_s18 }
 0xa18   : > { %v5964_v42 = vadd.f32 %v5948_v59, %v5836_v24  ;;  %v5965_v58 = vadd.f32 %v5949_v4, %v5837_v51  ;;  %v6253_v27 = vpop.permute.xlu0 %6252  ;;  %v10285_v29 = vpop.permute.xlu1 %6110  ;;  %v6204_v9 = vmul.f32 %v10008_v18, %v6156_v52  ;;  %v6205_v61 = vmul.f32 %v10008_v18, %v6157_v32 }
 0xa19   : > { %v6268_v50 = vsel %vm1785_vm5, %v6237_v31, %v6253_v27  ;;  %v6276_v39 = vsel %vm1785_vm5, %v6253_v27, %v6237_v31 }
 0xa1a   : > { %v6092_v8 = vadd.f32 %v6076_v57, %v5964_v42  ;;  %v6093_v26 = vadd.f32 %v6077_v53, %v5965_v58  ;;  %v6284_v41 = vmul.f32 %v6268_v50, %v8701_v56  ;;  %v6285_v59 = vmul.f32 %v6276_v39, %v8704_v19  ;;  %5860 = vrot.lane.b32.xlu1 %v10028_v0, %s8030_s17 }
 0xa1b   : > { %6388 = vrot.lane.b32.xlu0 %v10030_v22, %s11490_s29 }
 0xa1c   : > { %v6220_v38 = vadd.f32 %v6204_v9, %v6092_v8  ;;  %v6221_v18 = vadd.f32 %v6205_v61, %v6093_v26  ;;  %v6332_v51 = vmul.f32 %v9960_v35, %v6284_v41  ;;  %v6333_v17 = vmul.f32 %v9960_v35, %v6285_v59  ;;  %v6381_v4 = vpop.permute.xlu0 %6380  ;;  %v6239_v31 = vpop.permute.xlu1 %6238 }
 0xa1d   : > { %v6396_v10 = vsel %vm1890_vm6, %v10227_v60, %v6381_v4  ;;  %v6404_v24 = vsel %vm1890_vm6, %v6381_v4, %v10227_v60 }
 0xa1e   : > { %v6348_v52 = vadd.f32 %v6332_v51, %v6220_v38  ;;  %v6349_v32 = vadd.f32 %v6333_v17, %v6221_v18  ;;  %v6412_v57 = vmul.f32 %v6396_v10, %v8707_v36  ;;  %v6413_v53 = vmul.f32 %v6404_v24, %v8722_v25  ;;  %5988 = vrot.lane.b32.xlu1 %v10028_v0, %s8027_s14 }
 0xa1f   : > { %6516 = vrot.lane.b32.xlu0 %v10030_v22, %s11492_s30 }
 0xa20   : > { %v6460_v35 = vmul.f32 %v9972_v34, %v6412_v57  ;;  %v6461_v42 = vmul.f32 %v9972_v34, %v6413_v53  ;;  %v6509_v58 = vpop.permute.xlu0 %6508  ;;  %v10315_v27 = vpop.permute.xlu1 %6366 }
 0xa21   : > { %v6524_v60 = vsel %vm1995_vm7, %v10233_v54, %v6509_v58  ;;  %v6532_v9 = vsel %vm1995_vm7, %v6509_v58, %v10233_v54 }
 0xa22   : > { %v6476_v61 = vadd.f32 %v6460_v35, %v6348_v52  ;;  %v6477_v50 = vadd.f32 %v6461_v42, %v6349_v32  ;;  %v6540_v39 = vmul.f32 %v6524_v60, %v8741_v16  ;;  %v6541_v8 = vmul.f32 %v6532_v9, %v8744_v7  ;;  %6628 = vrot.lane.b32.xlu1 %v10028_v0, %s8034_s22 }
 0xa23   : > { %5862 = vrot.lane.b32.xlu0 %v10038_v37, %s8030_s17  ;;  %v5710_v35 = vmul.f32 %v9996_v40, %v9930_v30  ;;  %v5711_v42 = vmul.f32 %v9998_v33, %v9930_v30 }
 0xa24   : > { %v6588_v34 = vmul.f32 %v9980_v3, %v6540_v39  ;;  %v6589_v26 = vmul.f32 %v9980_v3, %v6541_v8  ;;  %v5855_v41 = vpop.permute.xlu0 %5854  ;;  %v10331_v59 = vpop.permute.xlu1 %6494 }
 0xa26   : > { %v10333_v54 = vadd.f32 %v6588_v34, %v6476_v61  ;;  %v10335_v38 = vadd.f32 %v6589_v26, %v6477_v50  ;;  %5876 = vrot.lane.b32.xlu1 %v10030_v22, %s8030_s17 }
 0xa27   : > { %5990 = vrot.lane.b32.xlu0 %v10038_v37, %s8027_s14 }
 0xa28   : > { %v5983_v18 = vpop.permute.xlu0 %5982  ;;  %v5743_v51 = vpop.permute.xlu1 %5742 }
 0xa29   : > { %v5757_v17 = vsel %vm1365_vm1, %v10269_v11, %v5743_v51  ;;  %v5765_v3 = vsel %vm1365_vm1, %v5743_v51, %v10269_v11 }
 0xa2a   : > { %6004 = vrot.lane.b32.xlu1 %v10030_v22, %s8027_s14  ;;  %v5774_v4 = vmul.f32 %v5765_v3, %v8628_v5  ;;  %v5775_v10 = vmul.f32 %v5757_v17, %v8632_v63 }
 0xa2b   : > { %6630 = vrot.lane.b32.xlu0 %v10038_v37, %s8034_s22 }
 0xa2c   : > { %v6623_v24 = vpop.permute.xlu0 %6622  ;;  %v6127_v52 = vpop.permute.xlu1 %6126  ;;  %v5822_v32 = vmul.f32 %v9922_v12, %v5774_v4  ;;  %v5823_v57 = vmul.f32 %v9922_v12, %v5775_v10 }
 0xa2d   : > { %v6141_v12 = vsel %vm1680_vm4, %v10285_v29, %v6127_v52  ;;  %v6149_v9 = vsel %vm1680_vm4, %v6127_v52, %v10285_v29 }
 0xa2e   : > { %6644 = vrot.lane.b32.xlu1 %v10030_v22, %s8034_s22  ;;  %v5838_v33 = vadd.f32 %v5822_v32, %v5710_v35  ;;  %v5839_v30 = vadd.f32 %v5823_v57, %v5711_v42  ;;  %v6159_v51 = vmul.f32 %v6141_v12, %v8689_v14 }
 0xa2f   : > { %5878 = vrot.lane.b32.xlu0 %v10042_v1, %s8030_s17 }
 0xa30   : > { %v5871_v11 = vpop.permute.xlu0 %5870  ;;  %v6255_v53 = vpop.permute.xlu1 %6254 }
 0xa31   : > { %v5885_v58 = vsel %vm1470_vm2, %v5855_v41, %v5871_v11  ;;  %v5893_v60 = vsel %vm1470_vm2, %v5871_v11, %v5855_v41  ;;  %v6269_v8 = vsel %vm1785_vm5, %v6239_v31, %v6255_v53  ;;  %v6277_v29 = vsel %vm1785_vm5, %v6255_v53, %v6239_v31 }
 0xa32   : > { %v5902_v61 = vmul.f32 %v5893_v60, %v8647_v45  ;;  %v5903_v40 = vmul.f32 %v5885_v58, %v8650_v20  ;;  %5734 = vrot.lane.b32.xlu1 %v10038_v37, %s8028_s15  ;;  %v6158_v41 = vmul.f32 %v6149_v9, %v8686_v44  ;;  %v6286_v31 = vmul.f32 %v6269_v8, %v8701_v56 }
 0xa33   : > { %6006 = vrot.lane.b32.xlu0 %v10042_v1, %s8027_s14  ;;  %v6287_v32 = vmul.f32 %v6277_v29, %v8704_v19 }
 0xa34   : > { %v5950_v50 = vmul.f32 %v9966_v23, %v5902_v61  ;;  %v5951_v39 = vmul.f32 %v9966_v23, %v5903_v40  ;;  %v5999_v34 = vpop.permute.xlu0 %5998  ;;  %v6383_v26 = vpop.permute.xlu1 %6382  ;;  %v6206_v61 = vmul.f32 %v9946_v13, %v6158_v41  ;;  %v6207_v40 = vmul.f32 %v9946_v13, %v6159_v51 }
 0xa35   : > { %v6013_v17 = vsel %vm1575_vm3, %v5983_v18, %v5999_v34  ;;  %v6021_v3 = vsel %vm1575_vm3, %v5999_v34, %v5983_v18  ;;  %v6397_v57 = vsel %vm1890_vm6, %v10315_v27, %v6383_v26  ;;  %v6405_v18 = vsel %vm1890_vm6, %v6383_v26, %v10315_v27 }
 0xa36   : > { %v5966_v4 = vadd.f32 %v5950_v50, %v5838_v33  ;;  %v5967_v23 = vadd.f32 %v5951_v39, %v5839_v30  ;;  %v6030_v10 = vmul.f32 %v6021_v3, %v8653_v43  ;;  %v6031_v52 = vmul.f32 %v6013_v17, %v8656_v15  ;;  %6118 = vrot.lane.b32.xlu1 %v10038_v37, %s8029_s16 }
 0xa37   : > { %6646 = vrot.lane.b32.xlu0 %v10042_v1, %s8034_s22  ;;  %v6414_v35 = vmul.f32 %v6397_v57, %v8707_v36  ;;  %v6415_v42 = vmul.f32 %v6405_v18, %v8722_v25  ;;  %v6334_v50 = vmul.f32 %v9964_v6, %v6286_v31 }
 0xa38   : > { %v6078_v11 = vmul.f32 %v9940_v2, %v6030_v10  ;;  %v6079_v53 = vmul.f32 %v9940_v2, %v6031_v52  ;;  %v6639_v58 = vpop.permute.xlu0 %6638  ;;  %v6511_v60 = vpop.permute.xlu1 %6510 }
 0xa39   : > { %v6653_v12 = vsel %vm2100_vm8, %v6623_v24, %v6639_v58  ;;  %v6661_v9 = vsel %vm2100_vm8, %v6639_v58, %v6623_v24  ;;  %v6525_v27 = vsel %vm1995_vm7, %v10331_v59, %v6511_v60  ;;  %v6533_v2 = vsel %vm1995_vm7, %v6511_v60, %v10331_v59 }
 0xa3a   : > { %v6094_v33 = vadd.f32 %v6078_v11, %v5966_v4  ;;  %v6095_v30 = vadd.f32 %v6079_v53, %v5967_v23  ;;  %6246 = vrot.lane.b32.xlu1 %v10038_v37, %s8031_s18  ;;  %v6335_v24 = vmul.f32 %v9964_v6, %v6287_v32  ;;  %v6542_v59 = vmul.f32 %v6525_v27, %v8741_v16  ;;  %v10434_v6 = vld [vmem:[%s11259_s1 + $0x10] ss:$0 sm:$0xff]  ;;  %v10440_v4 = vld [vmem:[%s11259_s1 + $0x18] ss:$0 sm:$0xff] }
 0xa3b   : > { %5736 = vrot.lane.b32.xlu0 %v10048_v46, %s8028_s15  ;;  %v6543_v29 = vmul.f32 %v6533_v2, %v8744_v7  ;;  %v6462_v26 = vmul.f32 %v10093_v28, %v6414_v35  ;;  %v6463_v41 = vmul.f32 %v10093_v28, %v6415_v42  ;;  %v6670_v3 = vmul.f32 %v10434_v6, %v6653_v12 }
 0xa3c   : > { %v6222_v39 = vadd.f32 %v6206_v61, %v6094_v33  ;;  %v6223_v8 = vadd.f32 %v6207_v40, %v6095_v30  ;;  %v5857_v34 = vpop.permute.xlu1 %5856  ;;  %v5729_v13 = vpop.permute.xlu0 %5728  ;;  %v6671_v23 = vmul.f32 %v10440_v4, %v6661_v9  ;;  %v6590_v52 = vmul.f32 %v10133_v21, %v6542_v59 }
 0xa3d   : > { %v6591_v31 = vmul.f32 %v10133_v21, %v6543_v29  ;;  %v6718_v18 = vmul.f32 %v10173_v62, %v6670_v3  ;;  %v11527_v29 = vld [vmem:[#allocation37_spill] sm:$0xff] }
 0xa3e   : > { %v6350_v51 = vadd.f32 %v6334_v50, %v6222_v39  ;;  %v6351_v17 = vadd.f32 %v6335_v24, %v6223_v8  ;;  %6374 = vrot.lane.b32.xlu1 %v10038_v37, %s11490_s29  ;;  %v6719_v11 = vmul.f32 %v10173_v62, %v6671_v23 }
 0xa3f   : > { %5752 = vrot.lane.b32.xlu0 %v10053_v55, %s8028_s15 }
 0xa40   : > { %v6478_v28 = vadd.f32 %v6462_v26, %v6350_v51  ;;  %v6479_v10 = vadd.f32 %v6463_v41, %v6351_v17  ;;  %v5985_v32 = vpop.permute.xlu1 %5984  ;;  %v10449_v57 = vpop.permute.xlu0 %6624  ;;  %v11529_v26 = vld [vmem:[#allocation28_spill] sm:$0xff]  ;;  %v11530_v51 = vld [vmem:[#allocation29_spill] sm:$0xff] }
 0xa42   : > { %v6606_v53 = vadd.f32 %v6590_v52, %v6478_v28  ;;  %v6607_v35 = vadd.f32 %v6591_v31, %v6479_v10  ;;  %6502 = vrot.lane.b32.xlu1 %v10038_v37, %s11492_s30 }
 0xa43   : > { %6008 = vrot.lane.b32.xlu0 %v10053_v55, %s8027_s14 }
 0xa44   : > { %v10457_v42 = vadd.f32 %v6718_v18, %v6606_v53  ;;  %v10459_v58 = vadd.f32 %v6719_v11, %v6607_v35  ;;  %v6113_v21 = vpop.permute.xlu1 %6112  ;;  %v5745_v60 = vpop.permute.xlu0 %5744 }
 0xa45   : > { %v5758_v12 = vsel %vm1365_vm1, %v5729_v13, %v5745_v60  ;;  %v5766_v62 = vsel %vm1365_vm1, %v5745_v60, %v5729_v13  ;;  %v11528_v13 = vld [vmem:[#allocation17_spill] sm:$0xff] }
 0xa46   : > { %5750 = vrot.lane.b32.xlu1 %v10042_v1, %s8028_s15  ;;  %v5776_v40 = vmul.f32 %v5766_v62, %v8628_v5  ;;  %v5777_v33 = vmul.f32 %v5758_v12, %v8632_v63  ;;  %v5712_v41 = vmul.f32 %v11529_v26, %v11528_v13  ;;  %v5713_v17 = vmul.f32 %v11530_v51, %v11528_v13  ;;  %v11532_v13 = vld [vmem:[#allocation15_spill] sm:$0xff] }
 0xa47   : > { %6136 = vrot.lane.b32.xlu0 %v10053_v55, %s8029_s16 }
 0xa48   : > { %v6241_v9 = vpop.permute.xlu1 %6240  ;;  %v6001_v27 = vpop.permute.xlu0 %6000  ;;  %v5824_v24 = vmul.f32 %v9924_v47, %v5776_v40  ;;  %v5825_v39 = vmul.f32 %v9924_v47, %v5777_v33 }
 0xa49   : > { %v6014_v8 = vsel %vm1575_vm3, %v5985_v32, %v6001_v27  ;;  %v6022_v59 = vsel %vm1575_vm3, %v6001_v27, %v5985_v32  ;;  %v11531_v27 = vld [vmem:[#allocation19_spill] sm:$0xff] }
 0xa4a   : > { %6134 = vrot.lane.b32.xlu1 %v10042_v1, %s8029_s16  ;;  %v6032_v18 = vmul.f32 %v6022_v59, %v8653_v43  ;;  %v6033_v11 = vmul.f32 %v6014_v8, %v8656_v15  ;;  %v5841_v60 = vadd.f32 %v5825_v39, %v5713_v17 }
 0xa4b   : > { %6264 = vrot.lane.b32.xlu0 %v10053_v55, %s8031_s18 }
 0xa4c   : > { %v6369_v2 = vpop.permute.xlu1 %6368  ;;  %v6129_v61 = vpop.permute.xlu0 %6128  ;;  %v6080_v26 = vmul.f32 %v11532_v13, %v6032_v18 }
 0xa4d   : > { %v6142_v3 = vsel %vm1680_vm4, %v6113_v21, %v6129_v61  ;;  %v6150_v47 = vsel %vm1680_vm4, %v6129_v61, %v6113_v21  ;;  %v5840_v21 = vadd.f32 %v5824_v24, %v5712_v41  ;;  %v6081_v41 = vmul.f32 %v11532_v13, %v6033_v11  ;;  %v11537_v13 = vld [vmem:[#allocation52_spill] sm:$0xff] }
 0xa4e   : > { %6262 = vrot.lane.b32.xlu1 %v10042_v1, %s8031_s18  ;;  %v6160_v12 = vmul.f32 %v6150_v47, %v8686_v44  ;;  %v6161_v62 = vmul.f32 %v6142_v3, %v8689_v14  ;;  %v11533_v3 = vld [vmem:[#allocation32_spill] sm:$0xff] }
 0xa4f   : > { %6520 = vrot.lane.b32.xlu0 %v10053_v55, %s11492_s30 }
 0xa50   : > { %v6497_v30 = vpop.permute.xlu1 %6496  ;;  %v6257_v50 = vpop.permute.xlu0 %6256  ;;  %v6208_v47 = vmul.f32 %v11533_v3, %v6160_v12 }
 0xa51   : > { %v6270_v10 = vsel %vm1785_vm5, %v6241_v9, %v6257_v50  ;;  %v6278_v52 = vsel %vm1785_vm5, %v6257_v50, %v6241_v9 }
 0xa52   : > { %6390 = vrot.lane.b32.xlu1 %v10042_v1, %s11490_s29  ;;  %v6289_v9 = vmul.f32 %v6278_v52, %v8704_v19 }
 0xa53   : > { %5866 = vrot.lane.b32.xlu0 %v11527_v29, %s8030_s17 }
 0xa54   : > { %v5873_v23 = vpop.permute.xlu1 %5872  ;;  %v6513_v28 = vpop.permute.xlu0 %6512 }
 0xa55   : > { %v5886_v31 = vsel %vm1470_vm2, %v5857_v34, %v5873_v23  ;;  %v5894_v32 = vsel %vm1470_vm2, %v5873_v23, %v5857_v34  ;;  %v6288_v34 = vmul.f32 %v6270_v10, %v8701_v56  ;;  %v6526_v23 = vsel %vm1995_vm7, %v6497_v30, %v6513_v28 }
 0xa56   : > { %v5904_v53 = vmul.f32 %v5894_v32, %v8647_v45  ;;  %v5905_v35 = vmul.f32 %v5886_v31, %v8650_v20  ;;  %6518 = vrot.lane.b32.xlu1 %v10042_v1, %s11492_s30  ;;  %v6534_v10 = vsel %vm1995_vm7, %v6513_v28, %v6497_v30  ;;  %v6544_v12 = vmul.f32 %v6526_v23, %v8741_v16 }
 0xa57   : > { %6378 = vrot.lane.b32.xlu0 %v11527_v29, %s11490_s29 }
 0xa58   : > { %v5952_v61 = vmul.f32 %v11531_v27, %v5904_v53  ;;  %v5953_v40 = vmul.f32 %v11531_v27, %v5905_v35  ;;  %v6385_v33 = vpop.permute.xlu1 %6384  ;;  %v6641_v50 = vpop.permute.xlu0 %6640  ;;  %v11535_v35 = vld [vmem:[#allocation40_spill] sm:$0xff] }
 0xa59   : > { %v6398_v24 = vsel %vm1890_vm6, %v6369_v2, %v6385_v33  ;;  %v6406_v39 = vsel %vm1890_vm6, %v6385_v33, %v6369_v2  ;;  %v6654_v8 = vsel %vm2100_vm8, %v10449_v57, %v6641_v50  ;;  %v6662_v59 = vsel %vm2100_vm8, %v6641_v50, %v10449_v57  ;;  %v11534_v57 = vld [vmem:[#allocation38_spill] sm:$0xff]  ;;  %v11536_v33 = vld [vmem:[#allocation45_spill] sm:$0xff] }
 0xa5a   : > { %v5968_v51 = vadd.f32 %v5952_v61, %v5840_v21  ;;  %v5969_v17 = vadd.f32 %v5953_v40, %v5841_v60  ;;  %5864 = vrot.lane.b32.xlu1 %v10048_v46, %s8030_s17  ;;  %v6209_v2 = vmul.f32 %v11533_v3, %v6161_v62  ;;  %v6416_v32 = vmul.f32 %v6398_v24, %v8707_v36  ;;  %v11538_v3 = vld [vmem:[#allocation33_spill] sm:$0xff] }
 0xa5b   : > { %5882 = vrot.lane.b32.xlu0 %v11534_v57, %s8030_s17  ;;  %v6417_v18 = vmul.f32 %v6406_v39, %v8722_v25  ;;  %v6336_v21 = vmul.f32 %v11535_v35, %v6288_v34  ;;  %v6337_v60 = vmul.f32 %v11535_v35, %v6289_v9  ;;  %v6545_v62 = vmul.f32 %v6534_v10, %v8744_v7 }
 0xa5c   : > { %v6096_v52 = vadd.f32 %v6080_v26, %v5968_v51  ;;  %v6097_v31 = vadd.f32 %v6081_v41, %v5969_v17  ;;  %v5859_v11 = vpop.permute.xlu0 %5858  ;;  %v5731_v53 = vpop.permute.xlu1 %5730  ;;  %v6672_v27 = vmul.f32 %v10434_v6, %v6654_v8  ;;  %v6673_v61 = vmul.f32 %v10440_v4, %v6662_v59 }
 0xa5d   : > { %v6464_v9 = vmul.f32 %v11536_v33, %v6416_v32  ;;  %v6465_v50 = vmul.f32 %v11536_v33, %v6417_v18  ;;  %v6592_v26 = vmul.f32 %v11537_v13, %v6544_v12  ;;  %v6593_v41 = vmul.f32 %v11537_v13, %v6545_v62  ;;  %v11539_v12 = vld [vmem:[#allocation66_spill] sm:$0xff]  ;;  %v11540_v62 = vld [vmem:[#allocation65_spill] sm:$0xff] }
 0xa5e   : > { %v6224_v30 = vadd.f32 %v6208_v47, %v6096_v52  ;;  %v6225_v28 = vadd.f32 %v6209_v2, %v6097_v31  ;;  %5992 = vrot.lane.b32.xlu1 %v10048_v46, %s8027_s14  ;;  %v6720_v47 = vmul.f32 %v11538_v3, %v6672_v27  ;;  %v6721_v2 = vmul.f32 %v11538_v3, %v6673_v61 }
 0xa5f   : > { %6632 = vrot.lane.b32.xlu0 %v10048_v46, %s8034_s22  ;;  %v6660_v61 = vsel %vm2100_vm8, %v11539_v12, %v11540_v62 }
 0xa60   : > { %v6352_v40 = vadd.f32 %v6336_v21, %v6224_v30  ;;  %v6353_v34 = vadd.f32 %v6337_v60, %v6225_v28  ;;  %v6371_v24 = vpop.permute.xlu0 %6370  ;;  %v5987_v39 = vpop.permute.xlu1 %5986  ;;  %v6652_v30 = vsel %vm2100_vm8, %v11540_v62, %v11539_v12 }
 0xa62   : > { %v6480_v51 = vadd.f32 %v6464_v9, %v6352_v40  ;;  %v6481_v17 = vadd.f32 %v6465_v50, %v6353_v34  ;;  %6120 = vrot.lane.b32.xlu1 %v10048_v46, %s8029_s16  ;;  %v6668_v40 = vmul.f32 %v10434_v6, %v6652_v30  ;;  %v6669_v34 = vmul.f32 %v10440_v4, %v6660_v61  ;;  %v11541_v50 = vld [vmem:[#allocation27_spill] sm:$0xff] }
 0xa63   : > { %6394 = vrot.lane.b32.xlu0 %v11534_v57, %s11490_s29 }
 0xa64   : > { %v6608_v8 = vadd.f32 %v6592_v26, %v6480_v51  ;;  %v6609_v59 = vadd.f32 %v6593_v41, %v6481_v17  ;;  %v6115_v23 = vpop.permute.xlu1 %6114  ;;  %v5875_v10 = vpop.permute.xlu0 %5874  ;;  %v6717_v26 = vmul.f32 %v11541_v50, %v6669_v34  ;;  %v11545_v34 = vld [vmem:[#allocation12_spill] sm:$0xff] }
 0xa65   : > { %v5887_v52 = vsel %vm1470_vm2, %v5859_v11, %v5875_v10  ;;  %v5895_v31 = vsel %vm1470_vm2, %v5875_v10, %v5859_v11 }
 0xa66   : > { %v10567_v32 = vadd.f32 %v6720_v47, %v6608_v8  ;;  %v10569_v18 = vadd.f32 %v6721_v2, %v6609_v59  ;;  %6248 = vrot.lane.b32.xlu1 %v10048_v46, %s8031_s18  ;;  %v5906_v17 = vmul.f32 %v5895_v31, %v8647_v45  ;;  %v5907_v8 = vmul.f32 %v5887_v52, %v8650_v20  ;;  %v11542_v52 = vld [vmem:[#allocation18_spill] sm:$0xff] }
 0xa67   : > { %6648 = vrot.lane.b32.xlu0 %v10053_v55, %s8034_s22  ;;  %v10627_v2 = vadd.f32 %v6717_v26, %v10335_v38  ;;  %v11543_v31 = vld [vmem:[#allocation30_spill] sm:$0xff]  ;;  %v5715_v12 = vmul.f32 %v10020_v49, %v11542_v52 }
 0xa68   : > { %v10575_v35 = vpop.permute.xlu1 %6242  ;;  %v6387_v21 = vpop.permute.xlu0 %6386  ;;  %v5955_v38 = vmul.f32 %v11545_v34, %v5907_v8 }
 0xa69   : > { %v10579_v60 = vsel %vm1890_vm6, %v6371_v24, %v6387_v21  ;;  %v10583_v11 = vsel %vm1890_vm6, %v6387_v21, %v6371_v24  ;;  %v6716_v24 = vmul.f32 %v11541_v50, %v6668_v40  ;;  %v5714_v21 = vmul.f32 %v11543_v31, %v11542_v52  ;;  %v11546_v52 = vld [vmem:[#allocation23_spill] sm:$0xff] }
 0xa6a   : > { %6376 = vrot.lane.b32.xlu1 %v10048_v46, %s11490_s29  ;;  %v5954_v50 = vmul.f32 %v11545_v34, %v5906_v17  ;;  %v6749_v17 = vmul.f32 %v10627_v2, %v10627_v2 }
 0xa6b   : > { %v10611_v13 = vadd.f32 %v6716_v24, %v10333_v54 }
 0xa6c   : > { %v10591_v28 = vpop.permute.xlu1 %6498  ;;  %v10593_v27 = vpop.permute.xlu0 %5732 }
 0xa6d   : > { %v6748_v10 = vmul.f32 %v10611_v13, %v10611_v13 }
 0xa6e   : > { %6504 = vrot.lane.b32.xlu1 %v10048_v46, %s11492_s30 }
 0xa6f   : > { %v6756_v8 = vmul.f32 %v6748_v10, %v10611_v13 }
 0xa70   : > { %v10603_v33 = vpop.permute.xlu1 %6626  ;;  %v10605_v9 = vpop.permute.xlu0 %6116 }
 0xa72   : > { %5880 = vrot.lane.b32.xlu1 %v10053_v55, %s8030_s17 }
 0xa74   : > { %v5747_v41 = vpop.permute.xlu1 %5746  ;;  %v10614_v51 = vpop.permute.xlu0 %6244 }
 0xa75   : > { %v5759_v59 = vsel %vm1365_vm1, %v5731_v53, %v5747_v41  ;;  %v5767_v3 = vsel %vm1365_vm1, %v5747_v41, %v5731_v53  ;;  %v11544_v53 = vld [vmem:[#allocation4_spill] sm:$0xff] }
 0xa76   : > { %v5778_v47 = vmul.f32 %v5767_v3, %v8628_v5  ;;  %v5779_v54 = vmul.f32 %v5759_v59, %v8632_v63  ;;  %6392 = vrot.lane.b32.xlu1 %v10053_v55, %s11490_s29 }
 0xa78   : > { %v5826_v62 = vmul.f32 %v11544_v53, %v5778_v47  ;;  %v5827_v30 = vmul.f32 %v11544_v53, %v5779_v54  ;;  %v6003_v61 = vpop.permute.xlu1 %6002  ;;  %v10637_v40 = vpop.permute.xlu0 %6372 }
 0xa79   : > { %v6015_v24 = vsel %vm1575_vm3, %v5987_v39, %v6003_v61  ;;  %v6023_v26 = vsel %vm1575_vm3, %v6003_v61, %v5987_v39 }
 0xa7a   : > { %v5842_v41 = vadd.f32 %v5826_v62, %v5714_v21  ;;  %v5843_v59 = vadd.f32 %v5827_v30, %v5715_v12  ;;  %v6034_v49 = vmul.f32 %v6023_v26, %v8653_v43  ;;  %v6035_v3 = vmul.f32 %v6015_v24, %v8656_v15  ;;  %5738 = vrot.lane.b32.xlu1 %v11527_v29, %s8028_s15  ;;  %v11547_v24 = vld [vmem:[#allocation20_spill] sm:$0xff] }
 0xa7c   : > { %v5970_v47 = vadd.f32 %v5954_v50, %v5842_v41  ;;  %v5971_v54 = vadd.f32 %v5955_v38, %v5843_v59  ;;  %v6082_v31 = vmul.f32 %v11546_v52, %v6034_v49  ;;  %v6083_v39 = vmul.f32 %v11546_v52, %v6035_v3  ;;  %v6131_v21 = vpop.permute.xlu1 %6130  ;;  %v10654_v12 = vpop.permute.xlu0 %6500 }
 0xa7d   : > { %v6143_v53 = vsel %vm1680_vm4, %v6115_v23, %v6131_v21  ;;  %v6151_v62 = vsel %vm1680_vm4, %v6131_v21, %v6115_v23  ;;  %v6757_v50 = vmul.f32 %v6749_v17, %v10627_v2  ;;  %v6764_v38 = vmul.f32 0.044715, %v6756_v8 }
 0xa7e   : > { %v6098_v30 = vadd.f32 %v6082_v31, %v5970_v47  ;;  %v6099_v61 = vadd.f32 %v6083_v39, %v5971_v54  ;;  %v6162_v34 = vmul.f32 %v6151_v62, %v8686_v44  ;;  %v6163_v10 = vmul.f32 %v6143_v53, %v8689_v14  ;;  %5994 = vrot.lane.b32.xlu1 %v11527_v29, %s8027_s14  ;;  %v11548_v39 = vld [vmem:[#allocation7_spill] sm:$0xff] }
 0xa7f   : > { %v6418_v23 = vmul.f32 %v10579_v60, %v8707_v36  ;;  %v6419_v3 = vmul.f32 %v10583_v11, %v8722_v25  ;;  %v6765_v60 = vmul.f32 0.044715, %v6757_v50  ;;  %v6772_v11 = vadd.f32 %v6764_v38, %v10611_v13 }
 0xa80   : > { %v6210_v26 = vmul.f32 %v11547_v24, %v6162_v34  ;;  %v6211_v41 = vmul.f32 %v11547_v24, %v6163_v10  ;;  %v6259_v59 = vpop.permute.xlu1 %6258  ;;  %v5749_v49 = vpop.permute.xlu0 %5748  ;;  %v11549_v34 = vld [vmem:[#allocation25_spill] sm:$0xff] }
 0xa81   : > { %v6271_v47 = vsel %vm1785_vm5, %v10575_v35, %v6259_v59  ;;  %v6279_v17 = vsel %vm1785_vm5, %v6259_v59, %v10575_v35  ;;  %v6466_v10 = vmul.f32 %v11549_v34, %v6418_v23  ;;  %v6467_v35 = vmul.f32 %v11549_v34, %v6419_v3  ;;  %v11550_v3 = vld [vmem:[#allocation31_spill] sm:$0xff] }
 0xa82   : > { %v6226_v8 = vadd.f32 %v6210_v26, %v6098_v30  ;;  %v6227_v54 = vadd.f32 %v6211_v41, %v6099_v61  ;;  %v6290_v52 = vmul.f32 %v6271_v47, %v8701_v56  ;;  %v6291_v31 = vmul.f32 %v6279_v17, %v8704_v19  ;;  %6122 = vrot.lane.b32.xlu1 %v11527_v29, %s8029_s16 }
 0xa84   : > { %v6338_v21 = vmul.f32 %v11548_v39, %v6290_v52  ;;  %v6339_v53 = vmul.f32 %v11548_v39, %v6291_v31  ;;  %v6515_v62 = vpop.permute.xlu1 %6514  ;;  %v6133_v50 = vpop.permute.xlu0 %6132  ;;  %v6780_v31 = vmul.f32 0.7978846, %v6772_v11  ;;  %v6773_v39 = vadd.f32 %v6765_v60, %v10627_v2 }
 0xa85   : > { %v6527_v30 = vsel %vm1995_vm7, %v10591_v28, %v6515_v62  ;;  %v6535_v61 = vsel %vm1995_vm7, %v6515_v62, %v10591_v28 }
 0xa86   : > { %v6354_v24 = vadd.f32 %v6338_v21, %v6226_v8  ;;  %v6355_v38 = vadd.f32 %v6339_v53, %v6227_v54  ;;  %v6546_v26 = vmul.f32 %v6527_v30, %v8741_v16  ;;  %v6547_v41 = vmul.f32 %v6535_v61, %v8744_v7  ;;  %6250 = vrot.lane.b32.xlu1 %v11527_v29, %s8031_s18 }
 0xa87   : > { %7983 = vtanh.f32 %v6780_v31  ;;  %v6781_v60 = vmul.f32 0.7978846, %v6773_v39  ;;  %v11554_v31 = vld [vmem:[#allocation14_spill] sm:$0xff] }
 0xa88   : > { %v6482_v59 = vadd.f32 %v6466_v10, %v6354_v24  ;;  %v6483_v23 = vadd.f32 %v6467_v35, %v6355_v38  ;;  %v6594_v47 = vmul.f32 %v11550_v3, %v6546_v26  ;;  %v6595_v17 = vmul.f32 %v11550_v3, %v6547_v41  ;;  %v6643_v52 = vpop.permute.xlu1 %6642  ;;  %v11551_v10 = vld [vmem:[#allocation59_spill] sm:$0xff] }
 0xa89   : > { %v6655_v28 = vsel %vm2100_vm8, %v10603_v33, %v6643_v52  ;;  %v6663_v8 = vsel %vm2100_vm8, %v6643_v52, %v10603_v33  ;;  %v6261_v54 = vpop.permute.xlu0 %6260  ;;  %v5760_v38 = vsel %vm1365_vm1, %v10593_v27, %v5749_v49  ;;  %v5768_v26 = vsel %vm1365_vm1, %v5749_v49, %v10593_v27  ;;  %v11553_v52 = vld [vmem:[#allocation11_spill] sm:$0xff] }
 0xa8a   : > { %v6610_v21 = vadd.f32 %v6594_v47, %v6482_v59  ;;  %v6611_v53 = vadd.f32 %v6595_v17, %v6483_v23  ;;  %v6674_v62 = vmul.f32 %v10434_v6, %v6655_v28  ;;  %v6675_v34 = vmul.f32 %v10440_v4, %v6663_v8  ;;  %6506 = vrot.lane.b32.xlu1 %v11527_v29, %s11492_s30 }
 0xa8b   : > { %7985 = vtanh.f32 %v6781_v60  ;;  %v5780_v23 = vmul.f32 %v5768_v26, %v8628_v5  ;;  %v5781_v3 = vmul.f32 %v5760_v38, %v8632_v63  ;;  %v5716_v39 = vmul.f32 %v10028_v0, %v11554_v31 }
 0xa8c   : > { %v6722_v35 = vmul.f32 %v11551_v10, %v6674_v62  ;;  %v6723_v30 = vmul.f32 %v11551_v10, %v6675_v34  ;;  %v5861_v61 = vpop.permute.xlu1 %5860  ;;  %v6144_v10 = vsel %vm1680_vm4, %v10605_v9, %v6133_v50 }
 0xa8d   : > { %v6389_v24 = vpop.permute.xlu0 %6388  ;;  %v5828_v28 = vmul.f32 %v11553_v52, %v5780_v23  ;;  %v5829_v27 = vmul.f32 %v11553_v52, %v5781_v3  ;;  %v6272_v23 = vsel %vm1785_vm5, %v10614_v51, %v6261_v54 }
 0xa8e   : > { %v10711_v33 = vadd.f32 %v6722_v35, %v6610_v21  ;;  %v10713_v11 = vadd.f32 %v6723_v30, %v6611_v53  ;;  %5754 = vrot.lane.b32.xlu1 %v11534_v57, %s8028_s15  ;;  %v5717_v21 = vmul.f32 %v10030_v22, %v11554_v31  ;;  %v6152_v35 = vsel %vm1680_vm4, %v6133_v50, %v10605_v9  ;;  %v11555_v50 = vld [vmem:[#allocation6_spill] sm:$0xff] }
 0xa8f   : > { %v6750_v30 = vmul.f32 %v10457_v42, %v10457_v42  ;;  %v6280_v9 = vsel %vm1785_vm5, %v6261_v54, %v10614_v51  ;;  %v6164_v31 = vmul.f32 %v6152_v35, %v8686_v44  ;;  %v6400_v51 = vsel %vm1890_vm6, %v10637_v40, %v6389_v24 }
 0xa90   : > { %11552 = vst [vmem:[#allocation17_spill] sm:$0xff] %v10713_v11  ;;  %v5989_v41 = vpop.permute.xlu1 %5988  ;;  %v5845_v60 = vadd.f32 %v5829_v27, %v5717_v21  ;;  %v6408_v54 = vsel %vm1890_vm6, %v6389_v24, %v10637_v40 }
 0xa91   : > { %v6517_v59 = vpop.permute.xlu0 %6516  ;;  %v7984_v49 = vpop.eup %7983 }
 0xa92   : > { %6634 = vrot.lane.b32.xlu1 %v11527_v29, %s8034_s22  ;;  %v6796_v38 = vadd.f32 1.0, %v7984_v49  ;;  %v6528_v29 = vsel %vm1995_vm7, %v10654_v12, %v6517_v59 }
 0xa94   : > { %v6629_v47 = vpop.permute.xlu1 %6628 }
 0xa95   : > { %v10727_v17 = vpop.permute.xlu0 %5862  ;;  %v7986_v26 = vpop.eup %7985 }
 0xa96   : > { %6010 = vrot.lane.b32.xlu1 %v11534_v57, %s8027_s14  ;;  %v6797_v35 = vadd.f32 1.0, %v7986_v26 }
 0xa98   : > { %v5877_v8 = vpop.permute.xlu1 %5876 }
 0xa99   : > { %v5888_v53 = vsel %vm1470_vm2, %v5861_v61, %v5877_v8  ;;  %v5896_v62 = vsel %vm1470_vm2, %v5877_v8, %v5861_v61  ;;  %v10741_v34 = vpop.permute.xlu0 %5990  ;;  %v5844_v61 = vadd.f32 %v5828_v28, %v5716_v39  ;;  %v6165_v28 = vmul.f32 %v6144_v10, %v8689_v14 }
 0xa9a   : > { %v5908_v0 = vmul.f32 %v5896_v62, %v8647_v45  ;;  %v5909_v22 = vmul.f32 %v5888_v53, %v8650_v20  ;;  %6138 = vrot.lane.b32.xlu1 %v11534_v57, %s8029_s16  ;;  %v6292_v62 = vmul.f32 %v6272_v23, %v8701_v56  ;;  %v6293_v10 = vmul.f32 %v6280_v9, %v8704_v19 }
 0xa9b   : > { %v6536_v23 = vsel %vm1995_vm7, %v6517_v59, %v10654_v12  ;;  %v6548_v59 = vmul.f32 %v6528_v29, %v8741_v16  ;;  %v6758_v29 = vmul.f32 %v6750_v30, %v10457_v42 }
 0xa9c   : > { %v5956_v3 = vmul.f32 %v11555_v50, %v5908_v0  ;;  %v5957_v52 = vmul.f32 %v11555_v50, %v5909_v22  ;;  %v6005_v8 = vpop.permute.xlu1 %6004  ;;  %v11556_v50 = vld [vmem:[#allocation39_spill] sm:$0xff] }
 0xa9d   : > { %v6016_v27 = vsel %vm1575_vm3, %v5989_v41, %v6005_v8  ;;  %v6024_v49 = vsel %vm1575_vm3, %v6005_v8, %v5989_v41  ;;  %v10769_v39 = vpop.permute.xlu0 %6630  ;;  %v6751_v41 = vmul.f32 %v10459_v58, %v10459_v58  ;;  %v6766_v30 = vmul.f32 0.044715, %v6758_v29 }
 0xa9e   : > { %v6036_v21 = vmul.f32 %v6024_v49, %v8653_v43  ;;  %v6037_v53 = vmul.f32 %v6016_v27, %v8656_v15  ;;  %6266 = vrot.lane.b32.xlu1 %v11534_v57, %s8031_s18  ;;  %v5972_v0 = vadd.f32 %v5956_v3, %v5844_v61  ;;  %v5973_v22 = vadd.f32 %v5957_v52, %v5845_v60  ;;  %v11557_v61 = vld [vmem:[#allocation34_spill] sm:$0xff] }
 0xa9f   : > { %v6420_v27 = vmul.f32 %v6400_v51, %v8707_v36  ;;  %v6421_v49 = vmul.f32 %v6408_v54, %v8722_v25  ;;  %v6212_v60 = vmul.f32 %v11557_v61, %v6164_v31  ;;  %v6213_v9 = vmul.f32 %v11557_v61, %v6165_v28  ;;  %v11558_v51 = vld [vmem:[#allocation48_spill] sm:$0xff] }
 0xaa0   : > { %v6084_v8 = vmul.f32 %v11556_v50, %v6036_v21  ;;  %v6085_v40 = vmul.f32 %v11556_v50, %v6037_v53  ;;  %v6645_v24 = vpop.permute.xlu1 %6644  ;;  %v6340_v54 = vmul.f32 %v11558_v51, %v6292_v62  ;;  %v6341_v21 = vmul.f32 %v11558_v51, %v6293_v10  ;;  %v11559_v50 = vld [vmem:[#allocation53_spill] sm:$0xff] }
 0xaa1   : > { %v5879_v26 = vpop.permute.xlu0 %5878  ;;  %v6656_v53 = vsel %vm2100_vm8, %v6629_v47, %v6645_v24  ;;  %v6664_v12 = vsel %vm2100_vm8, %v6645_v24, %v6629_v47  ;;  %v6549_v31 = vmul.f32 %v6536_v23, %v8744_v7  ;;  %v6759_v47 = vmul.f32 %v6751_v41, %v10459_v58 }
 0xaa2   : > { %v6100_v3 = vadd.f32 %v6084_v8, %v5972_v0  ;;  %v6101_v52 = vadd.f32 %v6085_v40, %v5973_v22  ;;  %6522 = vrot.lane.b32.xlu1 %v11534_v57, %s11492_s30  ;;  %v6468_v8 = vmul.f32 %v11559_v50, %v6420_v27  ;;  %v6469_v40 = vmul.f32 %v11559_v50, %v6421_v49 }
 0xaa3   : > { %v6676_v51 = vmul.f32 %v10434_v6, %v6656_v53  ;;  %v6677_v11 = vmul.f32 %v10440_v4, %v6664_v12  ;;  %v6804_v24 = vmul.f32 0.5, %v6796_v38  ;;  %v6805_v23 = vmul.f32 0.5, %v6797_v35  ;;  %v11561_v12 = vld [vmem:[#allocation60_spill] sm:$0xff] }
 0xaa4   : > { %v6228_v28 = vadd.f32 %v6212_v60, %v6100_v3  ;;  %v6229_v0 = vadd.f32 %v6213_v9, %v6101_v52  ;;  %v5735_v22 = vpop.permute.xlu1 %5734  ;;  %v11560_v60 = vld [vmem:[#allocation57_spill] sm:$0xff] }
 0xaa5   : > { %v6007_v62 = vpop.permute.xlu0 %6006  ;;  %v6596_v27 = vmul.f32 %v11560_v60, %v6548_v59  ;;  %v6597_v49 = vmul.f32 %v11560_v60, %v6549_v31  ;;  %v6812_v41 = vmul.f32 %v6804_v24, %v10611_v13  ;;  %v6767_v59 = vmul.f32 0.044715, %v6759_v47 }
 0xaa6   : > { %v6356_v61 = vadd.f32 %v6340_v54, %v6228_v28  ;;  %v6357_v10 = vadd.f32 %v6341_v21, %v6229_v0  ;;  %6650 = vrot.lane.b32.xlu1 %v11534_v57, %s8034_s22  ;;  %v6724_v28 = vmul.f32 %v11561_v12, %v6676_v51  ;;  %v6725_v0 = vmul.f32 %v11561_v12, %v6677_v11 }
 0xaa7   : > { %v6813_v31 = vmul.f32 %v6805_v23, %v10627_v2  ;;  %v6775_v11 = vadd.f32 %v6767_v59, %v10459_v58  ;;  %v6025_v12 = vsel %vm1575_vm3, %v6007_v62, %v10741_v34 }
 0xaa8   : > { %v6484_v9 = vadd.f32 %v6468_v8, %v6356_v61  ;;  %v6485_v3 = vadd.f32 %v6469_v40, %v6357_v10  ;;  %v6119_v52 = vpop.permute.xlu1 %6118  ;;  %v6774_v10 = vadd.f32 %v6766_v30, %v10457_v42 }
 0xaa9   : > { %v10817_v54 = vpop.permute.xlu0 %6646 }
 0xaaa   : > { %v6612_v21 = vadd.f32 %v6596_v27, %v6484_v9  ;;  %v6613_v53 = vadd.f32 %v6597_v49, %v6485_v3  ;;  %v6782_v23 = vmul.f32 0.7978846, %v6774_v10  ;;  %v6783_v27 = vmul.f32 0.7978846, %v6775_v11 }
 0xaab   : > { %v5889_v9 = vsel %vm1470_vm2, %v10727_v17, %v5879_v26  ;;  %v5897_v3 = vsel %vm1470_vm2, %v5879_v26, %v10727_v17 }
 0xaac   : > { %v6740_v38 = vadd.f32 %v6724_v28, %v6612_v21  ;;  %v6741_v35 = vadd.f32 %v6725_v0, %v6613_v53  ;;  %v6247_v50 = vpop.permute.xlu1 %6246  ;;  %7987 = vtanh.f32 %v6782_v23  ;;  %v6017_v53 = vsel %vm1575_vm3, %v10741_v34, %v6007_v62 }
 0xaad   : > { %v10823_v8 = vpop.permute.xlu0 %5736  ;;  %7989 = vtanh.f32 %v6783_v27  ;;  %v5910_v17 = vmul.f32 %v5897_v3, %v8647_v45  ;;  %v5911_v26 = vmul.f32 %v5889_v9, %v8650_v20  ;;  %v6038_v62 = vmul.f32 %v6025_v12, %v8653_v43  ;;  %v11564_v3 = vld [vmem:[#allocation35_spill] sm:$0xff] }
 0xaae   : > { %v10825_v40 = vmul.f32 %v6812_v41, %v6740_v38  ;;  %v10827_v61 = vmul.f32 %v6813_v31, %v6741_v35  ;;  %v11562_v35 = vld [vmem:[#allocation13_spill] sm:$0xff]  ;;  %v11563_v31 = vld [vmem:[#allocation22_spill] sm:$0xff] }
 0xaaf   : > { %v5718_v59 = vmul.f32 %v10038_v37, %v11562_v35  ;;  %v5719_v34 = vmul.f32 %v10042_v1, %v11562_v35  ;;  %v5958_v37 = vmul.f32 %v11564_v3, %v5910_v17 }
 0xab0   : > { %v10830_v51 = vpop.permute.xlu1 %6374  ;;  %v11396_v13 = vand.u32 4294901760, %v10827_v61  ;;  %v11395_v29 = vand.u32 4294901760, %v10825_v40 }
 0xab1   : > { %v10835_v24 = vpop.permute.xlu0 %5752 }
 0xab2   : > { %v10840_v2 = vsub.f32 %v10827_v61, %v11396_v13  ;;  %v10845_v47 = vsub.f32 %v10825_v40, %v11395_v29 }
 0xab4   : > { %v10847_v60 = vpop.permute.xlu1 %6502 }
 0xab5   : > { %v10849_v49 = vpop.permute.xlu0 %6008 }
 0xab8   : > { %v5751_v21 = vpop.permute.xlu1 %5750 }
 0xab9   : > { %v5761_v28 = vsel %vm1365_vm1, %v5735_v22, %v5751_v21  ;;  %v5769_v0 = vsel %vm1365_vm1, %v5751_v21, %v5735_v22  ;;  %v10867_v30 = vpop.permute.xlu0 %6136  ;;  %v6039_v22 = vmul.f32 %v6017_v53, %v8656_v15  ;;  %v5959_v21 = vmul.f32 %v11564_v3, %v5911_v26 }
 0xaba   : > { %v5782_v41 = vmul.f32 %v5769_v0, %v8628_v5  ;;  %v5783_v38 = vmul.f32 %v5761_v28, %v8632_v63 }
 0xabc   : > { %v5830_v10 = vmul.f32 %v11563_v31, %v5782_v41  ;;  %v5831_v11 = vmul.f32 %v11563_v31, %v5783_v38  ;;  %v6135_v23 = vpop.permute.xlu1 %6134  ;;  %v11565_v41 = vld [vmem:[#allocation24_spill] sm:$0xff] }
 0xabd   : > { %v6145_v27 = vsel %vm1680_vm4, %v6119_v52, %v6135_v23  ;;  %v6153_v9 = vsel %vm1680_vm4, %v6135_v23, %v6119_v52  ;;  %v10887_v12 = vpop.permute.xlu0 %6264  ;;  %v6086_v38 = vmul.f32 %v11565_v41, %v6038_v62  ;;  %v6087_v35 = vmul.f32 %v11565_v41, %v6039_v22  ;;  %v7988_v52 = vpop.eup %7987  ;;  %v11566_v62 = vld [vmem:[#allocation44_spill] sm:$0xff] }
 0xabe   : > { %v5846_v1 = vadd.f32 %v5830_v10, %v5718_v59  ;;  %v5847_v28 = vadd.f32 %v5831_v11, %v5719_v34  ;;  %v6166_v53 = vmul.f32 %v6153_v9, %v8686_v44  ;;  %v6167_v0 = vmul.f32 %v6145_v27, %v8689_v14  ;;  %v7990_v59 = vpop.eup %7989 }
 0xabf   : > { %v6657_v9 = vsel %vm2100_vm8, %v10769_v39, %v10817_v54 }
 0xac0   : > { %v5974_v31 = vadd.f32 %v5958_v37, %v5846_v1  ;;  %v5975_v29 = vadd.f32 %v5959_v21, %v5847_v28  ;;  %v6263_v13 = vpop.permute.xlu1 %6262  ;;  %v6214_v27 = vmul.f32 %v11566_v62, %v6166_v53  ;;  %v6215_v22 = vmul.f32 %v11566_v62, %v6167_v0  ;;  %v11567_v28 = vld [vmem:[#allocation50_spill] sm:$0xff] }
 0xac1   : > { %v6273_v17 = vsel %vm1785_vm5, %v6247_v50, %v6263_v13  ;;  %v6281_v26 = vsel %vm1785_vm5, %v6263_v13, %v6247_v50  ;;  %v6665_v50 = vsel %vm2100_vm8, %v10817_v54, %v10769_v39  ;;  %v10909_v13 = vpop.permute.xlu0 %6520  ;;  %v6798_v54 = vadd.f32 1.0, %v7988_v52 }
 0xac2   : > { %v6102_v34 = vadd.f32 %v6086_v38, %v5974_v31  ;;  %v6103_v10 = vadd.f32 %v6087_v35, %v5975_v29  ;;  %v6294_v11 = vmul.f32 %v6273_v17, %v8701_v56  ;;  %v6295_v23 = vmul.f32 %v6281_v26, %v8704_v19  ;;  %v11568_v31 = vld [vmem:[#allocation47_spill] sm:$0xff] }
 0xac3   : > { %v6799_v38 = vadd.f32 1.0, %v7990_v59  ;;  %v6752_v35 = vmul.f32 %v10567_v32, %v10567_v32 }
 0xac4   : > { %v6391_v29 = vpop.permute.xlu1 %6390  ;;  %v6230_v3 = vadd.f32 %v6214_v27, %v6102_v34  ;;  %v6231_v37 = vadd.f32 %v6215_v22, %v6103_v10  ;;  %v6342_v53 = vmul.f32 %v11567_v28, %v6294_v11  ;;  %v6343_v0 = vmul.f32 %v11567_v28, %v6295_v23 }
 0xac5   : > { %v6401_v21 = vsel %vm1890_vm6, %v10830_v51, %v6391_v29  ;;  %v6409_v1 = vsel %vm1890_vm6, %v6391_v29, %v10830_v51  ;;  %v6678_v51 = vmul.f32 %v10434_v6, %v6657_v9  ;;  %v6679_v10 = vmul.f32 %v10440_v4, %v6665_v50  ;;  %v10933_v62 = vpop.permute.xlu0 %5866 }
 0xac6   : > { %v6422_v41 = vmul.f32 %v6401_v21, %v8707_v36  ;;  %v6423_v39 = vmul.f32 %v6409_v1, %v8722_v25  ;;  %v6358_v59 = vadd.f32 %v6342_v53, %v6230_v3  ;;  %v6359_v23 = vadd.f32 %v6343_v0, %v6231_v37  ;;  %v11569_v21 = vld [vmem:[#allocation54_spill] sm:$0xff]  ;;  %v11570_v37 = vld [vmem:[#allocation61_spill] sm:$0xff] }
 0xac7   : > { %v6753_v6 = vmul.f32 %v10569_v18, %v10569_v18  ;;  %v6806_v4 = vmul.f32 0.5, %v6798_v54  ;;  %v6807_v9 = vmul.f32 0.5, %v6799_v38  ;;  %v6760_v3 = vmul.f32 %v6752_v35, %v10567_v32 }
 0xac8   : > { %v6470_v17 = vmul.f32 %v11568_v31, %v6422_v41  ;;  %v6471_v26 = vmul.f32 %v11568_v31, %v6423_v39  ;;  %v6519_v34 = vpop.permute.xlu1 %6518  ;;  %v6726_v53 = vmul.f32 %v11570_v37, %v6678_v51  ;;  %v6727_v0 = vmul.f32 %v11570_v37, %v6679_v10 }
 0xac9   : > { %v6529_v11 = vsel %vm1995_vm7, %v10847_v60, %v6519_v34  ;;  %v6537_v52 = vsel %vm1995_vm7, %v6519_v34, %v10847_v60  ;;  %v6814_v31 = vmul.f32 %v6806_v4, %v10457_v42  ;;  %v6761_v54 = vmul.f32 %v6753_v6, %v10569_v18 }
 0xaca   : > { %v6550_v27 = vmul.f32 %v6529_v11, %v8741_v16  ;;  %v6551_v22 = vmul.f32 %v6537_v52, %v8744_v7  ;;  %v6486_v50 = vadd.f32 %v6470_v17, %v6358_v59  ;;  %v6487_v29 = vadd.f32 %v6471_v26, %v6359_v23  ;;  %v10948_v26 = vpop.permute.xlu0 %6378 }
 0xacb   : > { %v6815_v11 = vmul.f32 %v6807_v9, %v10459_v58  ;;  %v6768_v52 = vmul.f32 0.044715, %v6760_v3  ;;  %v6769_v23 = vmul.f32 0.044715, %v6761_v54  ;;  %v11571_v42 = vand.u32 4294901760, %v10827_v61 }
 0xacc   : > { %v6598_v1 = vmul.f32 %v11569_v21, %v6550_v27  ;;  %v6599_v28 = vmul.f32 %v11569_v21, %v6551_v22  ;;  %v10941_v60 = vpop.permute.xlu1 %5864  ;;  %v6940_v58 = vand.u32 4294901760, %v10845_v47  ;;  %v5762_v61 = vsel %vm1365_vm1, %v10823_v8, %v10835_v24 }
 0xacd   : > { %v6776_v22 = vadd.f32 %v6768_v52, %v10567_v32  ;;  %v6777_v9 = vadd.f32 %v6769_v23, %v10569_v18 }
 0xace   : > { %v6614_v41 = vadd.f32 %v6598_v1, %v6486_v50  ;;  %v6615_v39 = vadd.f32 %v6599_v28, %v6487_v29  ;;  %v10952_v50 = vpop.permute.xlu0 %5882  ;;  %v6934_v29 = vand.u32 4294901760, %v10840_v2  ;;  %v11572_v1 = vand.u32 4294901760, %v10825_v40 }
 0xacf   : > { %v6784_v37 = vmul.f32 0.7978846, %v6776_v22 }
 0xad0   : > { %v6742_v38 = vadd.f32 %v6726_v53, %v6614_v41  ;;  %v6743_v17 = vadd.f32 %v6727_v0, %v6615_v39  ;;  %v5993_v34 = vpop.permute.xlu1 %5992  ;;  %v5770_v53 = vsel %vm1365_vm1, %v10835_v24, %v10823_v8  ;;  %v6935_v40 = vsub.f32 %v10840_v2, %v6934_v29 }
 0xad1   : > { %v6941_v41 = vsub.f32 %v10845_v47, %v6940_v58  ;;  %7991 = vtanh.f32 %v6784_v37  ;;  %v5784_v52 = vmul.f32 %v5770_v53, %v8628_v5  ;;  %v6026_v37 = vsel %vm1575_vm3, %v10849_v49, %v5993_v34 }
 0xad2   : > { %v6822_v59 = vmul.f32 %v6814_v31, %v6742_v38  ;;  %v6823_v35 = vmul.f32 %v6815_v11, %v6743_v17  ;;  %v6785_v31 = vmul.f32 0.7978846, %v6777_v9  ;;  %v6633_v54 = vpop.permute.xlu0 %6632 }
 0xad3   : > { %v6942_v22 = vand.u32 4294901760, %v6941_v41 }
 0xad4   : > { %v6121_v51 = vpop.permute.xlu1 %6120  ;;  %v6841_v27 = vand.u32 4294901760, %v6823_v35  ;;  %v6843_v10 = vand.u32 4294901760, %v6822_v59  ;;  %7993 = vtanh.f32 %v6785_v31  ;;  %v11576_v31 = vld [vmem:[#allocation10_spill] sm:$0xff] }
 0xad6   : > { %v10956_v6 = vpack.c.bf16 %v6841_v27, %v11571_v42  ;;  %v10958_v4 = vsub.f32 %v6823_v35, %v6841_v27  ;;  %v10965_v28 = vpack.c.bf16 %v6843_v10, %v11572_v1  ;;  %v10967_v3 = vsub.f32 %v6822_v59, %v6843_v10 }
 0xad7   : > { %v5785_v59 = vmul.f32 %v5762_v61, %v8632_v63  ;;  %v6936_v27 = vand.u32 4294901760, %v6935_v40  ;;  %v6018_v1 = vsel %vm1575_vm3, %v5993_v34, %v10849_v49  ;;  %v6154_v61 = vsel %vm1680_vm4, %v10867_v30, %v6121_v51  ;;  %v11011_v40 = vpop.permute.xlu0 %6394 }
 0xad8   : > { %v6249_v21 = vpop.permute.xlu1 %6248  ;;  %7581 = vmatprep.subr.bf16.mxu1 %v10956_v6  ;;  %v6946_v0 = vand.u32 4294901760, %v10958_v4  ;;  %v6952_v39 = vand.u32 4294901760, %v10967_v3  ;;  %v5720_v49 = vmul.f32 %v10048_v46, %v11576_v31  ;;  %v5721_v34 = vmul.f32 %v10053_v55, %v11576_v31  ;;  %v11578_v31 = vld [vmem:[#allocation41_spill] sm:$0xff] }
 0xad9   : > { %7583 = vmatpush1.bf16.msra.mxu1 %v10965_v28  ;;  %v6274_v55 = vsel %vm1785_vm5, %v6249_v21, %v10887_v12 }
 0xada   : > { %v6947_v8 = vsub.f32 %v10958_v4, %v6946_v0  ;;  %v6953_v24 = vsub.f32 %v10967_v3, %v6952_v39  ;;  %v10991_v35 = vpack.c.bf16 %v6946_v0, %v6934_v29  ;;  %v10993_v23 = vpack.c.bf16 %v6952_v39, %v6940_v58  ;;  %v11575_v0 = vld [vmem:[#allocation3_spill] sm:$0xff] }
 0xadb   : > { %v6146_v58 = vsel %vm1680_vm4, %v6121_v51, %v10867_v30  ;;  %v5832_v41 = vmul.f32 %v11575_v0, %v5784_v52  ;;  %v5833_v39 = vmul.f32 %v11575_v0, %v5785_v59  ;;  %v6282_v52 = vsel %vm1785_vm5, %v10887_v12, %v6249_v21 }
 0xadc   : > { %v6377_v38 = vpop.permute.xlu1 %6376  ;;  %11573 = vst [vmem:[#allocation28_spill] sm:$0xff] %v10991_v35  ;;  %11574 = vst [vmem:[#allocation29_spill] sm:$0xff] %v10993_v23  ;;  %v6948_v10 = vand.u32 4294901760, %v6947_v8  ;;  %v6954_v42 = vand.u32 4294901760, %v6953_v24  ;;  %v6040_v8 = vmul.f32 %v6026_v37, %v8653_v43  ;;  %v6041_v24 = vmul.f32 %v6018_v1, %v8656_v15 }
 0xadd   : > { %v6169_v30 = vmul.f32 %v6146_v58, %v8689_v14  ;;  %v5848_v1 = vadd.f32 %v5832_v41, %v5720_v49  ;;  %v5849_v37 = vadd.f32 %v5833_v39, %v5721_v34  ;;  %v11577_v58 = vld [vmem:[#allocation46_spill] sm:$0xff]  ;;  %v6296_v23 = vmul.f32 %v6274_v55, %v8701_v56  ;;  %v11579_v49 = vld [vmem:[#allocation36_spill] sm:$0xff] }
 0xade   : > { %v11001_v53 = vpack.c.bf16 %v6948_v10, %v6936_v27  ;;  %v11003_v29 = vpack.c.bf16 %v6954_v42, %v6942_v22  ;;  %v6168_v10 = vmul.f32 %v6154_v61, %v8686_v44  ;;  %v7992_v42 = vpop.eup %7991  ;;  %v6088_v61 = vmul.f32 %v11577_v58, %v6040_v8 }
 0xadf   : > { %v6089_v0 = vmul.f32 %v11577_v58, %v6041_v24  ;;  %v6297_v12 = vmul.f32 %v6282_v52, %v8704_v19  ;;  %v7994_v39 = vpop.eup %7993  ;;  %v6217_v8 = vmul.f32 %v11579_v49, %v6169_v30  ;;  %v6800_v58 = vadd.f32 1.0, %v7992_v42 }
 0xae0   : > { %v6505_v9 = vpop.permute.xlu1 %6504  ;;  %v6216_v34 = vmul.f32 %v11579_v49, %v6168_v10 }
 0xae1   : > { %v6530_v52 = vsel %vm1995_vm7, %v6505_v9, %v10909_v13 }
 0xae4   : > { %v5881_v27 = vpop.permute.xlu1 %5880 }
 0xae5   : > { %v5890_v51 = vsel %vm1470_vm2, %v10941_v60, %v5881_v27  ;;  %v5898_v46 = vsel %vm1470_vm2, %v5881_v27, %v10941_v60  ;;  %v6649_v60 = vpop.permute.xlu0 %6648 }
 0xae6   : > { %v5912_v59 = vmul.f32 %v5898_v46, %v8647_v45  ;;  %v5913_v22 = vmul.f32 %v5890_v51, %v8650_v20  ;;  %v6658_v46 = vsel %vm2100_vm8, %v6633_v54, %v6649_v60  ;;  %v6666_v55 = vsel %vm2100_vm8, %v6649_v60, %v6633_v54 }
 0xae7   : > { %v6801_v54 = vadd.f32 1.0, %v7994_v39  ;;  %v6552_v60 = vmul.f32 %v6530_v52, %v8741_v16  ;;  %v11583_v52 = vld [vmem:[#allocation56_spill] sm:$0xff] }
 0xae8   : > { %v5960_v27 = vmul.f32 %v11578_v31, %v5912_v59  ;;  %v5961_v11 = vmul.f32 %v11578_v31, %v5913_v22  ;;  %v6393_v17 = vpop.permute.xlu1 %6392  ;;  %v11580_v22 = vld [vmem:[#allocation42_spill] sm:$0xff] }
 0xae9   : > { %v6402_v21 = vsel %vm1890_vm6, %v6377_v38, %v6393_v17  ;;  %v6410_v41 = vsel %vm1890_vm6, %v6393_v17, %v6377_v38  ;;  %v6538_v38 = vsel %vm1995_vm7, %v10909_v13, %v6505_v9  ;;  %v11068_v13 = vld [vmem:[%s11259_s1 + $0x10] ss:$0 sm:$0xff] }
 0xaea   : > { %v5976_v24 = vadd.f32 %v5960_v27, %v5848_v1  ;;  %v5977_v51 = vadd.f32 %v5961_v11, %v5849_v37  ;;  %v6424_v30 = vmul.f32 %v6402_v21, %v8707_v36  ;;  %v6425_v11 = vmul.f32 %v6410_v41, %v8722_v25 }
 0xaeb   : > { %v6344_v1 = vmul.f32 %v11580_v22, %v6296_v23  ;;  %v6345_v37 = vmul.f32 %v11580_v22, %v6297_v12  ;;  %v6553_v31 = vmul.f32 %v6538_v38, %v8744_v7  ;;  %v6680_v9 = vmul.f32 %v11068_v13, %v6658_v46  ;;  %v11074_v23 = vld [vmem:[%s11259_s1 + $0x18] ss:$0 sm:$0xff]  ;;  %v11584_v22 = vld [vmem:[#allocation64_spill] sm:$0xff] }
 0xaec   : > { %v6104_v17 = vadd.f32 %v6088_v61, %v5976_v24  ;;  %v6105_v10 = vadd.f32 %v6089_v0, %v5977_v51  ;;  %v5739_v59 = vpop.permute.xlu1 %5738  ;;  %v6681_v42 = vmul.f32 %v11074_v23, %v6666_v55  ;;  %v11581_v12 = vld [vmem:[#allocation49_spill] sm:$0xff]  ;;  %v6809_v51 = vmul.f32 0.5, %v6801_v54 }
 0xaed   : > { %v6472_v21 = vmul.f32 %v11581_v12, %v6424_v30  ;;  %v6473_v41 = vmul.f32 %v11581_v12, %v6425_v11  ;;  %v6808_v46 = vmul.f32 0.5, %v6800_v58  ;;  %v6600_v38 = vmul.f32 %v11583_v52, %v6552_v60 }
 0xaee   : > { %v6232_v27 = vadd.f32 %v6216_v34, %v6104_v17  ;;  %v6233_v49 = vadd.f32 %v6217_v8, %v6105_v10  ;;  %v6754_v34 = vmul.f32 %v10711_v33, %v10711_v33  ;;  %v11582_v8 = vld [vmem:[#allocation17_spill] sm:$0xff]  ;;  %v6601_v17 = vmul.f32 %v11583_v52, %v6553_v31 }
 0xaef   : > { %v6755_v24 = vmul.f32 %v11582_v8, %v11582_v8  ;;  %v6729_v30 = vmul.f32 %v11584_v22, %v6681_v42  ;;  %v6816_v12 = vmul.f32 %v6808_v46, %v10567_v32  ;;  %v6817_v60 = vmul.f32 %v6809_v51, %v10569_v18 }
 0xaf0   : > { %v6360_v61 = vadd.f32 %v6344_v1, %v6232_v27  ;;  %v6361_v0 = vadd.f32 %v6345_v37, %v6233_v49  ;;  %v5995_v39 = vpop.permute.xlu1 %5994  ;;  %v6728_v1 = vmul.f32 %v11584_v22, %v6680_v9  ;;  %v6762_v49 = vmul.f32 %v6754_v34, %v10711_v33 }
 0xaf1   : > { %v6763_v54 = vmul.f32 %v6755_v24, %v11582_v8 }
 0xaf2   : > { %v6488_v55 = vadd.f32 %v6472_v21, %v6360_v61  ;;  %v6489_v10 = vadd.f32 %v6473_v41, %v6361_v0  ;;  %v6770_v9 = vmul.f32 0.044715, %v6762_v49  ;;  %v11587_v49 = vld [vmem:[#allocation37_spill] sm:$0xff] }
 0xaf3   : > { %v6771_v42 = vmul.f32 0.044715, %v6763_v54 }
 0xaf4   : > { %v6616_v11 = vadd.f32 %v6600_v38, %v6488_v55  ;;  %v6617_v37 = vadd.f32 %v6601_v17, %v6489_v10  ;;  %v6123_v27 = vpop.permute.xlu1 %6122  ;;  %v6778_v41 = vadd.f32 %v6770_v9, %v10711_v33  ;;  %v5891_v17 = vsel %vm1470_vm2, %v10933_v62, %v10952_v50  ;;  %v11585_v10 = vld [vmem:[#allocation5_spill] sm:$0xff] }
 0xaf5   : > { %v6779_v34 = vadd.f32 %v6771_v42, %v11582_v8  ;;  %v5899_v55 = vsel %vm1470_vm2, %v10952_v50, %v10933_v62  ;;  %v11588_v50 = vld [vmem:[#allocation43_spill] sm:$0xff] }
 0xaf6   : > { %v6744_v58 = vadd.f32 %v6728_v1, %v6616_v11  ;;  %v6745_v35 = vadd.f32 %v6729_v30, %v6617_v37  ;;  %v6786_v46 = vmul.f32 0.7978846, %v6778_v41  ;;  %v11586_v37 = vld [vmem:[#allocation2_spill] sm:$0xff] }
 0xaf7   : > { %v5723_v62 = vmul.f32 %v11534_v57, %v11586_v37  ;;  %v6403_v57 = vsel %vm1890_vm6, %v10948_v26, %v11011_v40 }
 0xaf8   : > { %v6251_v31 = vpop.permute.xlu1 %6250  ;;  %v11091_v61 = vmul.f32 %v6817_v60, %v6745_v35  ;;  %v11093_v0 = vmul.f32 %v6816_v12, %v6744_v58  ;;  %v6787_v35 = vmul.f32 0.7978846, %v6779_v34  ;;  %7995 = vtanh.f32 %v6786_v46  ;;  %v11589_v34 = vld [vmem:[#allocation26_spill] sm:$0xff] }
 0xaf9   : > { %v5722_v12 = vmul.f32 %v11587_v49, %v11586_v37 }
 0xafa   : > { %7997 = vtanh.f32 %v6787_v35 }
 0xafc   : > { %v11095_v21 = vpop.permute.xlu1 %6506 }
 0xb00   : > { %v5755_v32 = vpop.permute.xlu1 %5754 }
 0xb01   : > { %v5763_v24 = vsel %vm1365_vm1, %v5739_v59, %v5755_v32  ;;  %v5771_v18 = vsel %vm1365_vm1, %v5755_v32, %v5739_v59  ;;  %v5914_v59 = vmul.f32 %v5899_v55, %v8647_v45 }
 0xb02   : > { %v5786_v51 = vmul.f32 %v5771_v18, %v8628_v5  ;;  %v5787_v52 = vmul.f32 %v5763_v24, %v8632_v63  ;;  %v5915_v5 = vmul.f32 %v5891_v17, %v8650_v20  ;;  %v7996_v35 = vpop.eup %7995 }
 0xb03   : > { %v5962_v54 = vmul.f32 %v11588_v50, %v5914_v59  ;;  %v6802_v37 = vadd.f32 1.0, %v7996_v35  ;;  %v6847_v35 = vand.u32 4294901760, %v11093_v0 }
 0xb04   : > { %v11105_v38 = vpop.permute.xlu1 %6634  ;;  %v5834_v63 = vmul.f32 %v11585_v10, %v5786_v51  ;;  %v5835_v22 = vmul.f32 %v11585_v10, %v5787_v52  ;;  %v5963_v58 = vmul.f32 %v11588_v50, %v5915_v5  ;;  %v7998_v52 = vpop.eup %7997  ;;  %v6426_v10 = vmul.f32 %v6403_v57, %v8707_v36 }
 0xb05   : > { %v6803_v49 = vadd.f32 1.0, %v7998_v52  ;;  %v6963_v48 = vsub.f32 %v11093_v0, %v6847_v35 }
 0xb06   : > { %v5850_v60 = vadd.f32 %v5834_v63, %v5722_v12  ;;  %v5851_v9 = vadd.f32 %v5835_v22, %v5723_v62 }
 0xb08   : > { %v6011_v1 = vpop.permute.xlu1 %6010  ;;  %v5978_v17 = vadd.f32 %v5962_v54, %v5850_v60 }
 0xb09   : > { %v6019_v30 = vsel %vm1575_vm3, %v5995_v39, %v6011_v1  ;;  %v6027_v11 = vsel %vm1575_vm3, %v6011_v1, %v5995_v39  ;;  %v6828_v39 = vld [vmem:[%s11270_s12] sm:$0xff] }
 0xb0a   : > { %v6042_v45 = vmul.f32 %v6027_v11, %v8653_v43  ;;  %v6043_v20 = vmul.f32 %v6019_v30, %v8656_v15  ;;  %v6411_v43 = vsel %vm1890_vm6, %v11011_v40, %v10948_v26  ;;  %v6832_v51 = vsel %vm6830_vm10, %v6828_v39, 0  ;;  %v11590_v40 = vld [vmem:[#allocation51_spill] sm:$0xff] }
 0xb0b   : > { %v5979_v26 = vadd.f32 %v5963_v58, %v5851_v9  ;;  %v11164_v12 = vand.u32 4294901760, %v6832_v51 }
 0xb0c   : > { %v6139_v42 = vpop.permute.xlu1 %6138  ;;  %v6090_v32 = vmul.f32 %v11589_v34, %v6042_v45  ;;  %v6091_v46 = vmul.f32 %v11589_v34, %v6043_v20  ;;  %v11591_v45 = vld [vmem:[#allocation55_spill] sm:$0xff] }
 0xb0d   : > { %v6147_v15 = vsel %vm1680_vm4, %v6123_v27, %v6139_v42  ;;  %v6155_v41 = vsel %vm1680_vm4, %v6139_v42, %v6123_v27  ;;  %v6829_v27 = vld [vmem:[%s11270_s12 + $0x8] sm:$0xff] }
 0xb0e   : > { %v6170_v24 = vmul.f32 %v6155_v41, %v8686_v44  ;;  %v6171_v18 = vmul.f32 %v6147_v15, %v8689_v14  ;;  %v6427_v44 = vmul.f32 %v6411_v43, %v8722_v25  ;;  %v6106_v22 = vadd.f32 %v6090_v32, %v5978_v17  ;;  %v11593_v32 = vld [vmem:[#allocation62_spill] sm:$0xff] }
 0xb0f   : > { %v6107_v1 = vadd.f32 %v6091_v46, %v5979_v26  ;;  %v6835_v36 = vsel %vm6830_vm10, %v6829_v27, 0  ;;  %v11180_v43 = vsub.f32 %v6832_v51, %v11164_v12  ;;  %v6810_v51 = vmul.f32 0.5, %v6802_v37 }
 0xb10   : > { %v6218_v55 = vmul.f32 %v11590_v40, %v6170_v24  ;;  %v6219_v59 = vmul.f32 %v11590_v40, %v6171_v18  ;;  %v6267_v5 = vpop.permute.xlu1 %6266  ;;  %v11182_v15 = vand.u32 4294901760, %v6835_v36  ;;  %v6811_v26 = vmul.f32 0.5, %v6803_v49 }
 0xb11   : > { %v6275_v14 = vsel %vm1785_vm5, %v6251_v31, %v6267_v5  ;;  %v6283_v63 = vsel %vm1785_vm5, %v6267_v5, %v6251_v31  ;;  %v11592_v31 = vld [vmem:[#allocation58_spill] sm:$0xff] }
 0xb12   : > { %v6298_v30 = vmul.f32 %v6275_v14, %v8701_v56  ;;  %v6299_v11 = vmul.f32 %v6283_v63, %v8704_v19  ;;  %v6234_v62 = vadd.f32 %v6218_v55, %v6106_v22  ;;  %v6235_v25 = vadd.f32 %v6219_v59, %v6107_v1  ;;  %v11594_v59 = vld [vmem:[#allocation63_spill] sm:$0xff] }
 0xb13   : > { %v6474_v58 = vmul.f32 %v11592_v31, %v6426_v10  ;;  %v6475_v60 = vmul.f32 %v11592_v31, %v6427_v44  ;;  %v11202_v44 = vsub.f32 %v6835_v36, %v11182_v15  ;;  %v6819_v63 = vmul.f32 %v6811_v26, %v11582_v8 }
 0xb14   : > { %v6346_v20 = vmul.f32 %v11591_v45, %v6298_v30  ;;  %v6347_v50 = vmul.f32 %v11591_v45, %v6299_v11  ;;  %v6523_v54 = vpop.permute.xlu1 %6522  ;;  %v6964_v11 = vand.u32 4294901760, %v6963_v48 }
 0xb15   : > { %v6531_v56 = vsel %vm1995_vm7, %v11095_v21, %v6523_v54  ;;  %v6539_v19 = vsel %vm1995_vm7, %v6523_v54, %v11095_v21 }
 0xb16   : > { %v6362_v9 = vadd.f32 %v6346_v20, %v6234_v62  ;;  %v6363_v42 = vadd.f32 %v6347_v50, %v6235_v25  ;;  %v6554_v39 = vmul.f32 %v6531_v56, %v8741_v16  ;;  %v6555_v57 = vmul.f32 %v6539_v19, %v8744_v7 }
 0xb17   : > { %v6845_v7 = vand.u32 4294901760, %v11091_v61  ;;  %v6965_v50 = vsub.f32 %v6963_v48, %v6964_v11 }
 0xb18   : > { %v6490_v41 = vadd.f32 %v6474_v58, %v6362_v9  ;;  %v6491_v34 = vadd.f32 %v6475_v60, %v6363_v42  ;;  %v6602_v46 = vmul.f32 %v11593_v32, %v6554_v39  ;;  %v6603_v24 = vmul.f32 %v11593_v32, %v6555_v57  ;;  %v6651_v18 = vpop.permute.xlu1 %6650 }
 0xb19   : > { %v6659_v21 = vsel %vm2100_vm8, %v11105_v38, %v6651_v18  ;;  %v6667_v16 = vsel %vm2100_vm8, %v6651_v18, %v11105_v38  ;;  %v6957_v10 = vsub.f32 %v11091_v61, %v6845_v7  ;;  %v6912_v38 = vand.u32 4294901760, %v11180_v43 }
 0xb1a   : > { %v6682_v52 = vmul.f32 %v11068_v13, %v6659_v21  ;;  %v6683_v17 = vmul.f32 %v11074_v23, %v6667_v16  ;;  %v6618_v40 = vadd.f32 %v6602_v46, %v6490_v41  ;;  %v6619_v55 = vadd.f32 %v6603_v24, %v6491_v34 }
 0xb1b   : > { %v6818_v13 = vmul.f32 %v6810_v51, %v10711_v33  ;;  %v6913_v30 = vsub.f32 %v11180_v43, %v6912_v38  ;;  %v6923_v61 = vand.u32 4294901760, %v11202_v44  ;;  %v6958_v0 = vand.u32 4294901760, %v6957_v10  ;;  %v11604_v51 = vld [vmem:[#allocation9_spill] sm:$0xff] }
 0xb1c   : > { %v6730_v5 = vmul.f32 %v11594_v59, %v6682_v52  ;;  %v6731_v27 = vmul.f32 %v11594_v59, %v6683_v17  ;;  %v6966_v34 = vand.u32 4294901760, %v6965_v50  ;;  %v11595_v46 = vmov 0.0  }
 0xb1d   : > { %v6914_v45 = vand.u32 4294901760, %v6913_v30  ;;  %v6924_v20 = vsub.f32 %v11202_v44, %v6923_v61  ;;  %v6959_v8 = vsub.f32 %v6957_v10, %v6958_v0  ;;  %v11597_v21 = vpack.c.bf16 %v10967_v3, %v10845_v47  ;;  %v11599_v47 = vld [vmem:[#allocation29_spill] sm:$0xff] }
 0xb1e   : > { %v6746_v14 = vadd.f32 %v6730_v5, %v6618_v40  ;;  %v6747_v23 = vadd.f32 %v6731_v27, %v6619_v55 }
 0xb1f   : > { %v6925_v39 = vand.u32 4294901760, %v6924_v20  ;;  %v6960_v57 = vand.u32 4294901760, %v6959_v8 }
 0xb20   : > { %v6826_v22 = vmul.f32 %v6818_v13, %v6746_v14  ;;  %v6827_v1 = vmul.f32 %v6819_v63, %v6747_v23 }
 0xb22   : > { %v6849_v37 = vand.u32 4294901760, %v6827_v1  ;;  %v6851_v49 = vand.u32 4294901760, %v6826_v22 }
 0xb24   : > { %v7584_v36 = vpack.c.bf16 %v6849_v37, %v6845_v7  ;;  %v6969_v62 = vsub.f32 %v6827_v1, %v6849_v37  ;;  %v7586_v25 = vpack.c.bf16 %v6851_v49, %v6847_v35  ;;  %v6975_v33 = vsub.f32 %v6826_v22, %v6851_v49  ;;  %v11603_v7 = vld [vmem:[#allocation8_spill] sm:$0xff] }
 0xb26   : > { %7585 = vmatprep.subr.bf16.mxu1 %v7584_v36  ;;  %v6970_v54 = vand.u32 4294901760, %v6969_v62  ;;  %v6976_v31 = vand.u32 4294901760, %v6975_v33  ;;  %v7600_v58 = vpack.c.bf16 %v6969_v62, %v6957_v10  ;;  %v7602_v60 = vpack.c.bf16 %v6975_v33, %v6963_v48 }
 0xb27   : > { %7587 = vmatpush1.bf16.msra.mxu1 %v7586_v25 }
 0xb28   : > { %7589 = vmatprep.subr.bf16.mxu1 %v11001_v53  ;;  %v6971_v56 = vsub.f32 %v6969_v62, %v6970_v54  ;;  %v6977_v19 = vsub.f32 %v6975_v33, %v6976_v31  ;;  %v7616_v9 = vpack.c.bf16 %v6970_v54, %v6958_v0  ;;  %v7618_v42 = vpack.c.bf16 %v6976_v31, %v6964_v11 }
 0xb29   : > { %v11596_v53 = vpack.c.bf16 %v10958_v4, %v10840_v2  ;;  %v11598_v2 = vld [vmem:[#allocation28_spill] sm:$0xff] }
 0xb2a   : > { %6915 = vmatmul.mubr.f32.vlgmr.msra.gmra.mrb[32].mxu1 %v6914_v45  ;;  %v6972_v41 = vand.u32 4294901760, %v6971_v56  ;;  %v6978_v32 = vand.u32 4294901760, %v6977_v19  ;;  %v11601_v4 = vld [vmem:[#allocation16_spill] sm:$0xff] }
 0xb2b   : > { %7591 = vmatpush1.bf16.msra.mxu1 %v11003_v29  ;;  %6920 = vmatprep.mubr.f32.mxu1 %v11595_v46  ;;  %v11602_v29 = vld [vmem:[#allocation21_spill] sm:$0xff] }
 0xb2c   : > { %v7592_v24 = vpack.c.bf16 %v6972_v41, %v6960_v57  ;;  %v7594_v18 = vpack.c.bf16 %v6978_v32, %v6966_v34 }
 0xb2e   : > { %6926 = vmatmul.mubr.f32.gmra.mrb[34].mxu1 %v6925_v39  ;;  %7593 = vmatprep.subr.bf16.mxu1 %v7592_v24 }
 0xb2f   : > { %7595 = vmatpush1.bf16.msra.mxu1 %v7594_v18  ;;  %7036 = vmatprep.mubr.f32.mxu1 %v11595_v46 }
 0xb30   : > { %7597 = vmatprep.subr.bf16.mxu1 %v11596_v53 }
 0xb32   : > { %7038 = vmatmul.mubr.f32.vlgmr.msra.gmra.mrb[32].mxu1 %v11164_v12 }
 0xb33   : > { %7599 = vmatpush1.bf16.msra.mxu1 %v11597_v21  ;;  %7043 = vmatprep.mubr.f32.mxu1 %v11595_v46 }
 0xb34   : > { %7601 = vmatprep.subr.bf16.mxu1 %v7600_v58 }
 0xb36   : > { %7045 = vmatmul.mubr.f32.gmra.mrb[34].mxu1 %v11182_v15 }
 0xb37   : > { %7603 = vmatpush1.bf16.msra.mxu1 %v7602_v60  ;;  %7131 = vmatprep.mubr.f32.mxu1 %v11595_v46 }
 0xb38   : > { %7605 = vmatprep.subr.bf16.mxu1 %v10956_v6 }
 0xb3a   : > { %7134 = vmatmul.mubr.f32.vlgmr.msra.gmra.mrb[32].mxu1 %v11180_v43 }
 0xb3b   : > { %7607 = vmatpush1.bf16.msra.mxu1 %v10965_v28  ;;  %7139 = vmatprep.mubr.f32.mxu1 %v11595_v46 }
 0xb3c   : > { %7609 = vmatprep.subr.bf16.mxu1 %v7584_v36 }
 0xb3e   : > { %7142 = vmatmul.mubr.f32.gmra.mrb[34].mxu1 %v11202_v44 }
 0xb3f   : > { %7611 = vmatpush1.bf16.msra.mxu1 %v7586_v25  ;;  %7220 = vmatprep.mubr.f32.mxu1 %v11595_v46 }
 0xb40   : > { %7613 = vmatprep.subr.bf16.mxu1 %v11598_v2 }
 0xb42   : > { %7224 = vmatmul.mubr.f32.vlgmr.msra.gmra.mrb[32].mxu1 %v6912_v38 }
 0xb43   : > { %7615 = vmatpush1.bf16.msra.mxu1 %v11599_v47  ;;  %7229 = vmatprep.mubr.f32.mxu1 %v11595_v46 }
 0xb44   : > { %7617 = vmatprep.subr.bf16.mxu1 %v7616_v9 }
 0xb46   : > { %7233 = vmatmul.mubr.f32.gmra.mrb[34].mxu1 %v6923_v61 }
 0xb47   : > { %7619 = vmatpush1.bf16.msra.mxu1 %v7618_v42  ;;  %7327 = vmatprep.mubr.f32.mxu1 %v11595_v46 }
 0xb48   : > { %7621 = vmatprep.subr.bf16.mxu1 %v10956_v6 }
 0xb4a   : > { %7329 = vmatmul.mubr.f32.vlgmr.msra.gmra.mrb[32].mxu1 %v11164_v12 }
 0xb4b   : > { %7623 = vmatpush1.bf16.msra.mxu1 %v10965_v28  ;;  %7334 = vmatprep.mubr.f32.mxu1 %v11595_v46 }
 0xb4c   : > { %7625 = vmatprep.subr.bf16.mxu1 %v7584_v36 }
 0xb4e   : > { %7336 = vmatmul.mubr.f32.gmra.mrb[34].mxu1 %v11182_v15 }
 0xb4f   : > { %7627 = vmatpush1.bf16.msra.mxu1 %v7586_v25  ;;  %7414 = vmatprep.mubr.f32.mxu1 %v11595_v46 }
 0xb52   : > { %7416 = vmatmul.mubr.f32.vlgmr.msra.gmra.mrb[32].mxu1 %v11164_v12 }
 0xb53   : > { %7421 = vmatprep.mubr.f32.mxu1 %v11595_v46 }
 0xb56   : > { %7423 = vmatmul.mubr.f32.gmra.mrb[34].mxu1 %v11182_v15 }
 0xc25   : > { %v7417_v6 = vpop.f32.mrb[32].mxu1 }
 0xc26   : > { %v7429_v28 = vadd.f32 %v7417_v6, %v11601_v4  ;;  %v7419_v3 = vpop.f32.mrb[33].mxu1 }
 0xc27   : > { %v7430_v43 = vadd.f32 %v7419_v3, %v11602_v29 }
 0xc28   : > { %7433 = vst [vmem:[%s440_s20] sm:$0xff] %v7429_v28 }
 0xc29   : > { %7434 = vst [vmem:[%s440_s20 + $0x8] sm:$0xff] %v7430_v43  ;;  %v7424_v16 = vpop.f32.mrb[34].mxu1 }
 0xc2a   : > { %v7431_v12 = vadd.f32 %v7424_v16, %v11603_v7  ;;  %v7426_v35 = vpop.f32.mrb[35].mxu1 }
 0xc2b   : > { %v7432_v52 = vadd.f32 %v7426_v35, %v11604_v51 }
 0xc2c   : > { %7435 = vst [vmem:[%s440_s20 + $0x10] sm:$0xff] %v7431_v12 }
 0xc2d   : > { %7436 = vst [vmem:[%s440_s20 + $0x18] sm:$0xff] %v7432_v52 }
 0xc2e PF: > { %s23_s25 = sadd.s32 1, %s8015_s25  }
 0xc2f   : > { %p20_p4 = scmp.ge.s32.totalorder %s23_s25, 4  }
 0xc31   :  { %22 = sbr.rel (!%p20_p4) target bundleno = 1 (0x1), region = 102 }

</bundles_post_ra>
